<compile_context>
chip_gen: v5e
topology: v5e:2x2
jax: 0.10.0
libtpu: 0.0.40
codegen_flags: <defaults>
</compile_context>

<pallas_src>
import functools
import math

import jax
import jax.numpy as jnp
from jax import lax
from jax.experimental import pallas as pl
from jax.experimental.pallas import tpu as pltpu

NEG_INF = -1000000000.0
LN_EPS = 1e-6


# ----------------------------- fused Block kernel -----------------------------

def _block_kernel(x_ref, y_ref, bx_ref, by_ref, bc_ref, xpb_ref, ypb_ref,
                  wmat_ref, wmid_ref, wfl_ref, wfa_ref,
                  b32_ref, b64_ref, bfl_ref, bfa_ref,
                  out_x_ref, out_y_ref,
                  *, nb, num_heads, Lx, Ly, H, FF):
    f32 = jnp.float32
    bf16 = jnp.bfloat16

    # --- row offsets inside the packed parameter slabs (must match block_forward) ---
    W_SA1, W_SGA1, W_SGA2 = 0, 4 * H, 8 * H              # 4 (H,H) mats per MHAtt
    W_FFN_SA1_W2, W_FFN_SGA_W2 = 12 * H, 12 * H + FF     # (FF,H) FFN second mats
    M_FFN_SA1, M_FFN_SGA, M_AFL, M_AFA = 0, H, 2 * H, 3 * H   # (H,FF) first mats
    R_HM = 0                                             # head-column masks
    R_SA1, R_SGA1, R_SGA2 = num_heads, num_heads + 4, num_heads + 8
    R_FFN_SA1_B2, R_FFN_SGA_B2 = num_heads + 12, num_heads + 13
    R_LN = num_heads + 14                                # 7 (gamma, beta) pairs

    x = x_ref[0]                 # (Rx, H) f32, Rx = nb*Lx (batch stacked on sublanes)
    y = y_ref[0]                 # (Ry, H)
    bx = bx_ref[0]               # (NH*Rx, Rx) additive (block-diag + key-pad) bias
    by = by_ref[0]               # (NH*Ry, Ry)
    bc = bc_ref[0]               # (NH*Ry, Rx)
    xpb = xpb_ref[0]             # (Rx, 1) AttFlat position bias
    ypb = ypb_ref[0]             # (Ry, 1)

    # hoisted: head-column masks, loaded once and reused by all three attentions
    hm_all = b32_ref[R_HM:R_HM + num_heads, :]           # (NH, H) f32
    hm = [hm_all[h:h + 1, :] for h in range(num_heads)]

    def mm(a, b):                # bf16 MXU operands, f32 accumulate
        return jnp.dot(a.astype(bf16), b.astype(bf16), preferred_element_type=f32)

    def mm_kk(a, b):             # contract last dim of a with last dim of b
        return lax.dot_general(a.astype(bf16), b.astype(bf16),
                               (((1,), (1,)), ((), ())), preferred_element_type=f32)

    def mhatt(q_in, k_in, v_in, attn_bias, w_off, b_off):
        wq = wmat_ref[w_off:w_off + H, :]
        wk = wmat_ref[w_off + H:w_off + 2 * H, :]
        wv = wmat_ref[w_off + 2 * H:w_off + 3 * H, :]
        wm = wmat_ref[w_off + 3 * H:w_off + 4 * H, :]
        bq = b32_ref[b_off:b_off + 1, :]
        bk = b32_ref[b_off + 1:b_off + 2, :]
        bv = b32_ref[b_off + 2:b_off + 3, :]
        bm = b32_ref[b_off + 3:b_off + 4, :]
        qh = mm(q_in, wq) + bq                      # (R, H)   (1/sqrt(d_k) folded)
        kh = mm(k_in, wk) + bk                      # (S, H)
        vh = mm(v_in, wv) + bv                      # (S, H)
        # All heads in two MXU pushes: head-column-masked copies of Q stacked on
        # sublanes -> one (NH*R, S) score matmul, one softmax, one PV matmul.
        q_stack = jnp.concatenate([qh * hm[h] for h in range(num_heads)], axis=0)
        s = mm_kk(q_stack, kh) + attn_bias          # (NH*R, S)
        s = s - jnp.max(s, axis=-1, keepdims=True)
        e = jnp.exp(s)
        p = e * pl.reciprocal(jnp.sum(e, axis=-1, keepdims=True), approx=True)
        pv = mm(p, vh)                              # (NH*R, H)
        R = q_in.shape[0]
        acc = pv[0:R, :] * hm[0]                    # fold heads (masked sublane adds)
        for h in range(1, num_heads):
            acc = acc + pv[h * R:(h + 1) * R, :] * hm[h]
        return mm(acc, wm) + bm

    def ffn(t, w1_off, b1_row, w2_off, b2_row):
        w1 = wmid_ref[w1_off:w1_off + H, :]         # (H, FF)
        b1 = b64_ref[b1_row:b1_row + 1, :]
        w2 = wmat_ref[w2_off:w2_off + FF, :]        # (FF, H)
        b2 = b32_ref[b2_row:b2_row + 1, :]
        hdn = jnp.maximum(mm(t, w1) + b1, 0.0)
        return mm(hdn, w2) + b2

    def add_ln(a, b, ln_pair):
        g = b32_ref[R_LN + 2 * ln_pair:R_LN + 2 * ln_pair + 1, :]
        beta = b32_ref[R_LN + 2 * ln_pair + 1:R_LN + 2 * ln_pair + 2, :]
        s = a + b
        mean = jnp.mean(s, axis=-1, keepdims=True)
        d = s - mean
        # torch.std convention: unbiased (n-1) variance, eps added outside the sqrt
        var = jnp.sum(d * d, axis=-1, keepdims=True) * (1.0 / (H - 1))
        return g * d / (jnp.sqrt(var) + LN_EPS) + beta

    def attflat(t, pos_bias, seq_len, w1_off, b1_row, wg_ref, bg_ref):
        w1 = wmid_ref[w1_off:w1_off + H, :]
        b1 = b64_ref[b1_row:b1_row + 1, :]
        hdn = jnp.maximum(mm(t, w1) + b1, 0.0)      # (nb*L, FF)
        att = mm(hdn, wg_ref[...]) + bg_ref[...]    # (nb*L, G), G == seq_len
        att = att + pos_bias                        # additive -1e9 at padded rows
        outs = []
        for b in range(nb):                         # per-sequence softmax + pooling
            ab = att[b * seq_len:(b + 1) * seq_len, :]
            tb = t[b * seq_len:(b + 1) * seq_len, :]
            ab = ab - jnp.max(ab, axis=0, keepdims=True)
            eb = jnp.exp(ab)
            pb = eb / jnp.sum(eb, axis=0, keepdims=True)   # exact: runs once/sequence
            # out[g, :] = sum_s pb[s, g] * t[s, :]   (kept in f32)
            outs.append(lax.dot_general(pb, tb, (((0,), (0,)), ((), ())),
                                        preferred_element_type=f32))
        return outs[0] if nb == 1 else jnp.concatenate(outs, axis=0)

    # ---- SA(x, x_mask) ----
    t = add_ln(x, mhatt(x, x, x, bx, W_SA1, R_SA1), 0)
    ax = add_ln(t, ffn(t, M_FFN_SA1, 0, W_FFN_SA1_W2, R_FFN_SA1_B2), 1)

    # ---- SGA(y, x, y_mask, x_mask) ----
    t = add_ln(y, mhatt(y, y, y, by, W_SGA1, R_SGA1), 2)
    t = add_ln(t, mhatt(t, x, x, bc, W_SGA2, R_SGA2), 3)   # q = y', k = v = x
    ay = add_ln(t, ffn(t, M_FFN_SGA, 1, W_FFN_SGA_W2, R_FFN_SGA_B2), 4)

    x2 = ax + x
    y2 = ay + y

    axf = attflat(x2, xpb, Lx, M_AFL, 2, wfl_ref, bfl_ref)   # (Rx, H)
    ayf = attflat(y2, ypb, Ly, M_AFA, 3, wfa_ref, bfa_ref)   # (Ry, H)

    # TODO(synk): dropout layers are identity (eval mode); no in-kernel RNG dropout.
    out_x_ref[0] = add_ln(x2, axf, 5)     # norm_l
    out_y_ref[0] = add_ln(y2, ayf, 6)     # norm_i


# ----------------------------- pallas_call wrapper -----------------------------

def _choose_batch_fold(B):
    """Batch elements per grid step.  1-TC chips (v5e/v6e) fold the whole batch
    into a single grid step; dual-TC chips (v4/v5p/v7x) keep a parallel grid."""
    kind = ""
    try:
        kind = jax.devices()[0].device_kind.lower()
    except Exception:
        pass
    two_cores = any(tag in kind for tag in ("v4", "v5p", "v7"))
    if two_cores and B % 2 == 0:
        return B // 2            # grid=(2,) "parallel": one step per TensorCore
    return B                     # single grid step, batch stacked on sublanes


def block_forward(p, x, y, x_pad, y_pad, num_heads, nb=None):
    B, Lx, H = x.shape
    Ly = y.shape[1]
    FF = p["sa1"]["ffn"][0].shape[1]
    dh = H // num_heads
    scale = 1.0 / math.sqrt(dh)
    f32, bf16 = jnp.float32, jnp.bfloat16

    if nb is None:
        nb = _choose_batch_fold(B)
    assert B % nb == 0
    G = B // nb
    Rx, Ry = nb * Lx, nb * Ly

    # ---- activations / masks grouped per grid step ----
    x_in = x.reshape(G, Rx, H)
    y_in = y.reshape(G, Ry, H)
    xp = x_pad.reshape(G, nb, Lx)
    yp = y_pad.reshape(G, nb, Ly)

    def attn_bias(k_pad, Lq):
        # additive bias; rows ordered (head, batch-in-step, q), cols (batch-in-step, k)
        gg, nb_, Lk = k_pad.shape
        same = jnp.eye(nb_, dtype=f32)                                     # (nb, nb)
        allowed = same[None, :, :, None] * (1.0 - k_pad)[:, None, :, :]    # (G,nb,nb,Lk)
        bias = (1.0 - allowed) * NEG_INF
        bias = jnp.broadcast_to(bias[:, None, :, None, :, :],
                                (gg, num_heads, nb_, Lq, nb_, Lk))
        return bias.reshape(gg, num_heads * nb_ * Lq, nb_ * Lk)

    bx = attn_bias(xp, Lx)                      # (G, NH*Rx, Rx)
    by = attn_bias(yp, Ly)                      # (G, NH*Ry, Ry)
    bc = attn_bias(xp, Ly)                      # (G, NH*Ry, Rx)  q = y', keys = x
    xpb = (x_pad * NEG_INF).reshape(G, Rx, 1)   # AttFlat position bias
    ypb = (y_pad * NEG_INF).reshape(G, Ry, 1)

    # ---- packed parameter slabs (order must match the kernel offsets) ----
    sa1, sga = p["sa1"], p["sa3"]

    def mh_mats(mp):   # fold 1/sqrt(d_k) into the q projection
        return [mp["wq"] * scale, mp["wk"], mp["wv"], mp["wm"]]

    def mh_bias(mp):
        return [mp["bq"] * scale, mp["bk"], mp["bv"], mp["bm"]]

    # (*,H)-column matrices: 4 MHAtt x 4 (H,H) mats, then 2 FFN (FF,H) mats   (bf16)
    wmat = jnp.concatenate(
        mh_mats(sa1["mhatt"]) + mh_mats(sga["mhatt1"]) + mh_mats(sga["mhatt2"])
        + [sa1["ffn"][2], sga["ffn"][2]], axis=0).astype(bf16)      # (12H+2FF, H)
    # (H,FF) MLP first-layer matrices (bf16)
    wmid = jnp.concatenate([sa1["ffn"][0], sga["ffn"][0],
                            p["att_lang"][0], p["att_audio"][0]],
                           axis=0).astype(bf16)                     # (4H, FF)
    wfl = p["att_lang"][2].astype(bf16)        # (FF, Lx)
    wfa = p["att_audio"][2].astype(bf16)       # (FF, Ly)

    # H-wide rows: head masks, MHAtt/FFN biases, all LayerNorm gamma/beta  (f32)
    head_mask = (jnp.arange(H)[None, :] // dh ==
                 jnp.arange(num_heads)[:, None]).astype(f32)        # (NH, H)
    b32 = jnp.concatenate(
        [head_mask] + mh_bias(sa1["mhatt"]) + mh_bias(sga["mhatt1"])
        + mh_bias(sga["mhatt2"])
        + [sa1["ffn"][3], sga["ffn"][3],
           sa1["ln1_g"], sa1["ln1_b"], sa1["ln2_g"], sa1["ln2_b"],
           sga["ln1_g"], sga["ln1_b"], sga["ln2_g"], sga["ln2_b"],
           sga["ln3_g"], sga["ln3_b"],
           p["norm_l_g"], p["norm_l_b"], p["norm_i_g"], p["norm_i_b"]],
        axis=0)                                                     # (NH+28, H)
    b64 = jnp.concatenate([sa1["ffn"][1], sga["ffn"][1],
                           p["att_lang"][1], p["att_audio"][1]], axis=0)   # (4, FF)
    bfl = p["att_lang"][3]                     # (1, Lx)
    bfa = p["att_audio"][3]                    # (1, Ly)

    # ---- specs ----
    def step_spec(shape):
        n = len(shape)
        return pl.BlockSpec((1,) + tuple(shape[1:]),
                            lambda g, _n=n: (g,) + (0,) * (_n - 1))

    def const_spec(shape):
        n = len(shape)
        return pl.BlockSpec(tuple(shape), lambda g, _n=n: (0,) * _n)

    batched = [x_in, y_in, bx, by, bc, xpb, ypb]
    shared = [wmat, wmid, wfl, wfa, b32, b64, bfl, bfa]
    in_specs = ([step_spec(a.shape) for a in batched]
                + [const_spec(a.shape) for a in shared])
    # Outputs stay (rows, H): at H=32 the sublane->lane relayout needed to present
    # 128-lane-dense rows would cost more than the ~6 masked stores it removes.
    out_specs = [step_spec((G, Rx, H)), step_spec((G, Ry, H))]
    out_shape = (jax.ShapeDtypeStruct((G, Rx, H), f32),
                 jax.ShapeDtypeStruct((G, Ry, H), f32))

    # advisory cost estimate for XLA scheduling around the custom call
    def mmf(m, k, n):
        return 2 * m * k * n
    per_b = (4 * mmf(Lx, H, H) + mmf(Lx, H, FF) + mmf(Lx, FF, H)
             + 8 * mmf(Ly, H, H) + mmf(Ly, H, FF) + mmf(Ly, FF, H)
             + 2 * num_heads * (mmf(Lx, H, Lx) + mmf(Ly, H, Ly) + mmf(Ly, H, Lx))
             + mmf(Lx, H, FF) + mmf(Lx, FF, Lx) + mmf(Lx, Lx, H)
             + mmf(Ly, H, FF) + mmf(Ly, FF, Ly) + mmf(Ly, Ly, H))
    transc = B * (num_heads * (Lx * Lx + Ly * Ly + Ly * Lx) + Lx * Lx + Ly * Ly)
    bytes_acc = int(sum(int(a.size) * a.dtype.itemsize for a in batched + shared)
                    + 4 * (B * Lx * H + B * Ly * H))
    cost = pl.CostEstimate(flops=int(B * per_b), transcendentals=int(transc),
                           bytes_accessed=bytes_acc)

    kernel = functools.partial(_block_kernel, nb=nb, num_heads=num_heads,
                               Lx=Lx, Ly=Ly, H=H, FF=FF)
    out_l, out_i = pl.pallas_call(
        kernel,
        out_shape=out_shape,
        grid=(G,),
        in_specs=in_specs,
        out_specs=out_specs,
        compiler_params=pltpu.CompilerParams(dimension_semantics=("parallel",)),
        cost_estimate=cost,
    )(*batched, *shared)
    return out_l.reshape(B, Lx, H), out_i.reshape(B, Ly, H)


# ----------------------------- parameter init -----------------------------

def init_linear(key, din, dout, scale=0.08):
    kw, kb = jax.random.split(key)
    return (scale * jax.random.normal(kw, (din, dout), jnp.float32),
            scale * jax.random.normal(kb, (1, dout), jnp.float32))


def init_mhatt(key, H):
    ks = jax.random.split(key, 4)
    wq, bq = init_linear(ks[0], H, H)
    wk, bk = init_linear(ks[1], H, H)
    wv, bv = init_linear(ks[2], H, H)
    wm, bm = init_linear(ks[3], H, H)
    return dict(wq=wq, bq=bq, wk=wk, bk=bk, wv=wv, bv=bv, wm=wm, bm=bm)


def init_mlp(key, din, dmid, dout):
    k1, k2 = jax.random.split(key)
    w1, b1 = init_linear(k1, din, dmid)
    w2, b2 = init_linear(k2, dmid, dout)
    return (w1, b1, w2, b2)


def init_ln(H):
    return jnp.ones((1, H), jnp.float32), jnp.zeros((1, H), jnp.float32)


def init_block_params(key, H, FF, Lx, Ly):
    ks = jax.random.split(key, 7)
    sa1 = dict(mhatt=init_mhatt(ks[0], H), ffn=init_mlp(ks[1], H, FF, H))
    sa1["ln1_g"], sa1["ln1_b"] = init_ln(H)
    sa1["ln2_g"], sa1["ln2_b"] = init_ln(H)
    sa3 = dict(mhatt1=init_mhatt(ks[2], H), mhatt2=init_mhatt(ks[3], H),
               ffn=init_mlp(ks[4], H, FF, H))
    for i in (1, 2, 3):
        sa3[f"ln{i}_g"], sa3[f"ln{i}_b"] = init_ln(H)
    p = dict(sa1=sa1, sa3=sa3,
             att_lang=init_mlp(ks[5], H, FF, Lx),     # flat_glimpse = lang_seq_len
             att_audio=init_mlp(ks[6], H, FF, Ly))    # flat_glimpse = audio_seq_len
    p["norm_l_g"], p["norm_l_b"] = init_ln(H)
    p["norm_i_g"], p["norm_i_b"] = init_ln(H)
    return p


# ----------------------------- pure-JAX reference -----------------------------

def ref_block(p, x, y, x_pad_bool, y_pad_bool, nh, cast_bf16):
    """Pure-JAX reference.  With cast_bf16=True, matmul operands are cast to
    bfloat16 (f32 accumulate) at the same points as the kernel; with False it is
    the faithful full-f32 semantics of the original PyTorch module."""
    f32, bf16 = jnp.float32, jnp.bfloat16

    def c(a):
        return a.astype(bf16) if cast_bf16 else a

    def mm(a, b):
        return jnp.dot(c(a), c(b), preferred_element_type=f32)

    def mhatt(mp, q, k, v, key_pad):
        B, Lq, H = q.shape
        dh = H // nh
        scale = 1.0 / math.sqrt(dh)

        def heads(t, w, b):
            o = mm(t, w) + b
            return o.reshape(B, -1, nh, dh).transpose(0, 2, 1, 3)

        qh = heads(q, mp["wq"] * scale, mp["bq"] * scale)   # scale folded like kernel
        kh = heads(k, mp["wk"], mp["bk"])
        vh = heads(v, mp["wv"], mp["bv"])
        s = jnp.einsum("bhqd,bhkd->bhqk", c(qh), c(kh), preferred_element_type=f32)
        s = jnp.where(key_pad[:, None, None, :], NEG_INF, s)
        att = jax.nn.softmax(s, axis=-1)
        o = jnp.einsum("bhqk,bhkd->bhqd", c(att), c(vh), preferred_element_type=f32)
        o = o.transpose(0, 2, 1, 3).reshape(B, Lq, H)
        return mm(o, mp["wm"]) + mp["bm"]

    def mlp(t, w1, b1, w2, b2):
        return mm(jnp.maximum(mm(t, w1) + b1, 0.0), w2) + b2

    def add_ln(a, b, g, beta):
        s = a + b
        mean = s.mean(-1, keepdims=True)
        d = s - mean
        var = (d * d).sum(-1, keepdims=True) / (s.shape[-1] - 1)
        return g * d / (jnp.sqrt(var) + LN_EPS) + beta

    def attflat(t, pad_bool, w1, b1, w2, b2):
        att = mlp(t, w1, b1, w2, b2)
        att = jnp.where(pad_bool[:, :, None], NEG_INF, att)
        att = jax.nn.softmax(att, axis=1)
        return jnp.einsum("blg,blh->bgh", att, t, preferred_element_type=f32)

    sa1, sga = p["sa1"], p["sa3"]
    t = add_ln(x, mhatt(sa1["mhatt"], x, x, x, x_pad_bool), sa1["ln1_g"], sa1["ln1_b"])
    ax = add_ln(t, mlp(t, *sa1["ffn"]), sa1["ln2_g"], sa1["ln2_b"])

    t = add_ln(y, mhatt(sga["mhatt1"], y, y, y, y_pad_bool), sga["ln1_g"], sga["ln1_b"])
    t = add_ln(t, mhatt(sga["mhatt2"], t, x, x, x_pad_bool), sga["ln2_g"], sga["ln2_b"])
    ay = add_ln(t, mlp(t, *sga["ffn"]), sga["ln3_g"], sga["ln3_b"])

    x2, y2 = ax + x, ay + y
    axf = attflat(x2, x_pad_bool, *p["att_lang"])
    ayf = attflat(y2, y_pad_bool, *p["att_audio"])
    return (add_ln(x2, axf, p["norm_l_g"], p["norm_l_b"]),
            add_ln(y2, ayf, p["norm_i_g"], p["norm_i_b"]))


# ----------------------------- main -----------------------------

if __name__ == "__main__":
    B, H, FF, NH = 2, 32, 64, 4
    Lx, Ly = 8, 16            # lang_seq_len, audio_seq_len

    key = jax.random.PRNGKey(0)
    kx, ky, kp = jax.random.split(key, 3)
    x = jax.random.normal(kx, (B, Lx, H), jnp.float32)
    y = jax.random.normal(ky, (B, Ly, H), jnp.float32)

    # padded positions (True = masked); valid lengths [Lx, 6] and [Ly, 12]
    x_pad_bool = jnp.arange(Lx)[None, :] >= jnp.array([Lx, 6])[:, None]
    y_pad_bool = jnp.arange(Ly)[None, :] >= jnp.array([Ly, 12])[:, None]
    x_pad = x_pad_bool.astype(jnp.float32)
    y_pad = y_pad_bool.astype(jnp.float32)

    params = init_block_params(kp, H, FF, Lx, Ly)

    block_fn = jax.jit(functools.partial(block_forward, num_heads=NH))
    out_l, out_i = block_fn(params, x, y, x_pad, y_pad)
    jax.block_until_ready((out_l, out_i))

    with jax.default_matmul_precision("highest"):
        # matched-precision reference (bf16 MXU operands, f32 accumulate/LN/softmax)
        m_l, m_i = ref_block(params, x, y, x_pad_bool, y_pad_bool, NH, cast_bf16=True)
        # faithful full-f32 reference (original module semantics)
        r_l, r_i = ref_block(params, x, y, x_pad_bool, y_pad_bool, NH, cast_bf16=False)

    err_m = max(float(jnp.max(jnp.abs(out_l - m_l))),
                float(jnp.max(jnp.abs(out_i - m_i))))
    err_f = max(float(jnp.max(jnp.abs(out_l - r_l))),
                float(jnp.max(jnp.abs(out_i - r_i))))
    # tight check vs the precision-matched reference (absorbs the EUP approximate
    # reciprocal and MXU accumulation-order differences)
    assert err_m < 1e-2, ("mismatch vs matched-precision reference", err_m)
    # loose sanity bound vs the pure-f32 reference (slack is the cost of bf16 MXU
    # operands, requested by the perf review for v6e/v7x)
    assert err_f < 2.5e-1, ("mismatch vs f32 reference", err_f)
    print("KERNEL_OK")
</pallas_src>

<mosaic_0001>
module attributes {stable_mosaic.version = 11 : i64} {
  func.func @_block_kernel(%arg0: i32, %arg1: memref<1x16x32xf32, #tpu.memory_space<vmem>>, %arg2: memref<1x32x32xf32, #tpu.memory_space<vmem>>, %arg3: memref<1x64x16xf32, #tpu.memory_space<vmem>>, %arg4: memref<1x128x32xf32, #tpu.memory_space<vmem>>, %arg5: memref<1x128x16xf32, #tpu.memory_space<vmem>>, %arg6: memref<1x16x1xf32, #tpu.memory_space<vmem>>, %arg7: memref<1x32x1xf32, #tpu.memory_space<vmem>>, %arg8: memref<512x32xbf16, #tpu.memory_space<vmem>>, %arg9: memref<128x64xbf16, #tpu.memory_space<vmem>>, %arg10: memref<64x8xbf16, #tpu.memory_space<vmem>>, %arg11: memref<64x16xbf16, #tpu.memory_space<vmem>>, %arg12: memref<32x32xf32, #tpu.memory_space<vmem>>, %arg13: memref<4x64xf32, #tpu.memory_space<vmem>>, %arg14: memref<1x8xf32, #tpu.memory_space<vmem>>, %arg15: memref<1x16xf32, #tpu.memory_space<vmem>>, %arg16: memref<1x16x32xf32, #tpu.memory_space<vmem>>, %arg17: memref<1x32x32xf32, #tpu.memory_space<vmem>>) attributes {dimension_semantics = [#tpu.dimension_semantics<parallel>], iteration_bounds = array<i64: 1>, scalar_prefetch = 0 : i64, scratch_operands = 0 : i64, tpu.core_type = #tpu.core_type<tc>, window_params = [{transform_indices = @transform_0, window_bounds = array<i64: 1, 16, 32>}, {transform_indices = @transform_1, window_bounds = array<i64: 1, 32, 32>}, {transform_indices = @transform_2, window_bounds = array<i64: 1, 64, 16>}, {transform_indices = @transform_3, window_bounds = array<i64: 1, 128, 32>}, {transform_indices = @transform_4, window_bounds = array<i64: 1, 128, 16>}, {transform_indices = @transform_5, window_bounds = array<i64: 1, 16, 1>}, {transform_indices = @transform_6, window_bounds = array<i64: 1, 32, 1>}, {pipeline_mode = #tpu.pipeline_mode<synchronous>, transform_indices = @transform_7, window_bounds = array<i64: 512, 32>}, {pipeline_mode = #tpu.pipeline_mode<synchronous>, transform_indices = @transform_8, window_bounds = array<i64: 128, 64>}, {pipeline_mode = #tpu.pipeline_mode<synchronous>, transform_indices = @transform_9, window_bounds = array<i64: 64, 8>}, {pipeline_mode = #tpu.pipeline_mode<synchronous>, transform_indices = @transform_10, window_bounds = array<i64: 64, 16>}, {pipeline_mode = #tpu.pipeline_mode<synchronous>, transform_indices = @transform_11, window_bounds = array<i64: 32, 32>}, {pipeline_mode = #tpu.pipeline_mode<synchronous>, transform_indices = @transform_12, window_bounds = array<i64: 4, 64>}, {pipeline_mode = #tpu.pipeline_mode<synchronous>, transform_indices = @transform_13, window_bounds = array<i64: 1, 8>}, {pipeline_mode = #tpu.pipeline_mode<synchronous>, transform_indices = @transform_14, window_bounds = array<i64: 1, 16>}, {transform_indices = @transform_15, window_bounds = array<i64: 1, 16, 32>}, {transform_indices = @transform_16, window_bounds = array<i64: 1, 32, 32>}]} {
    %c0 = arith.constant 0 : index
    %c0_0 = arith.constant 0 : index
    %c0_1 = arith.constant 0 : index
    %0 = vector.load %arg1[%c0, %c0_0, %c0_1] : memref<1x16x32xf32, #tpu.memory_space<vmem>>, vector<1x16x32xf32>
    %1 = vector.shape_cast %0 : vector<1x16x32xf32> to vector<16x32xf32>
    %c0_2 = arith.constant 0 : index
    %c0_3 = arith.constant 0 : index
    %c0_4 = arith.constant 0 : index
    %2 = vector.load %arg2[%c0_2, %c0_3, %c0_4] : memref<1x32x32xf32, #tpu.memory_space<vmem>>, vector<1x32x32xf32>
    %3 = vector.shape_cast %2 : vector<1x32x32xf32> to vector<32x32xf32>
    %c0_5 = arith.constant 0 : index
    %c0_6 = arith.constant 0 : index
    %c0_7 = arith.constant 0 : index
    %4 = vector.load %arg3[%c0_5, %c0_6, %c0_7] : memref<1x64x16xf32, #tpu.memory_space<vmem>>, vector<1x64x16xf32>
    %5 = vector.shape_cast %4 : vector<1x64x16xf32> to vector<64x16xf32>
    %c0_8 = arith.constant 0 : index
    %c0_9 = arith.constant 0 : index
    %c0_10 = arith.constant 0 : index
    %6 = vector.load %arg4[%c0_8, %c0_9, %c0_10] : memref<1x128x32xf32, #tpu.memory_space<vmem>>, vector<1x128x32xf32>
    %7 = vector.shape_cast %6 : vector<1x128x32xf32> to vector<128x32xf32>
    %c0_11 = arith.constant 0 : index
    %c0_12 = arith.constant 0 : index
    %c0_13 = arith.constant 0 : index
    %8 = vector.load %arg5[%c0_11, %c0_12, %c0_13] : memref<1x128x16xf32, #tpu.memory_space<vmem>>, vector<1x128x16xf32>
    %9 = vector.shape_cast %8 : vector<1x128x16xf32> to vector<128x16xf32>
    %c0_14 = arith.constant 0 : index
    %c0_15 = arith.constant 0 : index
    %c0_16 = arith.constant 0 : index
    %10 = vector.load %arg6[%c0_14, %c0_15, %c0_16] : memref<1x16x1xf32, #tpu.memory_space<vmem>>, vector<1x16x1xf32>
    %11 = vector.shape_cast %10 : vector<1x16x1xf32> to vector<16x1xf32>
    %c0_17 = arith.constant 0 : index
    %c0_18 = arith.constant 0 : index
    %c0_19 = arith.constant 0 : index
    %12 = vector.load %arg7[%c0_17, %c0_18, %c0_19] : memref<1x32x1xf32, #tpu.memory_space<vmem>>, vector<1x32x1xf32>
    %13 = vector.shape_cast %12 : vector<1x32x1xf32> to vector<32x1xf32>
    %c0_20 = arith.constant 0 : index
    %c0_21 = arith.constant 0 : index
    %14 = vector.load %arg12[%c0_20, %c0_21] : memref<32x32xf32, #tpu.memory_space<vmem>>, vector<4x32xf32>
    %15 = vector.extract_strided_slice %14 {offsets = [0, 0], sizes = [1, 32], strides = [1, 1]} : vector<4x32xf32> to vector<1x32xf32>
    %16 = vector.extract_strided_slice %14 {offsets = [1, 0], sizes = [1, 32], strides = [1, 1]} : vector<4x32xf32> to vector<1x32xf32>
    %17 = vector.extract_strided_slice %14 {offsets = [2, 0], sizes = [1, 32], strides = [1, 1]} : vector<4x32xf32> to vector<1x32xf32>
    %18 = vector.extract_strided_slice %14 {offsets = [3, 0], sizes = [1, 32], strides = [1, 1]} : vector<4x32xf32> to vector<1x32xf32>
    %c0_22 = arith.constant 0 : index
    %c0_23 = arith.constant 0 : index
    %19 = vector.load %arg8[%c0_22, %c0_23] : memref<512x32xbf16, #tpu.memory_space<vmem>>, vector<32x32xbf16>
    %c32 = arith.constant 32 : index
    %c0_24 = arith.constant 0 : index
    %20 = vector.load %arg8[%c32, %c0_24] : memref<512x32xbf16, #tpu.memory_space<vmem>>, vector<32x32xbf16>
    %c64 = arith.constant 64 : index
    %c0_25 = arith.constant 0 : index
    %21 = vector.load %arg8[%c64, %c0_25] : memref<512x32xbf16, #tpu.memory_space<vmem>>, vector<32x32xbf16>
    %c96 = arith.constant 96 : index
    %c0_26 = arith.constant 0 : index
    %22 = vector.load %arg8[%c96, %c0_26] : memref<512x32xbf16, #tpu.memory_space<vmem>>, vector<32x32xbf16>
    %c4 = arith.constant 4 : index
    %c0_27 = arith.constant 0 : index
    %23 = vector.load %arg12[%c4, %c0_27] : memref<32x32xf32, #tpu.memory_space<vmem>>, vector<1x32xf32>
    %c5 = arith.constant 5 : index
    %c0_28 = arith.constant 0 : index
    %24 = vector.load %arg12[%c5, %c0_28] : memref<32x32xf32, #tpu.memory_space<vmem>>, vector<1x32xf32>
    %c6 = arith.constant 6 : index
    %c0_29 = arith.constant 0 : index
    %25 = vector.load %arg12[%c6, %c0_29] : memref<32x32xf32, #tpu.memory_space<vmem>>, vector<1x32xf32>
    %c7 = arith.constant 7 : index
    %c0_30 = arith.constant 0 : index
    %26 = vector.load %arg12[%c7, %c0_30] : memref<32x32xf32, #tpu.memory_space<vmem>>, vector<1x32xf32>
    %27 = arith.truncf %1 : vector<16x32xf32> to vector<16x32xbf16>
    %cst = arith.constant dense<0.000000e+00> : vector<16x32xf32>
    %28 = tpu.matmul %27, %19, %cst {dimension_numbers = #tpu.dot_dimension_numbers<[1], [0], [0], [1], [0, 0, 1, 1], [], []>} : vector<16x32xbf16>, vector<32x32xbf16>, vector<16x32xf32> -> vector<16x32xf32>
    %29 = vector.broadcast %23 : vector<1x32xf32> to vector<16x32xf32>
    %30 = arith.addf %28, %29 : vector<16x32xf32>
    %31 = arith.truncf %1 : vector<16x32xf32> to vector<16x32xbf16>
    %cst_31 = arith.constant dense<0.000000e+00> : vector<16x32xf32>
    %32 = tpu.matmul %31, %20, %cst_31 {dimension_numbers = #tpu.dot_dimension_numbers<[1], [0], [0], [1], [0, 0, 1, 1], [], []>} : vector<16x32xbf16>, vector<32x32xbf16>, vector<16x32xf32> -> vector<16x32xf32>
    %33 = vector.broadcast %24 : vector<1x32xf32> to vector<16x32xf32>
    %34 = arith.addf %32, %33 : vector<16x32xf32>
    %35 = arith.truncf %1 : vector<16x32xf32> to vector<16x32xbf16>
    %cst_32 = arith.constant dense<0.000000e+00> : vector<16x32xf32>
    %36 = tpu.matmul %35, %21, %cst_32 {dimension_numbers = #tpu.dot_dimension_numbers<[1], [0], [0], [1], [0, 0, 1, 1], [], []>} : vector<16x32xbf16>, vector<32x32xbf16>, vector<16x32xf32> -> vector<16x32xf32>
    %37 = vector.broadcast %25 : vector<1x32xf32> to vector<16x32xf32>
    %38 = arith.addf %36, %37 : vector<16x32xf32>
    %39 = vector.broadcast %15 : vector<1x32xf32> to vector<16x32xf32>
    %40 = arith.mulf %30, %39 : vector<16x32xf32>
    %41 = vector.broadcast %16 : vector<1x32xf32> to vector<16x32xf32>
    %42 = arith.mulf %30, %41 : vector<16x32xf32>
    %43 = vector.broadcast %17 : vector<1x32xf32> to vector<16x32xf32>
    %44 = arith.mulf %30, %43 : vector<16x32xf32>
    %45 = vector.broadcast %18 : vector<1x32xf32> to vector<16x32xf32>
    %46 = arith.mulf %30, %45 : vector<16x32xf32>
    %47 = tpu.concatenate %40, %42, %44, %46 in 0 : vector<16x32xf32>, vector<16x32xf32>, vector<16x32xf32>, vector<16x32xf32> -> vector<64x32xf32>
    %48 = arith.truncf %47 : vector<64x32xf32> to vector<64x32xbf16>
    %49 = arith.truncf %34 : vector<16x32xf32> to vector<16x32xbf16>
    %cst_33 = arith.constant dense<0.000000e+00> : vector<64x16xf32>
    %50 = tpu.matmul %48, %49, %cst_33 {dimension_numbers = #tpu.dot_dimension_numbers<[1], [1], [0], [0], [0, 0, 1, 0], [], []>} : vector<64x32xbf16>, vector<16x32xbf16>, vector<64x16xf32> -> vector<64x16xf32>
    %51 = arith.addf %50, %5 : vector<64x16xf32>
    %cst_34 = arith.constant dense<0xFF800000> : vector<64xf32>
    %52 = vector.multi_reduction <maximumf>, %51, %cst_34 [1] : vector<64x16xf32> to vector<64xf32>
    %53 = vector.shape_cast %52 : vector<64xf32> to vector<64x1xf32>
    %54 = vector.broadcast %53 : vector<64x1xf32> to vector<64x16xf32>
    %55 = arith.subf %51, %54 : vector<64x16xf32>
    %56 = math.exp %55 : vector<64x16xf32>
    %cst_35 = arith.constant dense<0.000000e+00> : vector<64xf32>
    %57 = vector.multi_reduction <add>, %56, %cst_35 [1] : vector<64x16xf32> to vector<64xf32>
    %58 = vector.shape_cast %57 : vector<64xf32> to vector<64x1xf32>
    %59 = tpu.reciprocal %58 {approx = true} : vector<64x1xf32> -> vector<64x1xf32>
    %60 = vector.broadcast %59 : vector<64x1xf32> to vector<64x16xf32>
    %61 = arith.mulf %56, %60 : vector<64x16xf32>
    %62 = arith.truncf %61 : vector<64x16xf32> to vector<64x16xbf16>
    %63 = arith.truncf %38 : vector<16x32xf32> to vector<16x32xbf16>
    %cst_36 = arith.constant dense<0.000000e+00> : vector<64x32xf32>
    %64 = tpu.matmul %62, %63, %cst_36 {dimension_numbers = #tpu.dot_dimension_numbers<[1], [0], [0], [1], [0, 0, 1, 1], [], []>} : vector<64x16xbf16>, vector<16x32xbf16>, vector<64x32xf32> -> vector<64x32xf32>
    %65 = vector.extract_strided_slice %64 {offsets = [0, 0], sizes = [16, 32], strides = [1, 1]} : vector<64x32xf32> to vector<16x32xf32>
    %66 = vector.broadcast %15 : vector<1x32xf32> to vector<16x32xf32>
    %67 = arith.mulf %65, %66 : vector<16x32xf32>
    %68 = vector.extract_strided_slice %64 {offsets = [16, 0], sizes = [16, 32], strides = [1, 1]} : vector<64x32xf32> to vector<16x32xf32>
    %69 = vector.broadcast %16 : vector<1x32xf32> to vector<16x32xf32>
    %70 = arith.mulf %68, %69 : vector<16x32xf32>
    %71 = arith.addf %67, %70 : vector<16x32xf32>
    %72 = vector.extract_strided_slice %64 {offsets = [32, 0], sizes = [16, 32], strides = [1, 1]} : vector<64x32xf32> to vector<16x32xf32>
    %73 = vector.broadcast %17 : vector<1x32xf32> to vector<16x32xf32>
    %74 = arith.mulf %72, %73 : vector<16x32xf32>
    %75 = arith.addf %71, %74 : vector<16x32xf32>
    %76 = vector.extract_strided_slice %64 {offsets = [48, 0], sizes = [16, 32], strides = [1, 1]} : vector<64x32xf32> to vector<16x32xf32>
    %77 = vector.broadcast %18 : vector<1x32xf32> to vector<16x32xf32>
    %78 = arith.mulf %76, %77 : vector<16x32xf32>
    %79 = arith.addf %75, %78 : vector<16x32xf32>
    %80 = arith.truncf %79 : vector<16x32xf32> to vector<16x32xbf16>
    %cst_37 = arith.constant dense<0.000000e+00> : vector<16x32xf32>
    %81 = tpu.matmul %80, %22, %cst_37 {dimension_numbers = #tpu.dot_dimension_numbers<[1], [0], [0], [1], [0, 0, 1, 1], [], []>} : vector<16x32xbf16>, vector<32x32xbf16>, vector<16x32xf32> -> vector<16x32xf32>
    %82 = vector.broadcast %26 : vector<1x32xf32> to vector<16x32xf32>
    %83 = arith.addf %81, %82 : vector<16x32xf32>
    %c18 = arith.constant 18 : index
    %c0_38 = arith.constant 0 : index
    %84 = vector.load %arg12[%c18, %c0_38] : memref<32x32xf32, #tpu.memory_space<vmem>>, vector<1x32xf32>
    %c19 = arith.constant 19 : index
    %c0_39 = arith.constant 0 : index
    %85 = vector.load %arg12[%c19, %c0_39] : memref<32x32xf32, #tpu.memory_space<vmem>>, vector<1x32xf32>
    %86 = arith.addf %1, %83 : vector<16x32xf32>
    %cst_40 = arith.constant dense<0.000000e+00> : vector<16xf32>
    %87 = vector.multi_reduction <add>, %86, %cst_40 [1] : vector<16x32xf32> to vector<16xf32>
    %88 = vector.shape_cast %87 : vector<16xf32> to vector<16x1xf32>
    %cst_41 = arith.constant 3.200000e+01 : f32
    %89 = vector.broadcast %cst_41 : f32 to vector<16x1xf32>
    %90 = arith.divf %88, %89 : vector<16x1xf32>
    %91 = vector.broadcast %90 : vector<16x1xf32> to vector<16x32xf32>
    %92 = arith.subf %86, %91 : vector<16x32xf32>
    %93 = arith.mulf %92, %92 : vector<16x32xf32>
    %cst_42 = arith.constant dense<0.000000e+00> : vector<16xf32>
    %94 = vector.multi_reduction <add>, %93, %cst_42 [1] : vector<16x32xf32> to vector<16xf32>
    %95 = vector.shape_cast %94 : vector<16xf32> to vector<16x1xf32>
    %cst_43 = arith.constant 0.0322580636 : f32
    %96 = vector.broadcast %cst_43 : f32 to vector<16x1xf32>
    %97 = arith.mulf %95, %96 : vector<16x1xf32>
    %98 = vector.broadcast %84 : vector<1x32xf32> to vector<16x32xf32>
    %99 = arith.mulf %98, %92 : vector<16x32xf32>
    %100 = math.sqrt %97 : vector<16x1xf32>
    %cst_44 = arith.constant 9.99999997E-7 : f32
    %101 = vector.broadcast %cst_44 : f32 to vector<16x1xf32>
    %102 = arith.addf %100, %101 : vector<16x1xf32>
    %103 = vector.broadcast %102 : vector<16x1xf32> to vector<16x32xf32>
    %104 = arith.divf %99, %103 : vector<16x32xf32>
    %105 = vector.broadcast %85 : vector<1x32xf32> to vector<16x32xf32>
    %106 = arith.addf %104, %105 : vector<16x32xf32>
    %c0_45 = arith.constant 0 : index
    %c0_46 = arith.constant 0 : index
    %107 = vector.load %arg9[%c0_45, %c0_46] : memref<128x64xbf16, #tpu.memory_space<vmem>>, vector<32x64xbf16>
    %c0_47 = arith.constant 0 : index
    %c0_48 = arith.constant 0 : index
    %108 = vector.load %arg13[%c0_47, %c0_48] : memref<4x64xf32, #tpu.memory_space<vmem>>, vector<1x64xf32>
    %c384 = arith.constant 384 : index
    %c0_49 = arith.constant 0 : index
    %109 = vector.load %arg8[%c384, %c0_49] : memref<512x32xbf16, #tpu.memory_space<vmem>>, vector<64x32xbf16>
    %c16 = arith.constant 16 : index
    %c0_50 = arith.constant 0 : index
    %110 = vector.load %arg12[%c16, %c0_50] : memref<32x32xf32, #tpu.memory_space<vmem>>, vector<1x32xf32>
    %111 = arith.truncf %106 : vector<16x32xf32> to vector<16x32xbf16>
    %cst_51 = arith.constant dense<0.000000e+00> : vector<16x64xf32>
    %112 = tpu.matmul %111, %107, %cst_51 {dimension_numbers = #tpu.dot_dimension_numbers<[1], [0], [0], [1], [0, 0, 1, 1], [], []>} : vector<16x32xbf16>, vector<32x64xbf16>, vector<16x64xf32> -> vector<16x64xf32>
    %113 = vector.broadcast %108 : vector<1x64xf32> to vector<16x64xf32>
    %114 = arith.addf %112, %113 : vector<16x64xf32>
    %cst_52 = arith.constant 0.000000e+00 : f32
    %115 = vector.broadcast %cst_52 : f32 to vector<16x64xf32>
    %116 = arith.maximumf %114, %115 : vector<16x64xf32>
    %117 = arith.truncf %116 : vector<16x64xf32> to vector<16x64xbf16>
    %cst_53 = arith.constant dense<0.000000e+00> : vector<16x32xf32>
    %118 = tpu.matmul %117, %109, %cst_53 {dimension_numbers = #tpu.dot_dimension_numbers<[1], [0], [0], [1], [0, 0, 1, 1], [], []>} : vector<16x64xbf16>, vector<64x32xbf16>, vector<16x32xf32> -> vector<16x32xf32>
    %119 = vector.broadcast %110 : vector<1x32xf32> to vector<16x32xf32>
    %120 = arith.addf %118, %119 : vector<16x32xf32>
    %c20 = arith.constant 20 : index
    %c0_54 = arith.constant 0 : index
    %121 = vector.load %arg12[%c20, %c0_54] : memref<32x32xf32, #tpu.memory_space<vmem>>, vector<1x32xf32>
    %c21 = arith.constant 21 : index
    %c0_55 = arith.constant 0 : index
    %122 = vector.load %arg12[%c21, %c0_55] : memref<32x32xf32, #tpu.memory_space<vmem>>, vector<1x32xf32>
    %123 = arith.addf %106, %120 : vector<16x32xf32>
    %cst_56 = arith.constant dense<0.000000e+00> : vector<16xf32>
    %124 = vector.multi_reduction <add>, %123, %cst_56 [1] : vector<16x32xf32> to vector<16xf32>
    %125 = vector.shape_cast %124 : vector<16xf32> to vector<16x1xf32>
    %cst_57 = arith.constant 3.200000e+01 : f32
    %126 = vector.broadcast %cst_57 : f32 to vector<16x1xf32>
    %127 = arith.divf %125, %126 : vector<16x1xf32>
    %128 = vector.broadcast %127 : vector<16x1xf32> to vector<16x32xf32>
    %129 = arith.subf %123, %128 : vector<16x32xf32>
    %130 = arith.mulf %129, %129 : vector<16x32xf32>
    %cst_58 = arith.constant dense<0.000000e+00> : vector<16xf32>
    %131 = vector.multi_reduction <add>, %130, %cst_58 [1] : vector<16x32xf32> to vector<16xf32>
    %132 = vector.shape_cast %131 : vector<16xf32> to vector<16x1xf32>
    %cst_59 = arith.constant 0.0322580636 : f32
    %133 = vector.broadcast %cst_59 : f32 to vector<16x1xf32>
    %134 = arith.mulf %132, %133 : vector<16x1xf32>
    %135 = vector.broadcast %121 : vector<1x32xf32> to vector<16x32xf32>
    %136 = arith.mulf %135, %129 : vector<16x32xf32>
    %137 = math.sqrt %134 : vector<16x1xf32>
    %cst_60 = arith.constant 9.99999997E-7 : f32
    %138 = vector.broadcast %cst_60 : f32 to vector<16x1xf32>
    %139 = arith.addf %137, %138 : vector<16x1xf32>
    %140 = vector.broadcast %139 : vector<16x1xf32> to vector<16x32xf32>
    %141 = arith.divf %136, %140 : vector<16x32xf32>
    %142 = vector.broadcast %122 : vector<1x32xf32> to vector<16x32xf32>
    %143 = arith.addf %141, %142 : vector<16x32xf32>
    %c128 = arith.constant 128 : index
    %c0_61 = arith.constant 0 : index
    %144 = vector.load %arg8[%c128, %c0_61] : memref<512x32xbf16, #tpu.memory_space<vmem>>, vector<32x32xbf16>
    %c160 = arith.constant 160 : index
    %c0_62 = arith.constant 0 : index
    %145 = vector.load %arg8[%c160, %c0_62] : memref<512x32xbf16, #tpu.memory_space<vmem>>, vector<32x32xbf16>
    %c192 = arith.constant 192 : index
    %c0_63 = arith.constant 0 : index
    %146 = vector.load %arg8[%c192, %c0_63] : memref<512x32xbf16, #tpu.memory_space<vmem>>, vector<32x32xbf16>
    %c224 = arith.constant 224 : index
    %c0_64 = arith.constant 0 : index
    %147 = vector.load %arg8[%c224, %c0_64] : memref<512x32xbf16, #tpu.memory_space<vmem>>, vector<32x32xbf16>
    %c8 = arith.constant 8 : index
    %c0_65 = arith.constant 0 : index
    %148 = vector.load %arg12[%c8, %c0_65] : memref<32x32xf32, #tpu.memory_space<vmem>>, vector<1x32xf32>
    %c9 = arith.constant 9 : index
    %c0_66 = arith.constant 0 : index
    %149 = vector.load %arg12[%c9, %c0_66] : memref<32x32xf32, #tpu.memory_space<vmem>>, vector<1x32xf32>
    %c10 = arith.constant 10 : index
    %c0_67 = arith.constant 0 : index
    %150 = vector.load %arg12[%c10, %c0_67] : memref<32x32xf32, #tpu.memory_space<vmem>>, vector<1x32xf32>
    %c11 = arith.constant 11 : index
    %c0_68 = arith.constant 0 : index
    %151 = vector.load %arg12[%c11, %c0_68] : memref<32x32xf32, #tpu.memory_space<vmem>>, vector<1x32xf32>
    %152 = arith.truncf %3 : vector<32x32xf32> to vector<32x32xbf16>
    %cst_69 = arith.constant dense<0.000000e+00> : vector<32x32xf32>
    %153 = tpu.matmul %152, %144, %cst_69 {dimension_numbers = #tpu.dot_dimension_numbers<[1], [0], [0], [1], [0, 0, 1, 1], [], []>} : vector<32x32xbf16>, vector<32x32xbf16>, vector<32x32xf32> -> vector<32x32xf32>
    %154 = vector.broadcast %148 : vector<1x32xf32> to vector<32x32xf32>
    %155 = arith.addf %153, %154 : vector<32x32xf32>
    %156 = arith.truncf %3 : vector<32x32xf32> to vector<32x32xbf16>
    %cst_70 = arith.constant dense<0.000000e+00> : vector<32x32xf32>
    %157 = tpu.matmul %156, %145, %cst_70 {dimension_numbers = #tpu.dot_dimension_numbers<[1], [0], [0], [1], [0, 0, 1, 1], [], []>} : vector<32x32xbf16>, vector<32x32xbf16>, vector<32x32xf32> -> vector<32x32xf32>
    %158 = vector.broadcast %149 : vector<1x32xf32> to vector<32x32xf32>
    %159 = arith.addf %157, %158 : vector<32x32xf32>
    %160 = arith.truncf %3 : vector<32x32xf32> to vector<32x32xbf16>
    %cst_71 = arith.constant dense<0.000000e+00> : vector<32x32xf32>
    %161 = tpu.matmul %160, %146, %cst_71 {dimension_numbers = #tpu.dot_dimension_numbers<[1], [0], [0], [1], [0, 0, 1, 1], [], []>} : vector<32x32xbf16>, vector<32x32xbf16>, vector<32x32xf32> -> vector<32x32xf32>
    %162 = vector.broadcast %150 : vector<1x32xf32> to vector<32x32xf32>
    %163 = arith.addf %161, %162 : vector<32x32xf32>
    %164 = vector.broadcast %15 : vector<1x32xf32> to vector<32x32xf32>
    %165 = arith.mulf %155, %164 : vector<32x32xf32>
    %166 = vector.broadcast %16 : vector<1x32xf32> to vector<32x32xf32>
    %167 = arith.mulf %155, %166 : vector<32x32xf32>
    %168 = vector.broadcast %17 : vector<1x32xf32> to vector<32x32xf32>
    %169 = arith.mulf %155, %168 : vector<32x32xf32>
    %170 = vector.broadcast %18 : vector<1x32xf32> to vector<32x32xf32>
    %171 = arith.mulf %155, %170 : vector<32x32xf32>
    %172 = tpu.concatenate %165, %167, %169, %171 in 0 : vector<32x32xf32>, vector<32x32xf32>, vector<32x32xf32>, vector<32x32xf32> -> vector<128x32xf32>
    %173 = arith.truncf %172 : vector<128x32xf32> to vector<128x32xbf16>
    %174 = arith.truncf %159 : vector<32x32xf32> to vector<32x32xbf16>
    %cst_72 = arith.constant dense<0.000000e+00> : vector<128x32xf32>
    %175 = tpu.matmul %173, %174, %cst_72 {dimension_numbers = #tpu.dot_dimension_numbers<[1], [1], [0], [0], [0, 0, 1, 0], [], []>} : vector<128x32xbf16>, vector<32x32xbf16>, vector<128x32xf32> -> vector<128x32xf32>
    %176 = arith.addf %175, %7 : vector<128x32xf32>
    %cst_73 = arith.constant dense<0xFF800000> : vector<128xf32>
    %177 = vector.multi_reduction <maximumf>, %176, %cst_73 [1] : vector<128x32xf32> to vector<128xf32>
    %178 = vector.shape_cast %177 : vector<128xf32> to vector<128x1xf32>
    %179 = vector.broadcast %178 : vector<128x1xf32> to vector<128x32xf32>
    %180 = arith.subf %176, %179 : vector<128x32xf32>
    %181 = math.exp %180 : vector<128x32xf32>
    %cst_74 = arith.constant dense<0.000000e+00> : vector<128xf32>
    %182 = vector.multi_reduction <add>, %181, %cst_74 [1] : vector<128x32xf32> to vector<128xf32>
    %183 = vector.shape_cast %182 : vector<128xf32> to vector<128x1xf32>
    %184 = tpu.reciprocal %183 {approx = true} : vector<128x1xf32> -> vector<128x1xf32>
    %185 = vector.broadcast %184 : vector<128x1xf32> to vector<128x32xf32>
    %186 = arith.mulf %181, %185 : vector<128x32xf32>
    %187 = arith.truncf %186 : vector<128x32xf32> to vector<128x32xbf16>
    %188 = arith.truncf %163 : vector<32x32xf32> to vector<32x32xbf16>
    %cst_75 = arith.constant dense<0.000000e+00> : vector<128x32xf32>
    %189 = tpu.matmul %187, %188, %cst_75 {dimension_numbers = #tpu.dot_dimension_numbers<[1], [0], [0], [1], [0, 0, 1, 1], [], []>} : vector<128x32xbf16>, vector<32x32xbf16>, vector<128x32xf32> -> vector<128x32xf32>
    %190 = vector.extract_strided_slice %189 {offsets = [0, 0], sizes = [32, 32], strides = [1, 1]} : vector<128x32xf32> to vector<32x32xf32>
    %191 = vector.broadcast %15 : vector<1x32xf32> to vector<32x32xf32>
    %192 = arith.mulf %190, %191 : vector<32x32xf32>
    %193 = vector.extract_strided_slice %189 {offsets = [32, 0], sizes = [32, 32], strides = [1, 1]} : vector<128x32xf32> to vector<32x32xf32>
    %194 = vector.broadcast %16 : vector<1x32xf32> to vector<32x32xf32>
    %195 = arith.mulf %193, %194 : vector<32x32xf32>
    %196 = arith.addf %192, %195 : vector<32x32xf32>
    %197 = vector.extract_strided_slice %189 {offsets = [64, 0], sizes = [32, 32], strides = [1, 1]} : vector<128x32xf32> to vector<32x32xf32>
    %198 = vector.broadcast %17 : vector<1x32xf32> to vector<32x32xf32>
    %199 = arith.mulf %197, %198 : vector<32x32xf32>
    %200 = arith.addf %196, %199 : vector<32x32xf32>
    %201 = vector.extract_strided_slice %189 {offsets = [96, 0], sizes = [32, 32], strides = [1, 1]} : vector<128x32xf32> to vector<32x32xf32>
    %202 = vector.broadcast %18 : vector<1x32xf32> to vector<32x32xf32>
    %203 = arith.mulf %201, %202 : vector<32x32xf32>
    %204 = arith.addf %200, %203 : vector<32x32xf32>
    %205 = arith.truncf %204 : vector<32x32xf32> to vector<32x32xbf16>
    %cst_76 = arith.constant dense<0.000000e+00> : vector<32x32xf32>
    %206 = tpu.matmul %205, %147, %cst_76 {dimension_numbers = #tpu.dot_dimension_numbers<[1], [0], [0], [1], [0, 0, 1, 1], [], []>} : vector<32x32xbf16>, vector<32x32xbf16>, vector<32x32xf32> -> vector<32x32xf32>
    %207 = vector.broadcast %151 : vector<1x32xf32> to vector<32x32xf32>
    %208 = arith.addf %206, %207 : vector<32x32xf32>
    %c22 = arith.constant 22 : index
    %c0_77 = arith.constant 0 : index
    %209 = vector.load %arg12[%c22, %c0_77] : memref<32x32xf32, #tpu.memory_space<vmem>>, vector<1x32xf32>
    %c23 = arith.constant 23 : index
    %c0_78 = arith.constant 0 : index
    %210 = vector.load %arg12[%c23, %c0_78] : memref<32x32xf32, #tpu.memory_space<vmem>>, vector<1x32xf32>
    %211 = arith.addf %3, %208 : vector<32x32xf32>
    %cst_79 = arith.constant dense<0.000000e+00> : vector<32xf32>
    %212 = vector.multi_reduction <add>, %211, %cst_79 [1] : vector<32x32xf32> to vector<32xf32>
    %213 = vector.shape_cast %212 : vector<32xf32> to vector<32x1xf32>
    %cst_80 = arith.constant 3.200000e+01 : f32
    %214 = vector.broadcast %cst_80 : f32 to vector<32x1xf32>
    %215 = arith.divf %213, %214 : vector<32x1xf32>
    %216 = vector.broadcast %215 : vector<32x1xf32> to vector<32x32xf32>
    %217 = arith.subf %211, %216 : vector<32x32xf32>
    %218 = arith.mulf %217, %217 : vector<32x32xf32>
    %cst_81 = arith.constant dense<0.000000e+00> : vector<32xf32>
    %219 = vector.multi_reduction <add>, %218, %cst_81 [1] : vector<32x32xf32> to vector<32xf32>
    %220 = vector.shape_cast %219 : vector<32xf32> to vector<32x1xf32>
    %cst_82 = arith.constant 0.0322580636 : f32
    %221 = vector.broadcast %cst_82 : f32 to vector<32x1xf32>
    %222 = arith.mulf %220, %221 : vector<32x1xf32>
    %223 = vector.broadcast %209 : vector<1x32xf32> to vector<32x32xf32>
    %224 = arith.mulf %223, %217 : vector<32x32xf32>
    %225 = math.sqrt %222 : vector<32x1xf32>
    %cst_83 = arith.constant 9.99999997E-7 : f32
    %226 = vector.broadcast %cst_83 : f32 to vector<32x1xf32>
    %227 = arith.addf %225, %226 : vector<32x1xf32>
    %228 = vector.broadcast %227 : vector<32x1xf32> to vector<32x32xf32>
    %229 = arith.divf %224, %228 : vector<32x32xf32>
    %230 = vector.broadcast %210 : vector<1x32xf32> to vector<32x32xf32>
    %231 = arith.addf %229, %230 : vector<32x32xf32>
    %c256 = arith.constant 256 : index
    %c0_84 = arith.constant 0 : index
    %232 = vector.load %arg8[%c256, %c0_84] : memref<512x32xbf16, #tpu.memory_space<vmem>>, vector<32x32xbf16>
    %c288 = arith.constant 288 : index
    %c0_85 = arith.constant 0 : index
    %233 = vector.load %arg8[%c288, %c0_85] : memref<512x32xbf16, #tpu.memory_space<vmem>>, vector<32x32xbf16>
    %c320 = arith.constant 320 : index
    %c0_86 = arith.constant 0 : index
    %234 = vector.load %arg8[%c320, %c0_86] : memref<512x32xbf16, #tpu.memory_space<vmem>>, vector<32x32xbf16>
    %c352 = arith.constant 352 : index
    %c0_87 = arith.constant 0 : index
    %235 = vector.load %arg8[%c352, %c0_87] : memref<512x32xbf16, #tpu.memory_space<vmem>>, vector<32x32xbf16>
    %c12 = arith.constant 12 : index
    %c0_88 = arith.constant 0 : index
    %236 = vector.load %arg12[%c12, %c0_88] : memref<32x32xf32, #tpu.memory_space<vmem>>, vector<1x32xf32>
    %c13 = arith.constant 13 : index
    %c0_89 = arith.constant 0 : index
    %237 = vector.load %arg12[%c13, %c0_89] : memref<32x32xf32, #tpu.memory_space<vmem>>, vector<1x32xf32>
    %c14 = arith.constant 14 : index
    %c0_90 = arith.constant 0 : index
    %238 = vector.load %arg12[%c14, %c0_90] : memref<32x32xf32, #tpu.memory_space<vmem>>, vector<1x32xf32>
    %c15 = arith.constant 15 : index
    %c0_91 = arith.constant 0 : index
    %239 = vector.load %arg12[%c15, %c0_91] : memref<32x32xf32, #tpu.memory_space<vmem>>, vector<1x32xf32>
    %240 = arith.truncf %231 : vector<32x32xf32> to vector<32x32xbf16>
    %cst_92 = arith.constant dense<0.000000e+00> : vector<32x32xf32>
    %241 = tpu.matmul %240, %232, %cst_92 {dimension_numbers = #tpu.dot_dimension_numbers<[1], [0], [0], [1], [0, 0, 1, 1], [], []>} : vector<32x32xbf16>, vector<32x32xbf16>, vector<32x32xf32> -> vector<32x32xf32>
    %242 = vector.broadcast %236 : vector<1x32xf32> to vector<32x32xf32>
    %243 = arith.addf %241, %242 : vector<32x32xf32>
    %244 = arith.truncf %1 : vector<16x32xf32> to vector<16x32xbf16>
    %cst_93 = arith.constant dense<0.000000e+00> : vector<16x32xf32>
    %245 = tpu.matmul %244, %233, %cst_93 {dimension_numbers = #tpu.dot_dimension_numbers<[1], [0], [0], [1], [0, 0, 1, 1], [], []>} : vector<16x32xbf16>, vector<32x32xbf16>, vector<16x32xf32> -> vector<16x32xf32>
    %246 = vector.broadcast %237 : vector<1x32xf32> to vector<16x32xf32>
    %247 = arith.addf %245, %246 : vector<16x32xf32>
    %248 = arith.truncf %1 : vector<16x32xf32> to vector<16x32xbf16>
    %cst_94 = arith.constant dense<0.000000e+00> : vector<16x32xf32>
    %249 = tpu.matmul %248, %234, %cst_94 {dimension_numbers = #tpu.dot_dimension_numbers<[1], [0], [0], [1], [0, 0, 1, 1], [], []>} : vector<16x32xbf16>, vector<32x32xbf16>, vector<16x32xf32> -> vector<16x32xf32>
    %250 = vector.broadcast %238 : vector<1x32xf32> to vector<16x32xf32>
    %251 = arith.addf %249, %250 : vector<16x32xf32>
    %252 = vector.broadcast %15 : vector<1x32xf32> to vector<32x32xf32>
    %253 = arith.mulf %243, %252 : vector<32x32xf32>
    %254 = vector.broadcast %16 : vector<1x32xf32> to vector<32x32xf32>
    %255 = arith.mulf %243, %254 : vector<32x32xf32>
    %256 = vector.broadcast %17 : vector<1x32xf32> to vector<32x32xf32>
    %257 = arith.mulf %243, %256 : vector<32x32xf32>
    %258 = vector.broadcast %18 : vector<1x32xf32> to vector<32x32xf32>
    %259 = arith.mulf %243, %258 : vector<32x32xf32>
    %260 = tpu.concatenate %253, %255, %257, %259 in 0 : vector<32x32xf32>, vector<32x32xf32>, vector<32x32xf32>, vector<32x32xf32> -> vector<128x32xf32>
    %261 = arith.truncf %260 : vector<128x32xf32> to vector<128x32xbf16>
    %262 = arith.truncf %247 : vector<16x32xf32> to vector<16x32xbf16>
    %cst_95 = arith.constant dense<0.000000e+00> : vector<128x16xf32>
    %263 = tpu.matmul %261, %262, %cst_95 {dimension_numbers = #tpu.dot_dimension_numbers<[1], [1], [0], [0], [0, 0, 1, 0], [], []>} : vector<128x32xbf16>, vector<16x32xbf16>, vector<128x16xf32> -> vector<128x16xf32>
    %264 = arith.addf %263, %9 : vector<128x16xf32>
    %cst_96 = arith.constant dense<0xFF800000> : vector<128xf32>
    %265 = vector.multi_reduction <maximumf>, %264, %cst_96 [1] : vector<128x16xf32> to vector<128xf32>
    %266 = vector.shape_cast %265 : vector<128xf32> to vector<128x1xf32>
    %267 = vector.broadcast %266 : vector<128x1xf32> to vector<128x16xf32>
    %268 = arith.subf %264, %267 : vector<128x16xf32>
    %269 = math.exp %268 : vector<128x16xf32>
    %cst_97 = arith.constant dense<0.000000e+00> : vector<128xf32>
    %270 = vector.multi_reduction <add>, %269, %cst_97 [1] : vector<128x16xf32> to vector<128xf32>
    %271 = vector.shape_cast %270 : vector<128xf32> to vector<128x1xf32>
    %272 = tpu.reciprocal %271 {approx = true} : vector<128x1xf32> -> vector<128x1xf32>
    %273 = vector.broadcast %272 : vector<128x1xf32> to vector<128x16xf32>
    %274 = arith.mulf %269, %273 : vector<128x16xf32>
    %275 = arith.truncf %274 : vector<128x16xf32> to vector<128x16xbf16>
    %276 = arith.truncf %251 : vector<16x32xf32> to vector<16x32xbf16>
    %cst_98 = arith.constant dense<0.000000e+00> : vector<128x32xf32>
    %277 = tpu.matmul %275, %276, %cst_98 {dimension_numbers = #tpu.dot_dimension_numbers<[1], [0], [0], [1], [0, 0, 1, 1], [], []>} : vector<128x16xbf16>, vector<16x32xbf16>, vector<128x32xf32> -> vector<128x32xf32>
    %278 = vector.extract_strided_slice %277 {offsets = [0, 0], sizes = [32, 32], strides = [1, 1]} : vector<128x32xf32> to vector<32x32xf32>
    %279 = vector.broadcast %15 : vector<1x32xf32> to vector<32x32xf32>
    %280 = arith.mulf %278, %279 : vector<32x32xf32>
    %281 = vector.extract_strided_slice %277 {offsets = [32, 0], sizes = [32, 32], strides = [1, 1]} : vector<128x32xf32> to vector<32x32xf32>
    %282 = vector.broadcast %16 : vector<1x32xf32> to vector<32x32xf32>
    %283 = arith.mulf %281, %282 : vector<32x32xf32>
    %284 = arith.addf %280, %283 : vector<32x32xf32>
    %285 = vector.extract_strided_slice %277 {offsets = [64, 0], sizes = [32, 32], strides = [1, 1]} : vector<128x32xf32> to vector<32x32xf32>
    %286 = vector.broadcast %17 : vector<1x32xf32> to vector<32x32xf32>
    %287 = arith.mulf %285, %286 : vector<32x32xf32>
    %288 = arith.addf %284, %287 : vector<32x32xf32>
    %289 = vector.extract_strided_slice %277 {offsets = [96, 0], sizes = [32, 32], strides = [1, 1]} : vector<128x32xf32> to vector<32x32xf32>
    %290 = vector.broadcast %18 : vector<1x32xf32> to vector<32x32xf32>
    %291 = arith.mulf %289, %290 : vector<32x32xf32>
    %292 = arith.addf %288, %291 : vector<32x32xf32>
    %293 = arith.truncf %292 : vector<32x32xf32> to vector<32x32xbf16>
    %cst_99 = arith.constant dense<0.000000e+00> : vector<32x32xf32>
    %294 = tpu.matmul %293, %235, %cst_99 {dimension_numbers = #tpu.dot_dimension_numbers<[1], [0], [0], [1], [0, 0, 1, 1], [], []>} : vector<32x32xbf16>, vector<32x32xbf16>, vector<32x32xf32> -> vector<32x32xf32>
    %295 = vector.broadcast %239 : vector<1x32xf32> to vector<32x32xf32>
    %296 = arith.addf %294, %295 : vector<32x32xf32>
    %c24 = arith.constant 24 : index
    %c0_100 = arith.constant 0 : index
    %297 = vector.load %arg12[%c24, %c0_100] : memref<32x32xf32, #tpu.memory_space<vmem>>, vector<1x32xf32>
    %c25 = arith.constant 25 : index
    %c0_101 = arith.constant 0 : index
    %298 = vector.load %arg12[%c25, %c0_101] : memref<32x32xf32, #tpu.memory_space<vmem>>, vector<1x32xf32>
    %299 = arith.addf %231, %296 : vector<32x32xf32>
    %cst_102 = arith.constant dense<0.000000e+00> : vector<32xf32>
    %300 = vector.multi_reduction <add>, %299, %cst_102 [1] : vector<32x32xf32> to vector<32xf32>
    %301 = vector.shape_cast %300 : vector<32xf32> to vector<32x1xf32>
    %cst_103 = arith.constant 3.200000e+01 : f32
    %302 = vector.broadcast %cst_103 : f32 to vector<32x1xf32>
    %303 = arith.divf %301, %302 : vector<32x1xf32>
    %304 = vector.broadcast %303 : vector<32x1xf32> to vector<32x32xf32>
    %305 = arith.subf %299, %304 : vector<32x32xf32>
    %306 = arith.mulf %305, %305 : vector<32x32xf32>
    %cst_104 = arith.constant dense<0.000000e+00> : vector<32xf32>
    %307 = vector.multi_reduction <add>, %306, %cst_104 [1] : vector<32x32xf32> to vector<32xf32>
    %308 = vector.shape_cast %307 : vector<32xf32> to vector<32x1xf32>
    %cst_105 = arith.constant 0.0322580636 : f32
    %309 = vector.broadcast %cst_105 : f32 to vector<32x1xf32>
    %310 = arith.mulf %308, %309 : vector<32x1xf32>
    %311 = vector.broadcast %297 : vector<1x32xf32> to vector<32x32xf32>
    %312 = arith.mulf %311, %305 : vector<32x32xf32>
    %313 = math.sqrt %310 : vector<32x1xf32>
    %cst_106 = arith.constant 9.99999997E-7 : f32
    %314 = vector.broadcast %cst_106 : f32 to vector<32x1xf32>
    %315 = arith.addf %313, %314 : vector<32x1xf32>
    %316 = vector.broadcast %315 : vector<32x1xf32> to vector<32x32xf32>
    %317 = arith.divf %312, %316 : vector<32x32xf32>
    %318 = vector.broadcast %298 : vector<1x32xf32> to vector<32x32xf32>
    %319 = arith.addf %317, %318 : vector<32x32xf32>
    %c32_107 = arith.constant 32 : index
    %c0_108 = arith.constant 0 : index
    %320 = vector.load %arg9[%c32_107, %c0_108] : memref<128x64xbf16, #tpu.memory_space<vmem>>, vector<32x64xbf16>
    %c1 = arith.constant 1 : index
    %c0_109 = arith.constant 0 : index
    %321 = vector.load %arg13[%c1, %c0_109] : memref<4x64xf32, #tpu.memory_space<vmem>>, vector<1x64xf32>
    %c448 = arith.constant 448 : index
    %c0_110 = arith.constant 0 : index
    %322 = vector.load %arg8[%c448, %c0_110] : memref<512x32xbf16, #tpu.memory_space<vmem>>, vector<64x32xbf16>
    %c17 = arith.constant 17 : index
    %c0_111 = arith.constant 0 : index
    %323 = vector.load %arg12[%c17, %c0_111] : memref<32x32xf32, #tpu.memory_space<vmem>>, vector<1x32xf32>
    %324 = arith.truncf %319 : vector<32x32xf32> to vector<32x32xbf16>
    %cst_112 = arith.constant dense<0.000000e+00> : vector<32x64xf32>
    %325 = tpu.matmul %324, %320, %cst_112 {dimension_numbers = #tpu.dot_dimension_numbers<[1], [0], [0], [1], [0, 0, 1, 1], [], []>} : vector<32x32xbf16>, vector<32x64xbf16>, vector<32x64xf32> -> vector<32x64xf32>
    %326 = vector.broadcast %321 : vector<1x64xf32> to vector<32x64xf32>
    %327 = arith.addf %325, %326 : vector<32x64xf32>
    %cst_113 = arith.constant 0.000000e+00 : f32
    %328 = vector.broadcast %cst_113 : f32 to vector<32x64xf32>
    %329 = arith.maximumf %327, %328 : vector<32x64xf32>
    %330 = arith.truncf %329 : vector<32x64xf32> to vector<32x64xbf16>
    %cst_114 = arith.constant dense<0.000000e+00> : vector<32x32xf32>
    %331 = tpu.matmul %330, %322, %cst_114 {dimension_numbers = #tpu.dot_dimension_numbers<[1], [0], [0], [1], [0, 0, 1, 1], [], []>} : vector<32x64xbf16>, vector<64x32xbf16>, vector<32x32xf32> -> vector<32x32xf32>
    %332 = vector.broadcast %323 : vector<1x32xf32> to vector<32x32xf32>
    %333 = arith.addf %331, %332 : vector<32x32xf32>
    %c26 = arith.constant 26 : index
    %c0_115 = arith.constant 0 : index
    %334 = vector.load %arg12[%c26, %c0_115] : memref<32x32xf32, #tpu.memory_space<vmem>>, vector<1x32xf32>
    %c27 = arith.constant 27 : index
    %c0_116 = arith.constant 0 : index
    %335 = vector.load %arg12[%c27, %c0_116] : memref<32x32xf32, #tpu.memory_space<vmem>>, vector<1x32xf32>
    %336 = arith.addf %319, %333 : vector<32x32xf32>
    %cst_117 = arith.constant dense<0.000000e+00> : vector<32xf32>
    %337 = vector.multi_reduction <add>, %336, %cst_117 [1] : vector<32x32xf32> to vector<32xf32>
    %338 = vector.shape_cast %337 : vector<32xf32> to vector<32x1xf32>
    %cst_118 = arith.constant 3.200000e+01 : f32
    %339 = vector.broadcast %cst_118 : f32 to vector<32x1xf32>
    %340 = arith.divf %338, %339 : vector<32x1xf32>
    %341 = vector.broadcast %340 : vector<32x1xf32> to vector<32x32xf32>
    %342 = arith.subf %336, %341 : vector<32x32xf32>
    %343 = arith.mulf %342, %342 : vector<32x32xf32>
    %cst_119 = arith.constant dense<0.000000e+00> : vector<32xf32>
    %344 = vector.multi_reduction <add>, %343, %cst_119 [1] : vector<32x32xf32> to vector<32xf32>
    %345 = vector.shape_cast %344 : vector<32xf32> to vector<32x1xf32>
    %cst_120 = arith.constant 0.0322580636 : f32
    %346 = vector.broadcast %cst_120 : f32 to vector<32x1xf32>
    %347 = arith.mulf %345, %346 : vector<32x1xf32>
    %348 = vector.broadcast %334 : vector<1x32xf32> to vector<32x32xf32>
    %349 = arith.mulf %348, %342 : vector<32x32xf32>
    %350 = math.sqrt %347 : vector<32x1xf32>
    %cst_121 = arith.constant 9.99999997E-7 : f32
    %351 = vector.broadcast %cst_121 : f32 to vector<32x1xf32>
    %352 = arith.addf %350, %351 : vector<32x1xf32>
    %353 = vector.broadcast %352 : vector<32x1xf32> to vector<32x32xf32>
    %354 = arith.divf %349, %353 : vector<32x32xf32>
    %355 = vector.broadcast %335 : vector<1x32xf32> to vector<32x32xf32>
    %356 = arith.addf %354, %355 : vector<32x32xf32>
    %357 = arith.addf %143, %1 : vector<16x32xf32>
    %358 = arith.addf %356, %3 : vector<32x32xf32>
    %c64_122 = arith.constant 64 : index
    %c0_123 = arith.constant 0 : index
    %359 = vector.load %arg9[%c64_122, %c0_123] : memref<128x64xbf16, #tpu.memory_space<vmem>>, vector<32x64xbf16>
    %c2 = arith.constant 2 : index
    %c0_124 = arith.constant 0 : index
    %360 = vector.load %arg13[%c2, %c0_124] : memref<4x64xf32, #tpu.memory_space<vmem>>, vector<1x64xf32>
    %361 = arith.truncf %357 : vector<16x32xf32> to vector<16x32xbf16>
    %cst_125 = arith.constant dense<0.000000e+00> : vector<16x64xf32>
    %362 = tpu.matmul %361, %359, %cst_125 {dimension_numbers = #tpu.dot_dimension_numbers<[1], [0], [0], [1], [0, 0, 1, 1], [], []>} : vector<16x32xbf16>, vector<32x64xbf16>, vector<16x64xf32> -> vector<16x64xf32>
    %363 = vector.broadcast %360 : vector<1x64xf32> to vector<16x64xf32>
    %364 = arith.addf %362, %363 : vector<16x64xf32>
    %cst_126 = arith.constant 0.000000e+00 : f32
    %365 = vector.broadcast %cst_126 : f32 to vector<16x64xf32>
    %366 = arith.maximumf %364, %365 : vector<16x64xf32>
    %c0_127 = arith.constant 0 : index
    %c0_128 = arith.constant 0 : index
    %367 = vector.load %arg10[%c0_127, %c0_128] : memref<64x8xbf16, #tpu.memory_space<vmem>>, vector<64x8xbf16>
    %368 = arith.truncf %366 : vector<16x64xf32> to vector<16x64xbf16>
    %cst_129 = arith.constant dense<0.000000e+00> : vector<16x8xf32>
    %369 = tpu.matmul %368, %367, %cst_129 {dimension_numbers = #tpu.dot_dimension_numbers<[1], [0], [0], [1], [0, 0, 1, 1], [], []>} : vector<16x64xbf16>, vector<64x8xbf16>, vector<16x8xf32> -> vector<16x8xf32>
    %c0_130 = arith.constant 0 : index
    %c0_131 = arith.constant 0 : index
    %370 = vector.load %arg14[%c0_130, %c0_131] : memref<1x8xf32, #tpu.memory_space<vmem>>, vector<1x8xf32>
    %371 = vector.broadcast %370 : vector<1x8xf32> to vector<16x8xf32>
    %372 = arith.addf %369, %371 : vector<16x8xf32>
    %373 = vector.broadcast %11 : vector<16x1xf32> to vector<16x8xf32>
    %374 = arith.addf %372, %373 : vector<16x8xf32>
    %375 = vector.extract_strided_slice %374 {offsets = [0, 0], sizes = [8, 8], strides = [1, 1]} : vector<16x8xf32> to vector<8x8xf32>
    %376 = vector.extract_strided_slice %357 {offsets = [0, 0], sizes = [8, 32], strides = [1, 1]} : vector<16x32xf32> to vector<8x32xf32>
    %cst_132 = arith.constant dense<0xFF800000> : vector<8xf32>
    %377 = vector.multi_reduction <maximumf>, %375, %cst_132 [0] : vector<8x8xf32> to vector<8xf32>
    %378 = vector.shape_cast %377 : vector<8xf32> to vector<1x8xf32>
    %379 = vector.broadcast %378 : vector<1x8xf32> to vector<8x8xf32>
    %380 = arith.subf %375, %379 : vector<8x8xf32>
    %381 = math.exp %380 : vector<8x8xf32>
    %cst_133 = arith.constant dense<0.000000e+00> : vector<8xf32>
    %382 = vector.multi_reduction <add>, %381, %cst_133 [0] : vector<8x8xf32> to vector<8xf32>
    %383 = vector.shape_cast %382 : vector<8xf32> to vector<1x8xf32>
    %384 = vector.broadcast %383 : vector<1x8xf32> to vector<8x8xf32>
    %385 = arith.divf %381, %384 : vector<8x8xf32>
    %cst_134 = arith.constant dense<0.000000e+00> : vector<8x32xf32>
    %386 = tpu.matmul %385, %376, %cst_134 {dimension_numbers = #tpu.dot_dimension_numbers<[0], [0], [1], [1], [0, 1, 1, 1], [], []>} : vector<8x8xf32>, vector<8x32xf32>, vector<8x32xf32> -> vector<8x32xf32>
    %387 = vector.extract_strided_slice %374 {offsets = [8, 0], sizes = [8, 8], strides = [1, 1]} : vector<16x8xf32> to vector<8x8xf32>
    %388 = vector.extract_strided_slice %357 {offsets = [8, 0], sizes = [8, 32], strides = [1, 1]} : vector<16x32xf32> to vector<8x32xf32>
    %cst_135 = arith.constant dense<0xFF800000> : vector<8xf32>
    %389 = vector.multi_reduction <maximumf>, %387, %cst_135 [0] : vector<8x8xf32> to vector<8xf32>
    %390 = vector.shape_cast %389 : vector<8xf32> to vector<1x8xf32>
    %391 = vector.broadcast %390 : vector<1x8xf32> to vector<8x8xf32>
    %392 = arith.subf %387, %391 : vector<8x8xf32>
    %393 = math.exp %392 : vector<8x8xf32>
    %cst_136 = arith.constant dense<0.000000e+00> : vector<8xf32>
    %394 = vector.multi_reduction <add>, %393, %cst_136 [0] : vector<8x8xf32> to vector<8xf32>
    %395 = vector.shape_cast %394 : vector<8xf32> to vector<1x8xf32>
    %396 = vector.broadcast %395 : vector<1x8xf32> to vector<8x8xf32>
    %397 = arith.divf %393, %396 : vector<8x8xf32>
    %cst_137 = arith.constant dense<0.000000e+00> : vector<8x32xf32>
    %398 = tpu.matmul %397, %388, %cst_137 {dimension_numbers = #tpu.dot_dimension_numbers<[0], [0], [1], [1], [0, 1, 1, 1], [], []>} : vector<8x8xf32>, vector<8x32xf32>, vector<8x32xf32> -> vector<8x32xf32>
    %399 = tpu.concatenate %386, %398 in 0 : vector<8x32xf32>, vector<8x32xf32> -> vector<16x32xf32>
    %c96_138 = arith.constant 96 : index
    %c0_139 = arith.constant 0 : index
    %400 = vector.load %arg9[%c96_138, %c0_139] : memref<128x64xbf16, #tpu.memory_space<vmem>>, vector<32x64xbf16>
    %c3 = arith.constant 3 : index
    %c0_140 = arith.constant 0 : index
    %401 = vector.load %arg13[%c3, %c0_140] : memref<4x64xf32, #tpu.memory_space<vmem>>, vector<1x64xf32>
    %402 = arith.truncf %358 : vector<32x32xf32> to vector<32x32xbf16>
    %cst_141 = arith.constant dense<0.000000e+00> : vector<32x64xf32>
    %403 = tpu.matmul %402, %400, %cst_141 {dimension_numbers = #tpu.dot_dimension_numbers<[1], [0], [0], [1], [0, 0, 1, 1], [], []>} : vector<32x32xbf16>, vector<32x64xbf16>, vector<32x64xf32> -> vector<32x64xf32>
    %404 = vector.broadcast %401 : vector<1x64xf32> to vector<32x64xf32>
    %405 = arith.addf %403, %404 : vector<32x64xf32>
    %cst_142 = arith.constant 0.000000e+00 : f32
    %406 = vector.broadcast %cst_142 : f32 to vector<32x64xf32>
    %407 = arith.maximumf %405, %406 : vector<32x64xf32>
    %c0_143 = arith.constant 0 : index
    %c0_144 = arith.constant 0 : index
    %408 = vector.load %arg11[%c0_143, %c0_144] : memref<64x16xbf16, #tpu.memory_space<vmem>>, vector<64x16xbf16>
    %409 = arith.truncf %407 : vector<32x64xf32> to vector<32x64xbf16>
    %cst_145 = arith.constant dense<0.000000e+00> : vector<32x16xf32>
    %410 = tpu.matmul %409, %408, %cst_145 {dimension_numbers = #tpu.dot_dimension_numbers<[1], [0], [0], [1], [0, 0, 1, 1], [], []>} : vector<32x64xbf16>, vector<64x16xbf16>, vector<32x16xf32> -> vector<32x16xf32>
    %c0_146 = arith.constant 0 : index
    %c0_147 = arith.constant 0 : index
    %411 = vector.load %arg15[%c0_146, %c0_147] : memref<1x16xf32, #tpu.memory_space<vmem>>, vector<1x16xf32>
    %412 = vector.broadcast %411 : vector<1x16xf32> to vector<32x16xf32>
    %413 = arith.addf %410, %412 : vector<32x16xf32>
    %414 = vector.broadcast %13 : vector<32x1xf32> to vector<32x16xf32>
    %415 = arith.addf %413, %414 : vector<32x16xf32>
    %416 = vector.extract_strided_slice %415 {offsets = [0, 0], sizes = [16, 16], strides = [1, 1]} : vector<32x16xf32> to vector<16x16xf32>
    %417 = vector.extract_strided_slice %358 {offsets = [0, 0], sizes = [16, 32], strides = [1, 1]} : vector<32x32xf32> to vector<16x32xf32>
    %cst_148 = arith.constant dense<0xFF800000> : vector<16xf32>
    %418 = vector.multi_reduction <maximumf>, %416, %cst_148 [0] : vector<16x16xf32> to vector<16xf32>
    %419 = vector.shape_cast %418 : vector<16xf32> to vector<1x16xf32>
    %420 = vector.broadcast %419 : vector<1x16xf32> to vector<16x16xf32>
    %421 = arith.subf %416, %420 : vector<16x16xf32>
    %422 = math.exp %421 : vector<16x16xf32>
    %cst_149 = arith.constant dense<0.000000e+00> : vector<16xf32>
    %423 = vector.multi_reduction <add>, %422, %cst_149 [0] : vector<16x16xf32> to vector<16xf32>
    %424 = vector.shape_cast %423 : vector<16xf32> to vector<1x16xf32>
    %425 = vector.broadcast %424 : vector<1x16xf32> to vector<16x16xf32>
    %426 = arith.divf %422, %425 : vector<16x16xf32>
    %cst_150 = arith.constant dense<0.000000e+00> : vector<16x32xf32>
    %427 = tpu.matmul %426, %417, %cst_150 {dimension_numbers = #tpu.dot_dimension_numbers<[0], [0], [1], [1], [0, 1, 1, 1], [], []>} : vector<16x16xf32>, vector<16x32xf32>, vector<16x32xf32> -> vector<16x32xf32>
    %428 = vector.extract_strided_slice %415 {offsets = [16, 0], sizes = [16, 16], strides = [1, 1]} : vector<32x16xf32> to vector<16x16xf32>
    %429 = vector.extract_strided_slice %358 {offsets = [16, 0], sizes = [16, 32], strides = [1, 1]} : vector<32x32xf32> to vector<16x32xf32>
    %cst_151 = arith.constant dense<0xFF800000> : vector<16xf32>
    %430 = vector.multi_reduction <maximumf>, %428, %cst_151 [0] : vector<16x16xf32> to vector<16xf32>
    %431 = vector.shape_cast %430 : vector<16xf32> to vector<1x16xf32>
    %432 = vector.broadcast %431 : vector<1x16xf32> to vector<16x16xf32>
    %433 = arith.subf %428, %432 : vector<16x16xf32>
    %434 = math.exp %433 : vector<16x16xf32>
    %cst_152 = arith.constant dense<0.000000e+00> : vector<16xf32>
    %435 = vector.multi_reduction <add>, %434, %cst_152 [0] : vector<16x16xf32> to vector<16xf32>
    %436 = vector.shape_cast %435 : vector<16xf32> to vector<1x16xf32>
    %437 = vector.broadcast %436 : vector<1x16xf32> to vector<16x16xf32>
    %438 = arith.divf %434, %437 : vector<16x16xf32>
    %cst_153 = arith.constant dense<0.000000e+00> : vector<16x32xf32>
    %439 = tpu.matmul %438, %429, %cst_153 {dimension_numbers = #tpu.dot_dimension_numbers<[0], [0], [1], [1], [0, 1, 1, 1], [], []>} : vector<16x16xf32>, vector<16x32xf32>, vector<16x32xf32> -> vector<16x32xf32>
    %440 = tpu.concatenate %427, %439 in 0 : vector<16x32xf32>, vector<16x32xf32> -> vector<32x32xf32>
    %c28 = arith.constant 28 : index
    %c0_154 = arith.constant 0 : index
    %441 = vector.load %arg12[%c28, %c0_154] : memref<32x32xf32, #tpu.memory_space<vmem>>, vector<1x32xf32>
    %c29 = arith.constant 29 : index
    %c0_155 = arith.constant 0 : index
    %442 = vector.load %arg12[%c29, %c0_155] : memref<32x32xf32, #tpu.memory_space<vmem>>, vector<1x32xf32>
    %443 = arith.addf %357, %399 : vector<16x32xf32>
    %cst_156 = arith.constant dense<0.000000e+00> : vector<16xf32>
    %444 = vector.multi_reduction <add>, %443, %cst_156 [1] : vector<16x32xf32> to vector<16xf32>
    %445 = vector.shape_cast %444 : vector<16xf32> to vector<16x1xf32>
    %cst_157 = arith.constant 3.200000e+01 : f32
    %446 = vector.broadcast %cst_157 : f32 to vector<16x1xf32>
    %447 = arith.divf %445, %446 : vector<16x1xf32>
    %448 = vector.broadcast %447 : vector<16x1xf32> to vector<16x32xf32>
    %449 = arith.subf %443, %448 : vector<16x32xf32>
    %450 = arith.mulf %449, %449 : vector<16x32xf32>
    %cst_158 = arith.constant dense<0.000000e+00> : vector<16xf32>
    %451 = vector.multi_reduction <add>, %450, %cst_158 [1] : vector<16x32xf32> to vector<16xf32>
    %452 = vector.shape_cast %451 : vector<16xf32> to vector<16x1xf32>
    %cst_159 = arith.constant 0.0322580636 : f32
    %453 = vector.broadcast %cst_159 : f32 to vector<16x1xf32>
    %454 = arith.mulf %452, %453 : vector<16x1xf32>
    %455 = vector.broadcast %441 : vector<1x32xf32> to vector<16x32xf32>
    %456 = arith.mulf %455, %449 : vector<16x32xf32>
    %457 = math.sqrt %454 : vector<16x1xf32>
    %cst_160 = arith.constant 9.99999997E-7 : f32
    %458 = vector.broadcast %cst_160 : f32 to vector<16x1xf32>
    %459 = arith.addf %457, %458 : vector<16x1xf32>
    %460 = vector.broadcast %459 : vector<16x1xf32> to vector<16x32xf32>
    %461 = arith.divf %456, %460 : vector<16x32xf32>
    %462 = vector.broadcast %442 : vector<1x32xf32> to vector<16x32xf32>
    %463 = arith.addf %461, %462 : vector<16x32xf32>
    %c0_161 = arith.constant 0 : index
    %c0_162 = arith.constant 0 : index
    %c0_163 = arith.constant 0 : index
    %464 = vector.load %arg16[%c0_161, %c0_162, %c0_163] : memref<1x16x32xf32, #tpu.memory_space<vmem>>, vector<1x16x32xf32>
    %465 = vector.shape_cast %464 : vector<1x16x32xf32> to vector<16x32xf32>
    %466 = vector.shape_cast %463 : vector<16x32xf32> to vector<1x16x32xf32>
    tpu.vector_store %arg16[%c0_161, %c0_162, %c0_163], %466 {strides = array<i32>} : memref<1x16x32xf32, #tpu.memory_space<vmem>>, vector<1x16x32xf32>,
    %c30 = arith.constant 30 : index
    %c0_164 = arith.constant 0 : index
    %467 = vector.load %arg12[%c30, %c0_164] : memref<32x32xf32, #tpu.memory_space<vmem>>, vector<1x32xf32>
    %c31 = arith.constant 31 : index
    %c0_165 = arith.constant 0 : index
    %468 = vector.load %arg12[%c31, %c0_165] : memref<32x32xf32, #tpu.memory_space<vmem>>, vector<1x32xf32>
    %469 = arith.addf %358, %440 : vector<32x32xf32>
    %cst_166 = arith.constant dense<0.000000e+00> : vector<32xf32>
    %470 = vector.multi_reduction <add>, %469, %cst_166 [1] : vector<32x32xf32> to vector<32xf32>
    %471 = vector.shape_cast %470 : vector<32xf32> to vector<32x1xf32>
    %cst_167 = arith.constant 3.200000e+01 : f32
    %472 = vector.broadcast %cst_167 : f32 to vector<32x1xf32>
    %473 = arith.divf %471, %472 : vector<32x1xf32>
    %474 = vector.broadcast %473 : vector<32x1xf32> to vector<32x32xf32>
    %475 = arith.subf %469, %474 : vector<32x32xf32>
    %476 = arith.mulf %475, %475 : vector<32x32xf32>
    %cst_168 = arith.constant dense<0.000000e+00> : vector<32xf32>
    %477 = vector.multi_reduction <add>, %476, %cst_168 [1] : vector<32x32xf32> to vector<32xf32>
    %478 = vector.shape_cast %477 : vector<32xf32> to vector<32x1xf32>
    %cst_169 = arith.constant 0.0322580636 : f32
    %479 = vector.broadcast %cst_169 : f32 to vector<32x1xf32>
    %480 = arith.mulf %478, %479 : vector<32x1xf32>
    %481 = vector.broadcast %467 : vector<1x32xf32> to vector<32x32xf32>
    %482 = arith.mulf %481, %475 : vector<32x32xf32>
    %483 = math.sqrt %480 : vector<32x1xf32>
    %cst_170 = arith.constant 9.99999997E-7 : f32
    %484 = vector.broadcast %cst_170 : f32 to vector<32x1xf32>
    %485 = arith.addf %483, %484 : vector<32x1xf32>
    %486 = vector.broadcast %485 : vector<32x1xf32> to vector<32x32xf32>
    %487 = arith.divf %482, %486 : vector<32x32xf32>
    %488 = vector.broadcast %468 : vector<1x32xf32> to vector<32x32xf32>
    %489 = arith.addf %487, %488 : vector<32x32xf32>
    %c0_171 = arith.constant 0 : index
    %c0_172 = arith.constant 0 : index
    %c0_173 = arith.constant 0 : index
    %490 = vector.load %arg17[%c0_171, %c0_172, %c0_173] : memref<1x32x32xf32, #tpu.memory_space<vmem>>, vector<1x32x32xf32>
    %491 = vector.shape_cast %490 : vector<1x32x32xf32> to vector<32x32xf32>
    %492 = vector.shape_cast %489 : vector<32x32xf32> to vector<1x32x32xf32>
    tpu.vector_store %arg17[%c0_171, %c0_172, %c0_173], %492 {strides = array<i32>} : memref<1x32x32xf32, #tpu.memory_space<vmem>>, vector<1x32x32xf32>,
    return
  }
  func.func @transform_0(%arg0: i32) -> (i32, i32, i32) {
    %c0_i32 = arith.constant 0 : i32
    %c0_i32_0 = arith.constant 0 : i32
    %c0_i32_1 = arith.constant 0 : i32
    return %arg0, %c0_i32, %c0_i32_0 : i32, i32, i32
  }
  func.func @transform_1(%arg0: i32) -> (i32, i32, i32) {
    %c0_i32 = arith.constant 0 : i32
    %c0_i32_0 = arith.constant 0 : i32
    %c0_i32_1 = arith.constant 0 : i32
    return %arg0, %c0_i32, %c0_i32_0 : i32, i32, i32
  }
  func.func @transform_2(%arg0: i32) -> (i32, i32, i32) {
    %c0_i32 = arith.constant 0 : i32
    %c0_i32_0 = arith.constant 0 : i32
    %c0_i32_1 = arith.constant 0 : i32
    return %arg0, %c0_i32, %c0_i32_0 : i32, i32, i32
  }
  func.func @transform_3(%arg0: i32) -> (i32, i32, i32) {
    %c0_i32 = arith.constant 0 : i32
    %c0_i32_0 = arith.constant 0 : i32
    %c0_i32_1 = arith.constant 0 : i32
    return %arg0, %c0_i32, %c0_i32_0 : i32, i32, i32
  }
  func.func @transform_4(%arg0: i32) -> (i32, i32, i32) {
    %c0_i32 = arith.constant 0 : i32
    %c0_i32_0 = arith.constant 0 : i32
    %c0_i32_1 = arith.constant 0 : i32
    return %arg0, %c0_i32, %c0_i32_0 : i32, i32, i32
  }
  func.func @transform_5(%arg0: i32) -> (i32, i32, i32) {
    %c0_i32 = arith.constant 0 : i32
    %c0_i32_0 = arith.constant 0 : i32
    %c0_i32_1 = arith.constant 0 : i32
    return %arg0, %c0_i32, %c0_i32_0 : i32, i32, i32
  }
  func.func @transform_6(%arg0: i32) -> (i32, i32, i32) {
    %c0_i32 = arith.constant 0 : i32
    %c0_i32_0 = arith.constant 0 : i32
    %c0_i32_1 = arith.constant 0 : i32
    return %arg0, %c0_i32, %c0_i32_0 : i32, i32, i32
  }
  func.func @transform_7(%arg0: i32) -> (i32, i32) {
    %c0_i32 = arith.constant 0 : i32
    %c0_i32_0 = arith.constant 0 : i32
    %c0_i32_1 = arith.constant 0 : i32
    return %c0_i32, %c0_i32_0 : i32, i32
  }
  func.func @transform_8(%arg0: i32) -> (i32, i32) {
    %c0_i32 = arith.constant 0 : i32
    %c0_i32_0 = arith.constant 0 : i32
    %c0_i32_1 = arith.constant 0 : i32
    return %c0_i32, %c0_i32_0 : i32, i32
  }
  func.func @transform_9(%arg0: i32) -> (i32, i32) {
    %c0_i32 = arith.constant 0 : i32
    %c0_i32_0 = arith.constant 0 : i32
    %c0_i32_1 = arith.constant 0 : i32
    return %c0_i32, %c0_i32_0 : i32, i32
  }
  func.func @transform_10(%arg0: i32) -> (i32, i32) {
    %c0_i32 = arith.constant 0 : i32
    %c0_i32_0 = arith.constant 0 : i32
    %c0_i32_1 = arith.constant 0 : i32
    return %c0_i32, %c0_i32_0 : i32, i32
  }
  func.func @transform_11(%arg0: i32) -> (i32, i32) {
    %c0_i32 = arith.constant 0 : i32
    %c0_i32_0 = arith.constant 0 : i32
    %c0_i32_1 = arith.constant 0 : i32
    return %c0_i32, %c0_i32_0 : i32, i32
  }
  func.func @transform_12(%arg0: i32) -> (i32, i32) {
    %c0_i32 = arith.constant 0 : i32
    %c0_i32_0 = arith.constant 0 : i32
    %c0_i32_1 = arith.constant 0 : i32
    return %c0_i32, %c0_i32_0 : i32, i32
  }
  func.func @transform_13(%arg0: i32) -> (i32, i32) {
    %c0_i32 = arith.constant 0 : i32
    %c0_i32_0 = arith.constant 0 : i32
    %c0_i32_1 = arith.constant 0 : i32
    return %c0_i32, %c0_i32_0 : i32, i32
  }
  func.func @transform_14(%arg0: i32) -> (i32, i32) {
    %c0_i32 = arith.constant 0 : i32
    %c0_i32_0 = arith.constant 0 : i32
    %c0_i32_1 = arith.constant 0 : i32
    return %c0_i32, %c0_i32_0 : i32, i32
  }
  func.func @transform_15(%arg0: i32) -> (i32, i32, i32) {
    %c0_i32 = arith.constant 0 : i32
    %c0_i32_0 = arith.constant 0 : i32
    %c0_i32_1 = arith.constant 0 : i32
    return %arg0, %c0_i32, %c0_i32_0 : i32, i32, i32
  }
  func.func @transform_16(%arg0: i32) -> (i32, i32, i32) {
    %c0_i32 = arith.constant 0 : i32
    %c0_i32_0 = arith.constant 0 : i32
    %c0_i32_1 = arith.constant 0 : i32
    return %arg0, %c0_i32, %c0_i32_0 : i32, i32, i32
  }
}

</mosaic_0001>

<bundles_post_ra>
// kernel: block_forward.1
= control target key start
LH: loop header
LB: loop body
LE: loop exit
PB: predicated region body
PF: predicated region fallthrough
CT: control target
= control target key end

     0   :  { %s5453_s0 = inlined_call_operand.vmem [shape: f32[1,16,32], index: 0, kind: input, shape index: {}]   ;;  %s5454_s1 = inlined_call_operand.vmem [shape: f32[1,32,32], index: 1, kind: input, shape index: {}]   ;;  %s5455_s2 = inlined_call_operand.vmem [shape: f32[1,64,16], index: 2, kind: input, shape index: {}]   ;;  %s5456_s3 = inlined_call_operand.vmem [shape: f32[1,128,32], index: 3, kind: input, shape index: {}]   ;;  %s5457_s4 = inlined_call_operand.vmem [shape: f32[1,128,16], index: 4, kind: input, shape index: {}]   ;;  %s5458_s5 = inlined_call_operand.vmem [shape: f32[1,16,1], index: 5, kind: input, shape index: {}]   ;;  %s5459_s6 = inlined_call_operand.vmem [shape: f32[1,32,1], index: 6, kind: input, shape index: {}]   ;;  %s5460_s7 = inlined_call_operand.vmem [shape: bf16[512,32], index: 7, kind: input, shape index: {}]   ;;  %s5461_s8 = inlined_call_operand.vmem [shape: bf16[128,64], index: 8, kind: input, shape index: {}]   ;;  %s5462_s9 = inlined_call_operand.vmem [shape: bf16[64,8], index: 9, kind: input, shape index: {}]   ;;  %s5463_s10 = inlined_call_operand.vmem [shape: bf16[64,16], index: 10, kind: input, shape index: {}]   ;;  %s5464_s11 = inlined_call_operand.vmem [shape: f32[32,32], index: 11, kind: input, shape index: {}]   ;;  %s5465_s12 = inlined_call_operand.vmem [shape: f32[4,64], index: 12, kind: input, shape index: {}]   ;;  %s5466_s13 = inlined_call_operand.vmem [shape: f32[1,8], index: 13, kind: input, shape index: {}]   ;;  %s5467_s14 = inlined_call_operand.vmem [shape: f32[1,16], index: 14, kind: input, shape index: {}]   ;;  %s5468_s15 = inlined_call_operand.hbm [shape: f32[1,16,32], index: 15, kind: output, shape index: {0}]   ;;  %s5469_s16 = inlined_call_operand.hbm [shape: f32[1,32,32], index: 16, kind: output, shape index: {1}]  }
   0x1   :  { %5471 = sst [smem:[#allocation8_spill]] %s5453_s0 }
   0x2   :  { %22 = vsyncpa [#allocation3], 0  ;;  %v3624_v0 = vld [vmem:[%s5460_s7 + $0x8] sm:$0xff]  ;;  %v3626_v1 = vld [vmem:[%s5460_s7 + $0x18] sm:$0xff]  ;;  %s5472_s0 = sld [smem:[#allocation8_spill]]  ;;  %vm142_vm0 = vcmask 261120  }
   0x3   :  { %v3623_v2 = vld [vmem:[%s5460_s7] sm:$0xff]  ;;  %v3625_v3 = vld [vmem:[%s5460_s7 + $0x10] sm:$0xff]  ;;  %152 = vmatpush.bf16.msra.mxu3 %v3624_v0  ;;  %179 = vmatpush.bf16.msra.mxu1 %v3626_v1 }
   0x7   :  { %153 = vmatpush.bf16.msra.mxu3 %v3623_v2  ;;  %180 = vmatpush.bf16.msra.mxu1 %v3625_v3 }
   0x8   :  { %v4148_v4 = vld [vmem:[%s5472_s0] sm:$0xff]  ;;  %v4153_v5 = vld [vmem:[%s5472_s0 + $0x8] sm:$0xff] }
   0x9   :  { %v4157_v6 = vpack.c.bf16 %v4153_v5, %v4148_v4 }
   0xb   :  { %3363 = vmatmul.msk.bf16.vlgmr.msra.gmra.mxu3 %vm142_vm0, %v4157_v6  ;;  %3372 = vmatmul.msk.bf16.vlgmr.msra.gmra.mxu1 %vm142_vm0, %v4157_v6 }
   0xc   :  { %23 = vsyncpa [#allocation5], 0  ;;  %v3680_v8 = vld [vmem:[%s5464_s11 + $0x5] ss:$0 sm:$0xff]  ;;  %v3681_v12 = vld [vmem:[%s5464_s11 + $0x4] ss:$0 sm:$0xff] }
   0xd   :  { %v107_v14 = vld [vmem:[%s5464_s11] sm:$0xf]  ;;  %vm275_vm1 = vcmask 130048   ;;  %v62_v40 = vld [vmem:[%s5455_s2 + $0x8] sm:$0xff]  ;;  %v63_v44 = vld [vmem:[%s5455_s2 + $0x10] sm:$0xff]  ;;  %vm621_vm15 = vcmask 523264  }
   0xe   :  { %v4172_v17 = vperm.slane %v107_v14, 0  ;;  %v4178_v24 = vperm.slane %v107_v14, 1  ;;  %v4183_v28 = vperm.slane %v107_v14, 2  ;;  %v4188_v32 = vperm.slane %v107_v14, 3  ;;  %v61_v36 = vld [vmem:[%s5455_s2] sm:$0xff]  ;;  %v64_v48 = vld [vmem:[%s5455_s2 + $0x18] sm:$0xff] }
   0xf   :  { %v3628_v52 = vld [vmem:[%s5460_s7 + $0x28] sm:$0xff]  ;;  %v65_v53 = vld [vmem:[%s5455_s2 + $0x20] sm:$0xff]  ;;  %v67_v62 = vld [vmem:[%s5455_s2 + $0x30] sm:$0xff]  ;;  %s4044_s29 = smov [#allocation2]   ;;  %s4046_s17 = smov 8  }
  0x10   :  { %206 = vmatpush.bf16.msra.mxu2 %v3628_v52  ;;  %v3627_v54 = vld [vmem:[%s5460_s7 + $0x20] sm:$0xff]  ;;  %v66_v58 = vld [vmem:[%s5455_s2 + $0x28] sm:$0xff]  ;;  %v68_v2 = vld [vmem:[%s5455_s2 + $0x38] sm:$0xff]  ;;  %s3338_s22 = sshll.u32 %s5469_s16, 4  ;;  %s3339_s22 = int_to_ptr.hbm [resolvable:$true] %s3338_s22 }
  0x14   :  { %207 = vmatpush.bf16.msra.mxu2 %v3627_v54  ;;  %v3682_v54 = vld [vmem:[%s5464_s11 + $0x6] ss:$0 sm:$0xff] }
  0x17   :  { %3381 = vmatmul.msk.bf16.vlgmr.msra.gmra.mxu2 %vm142_vm0, %v4157_v6 }
  0x88   :  { %v182_v7 = vpop.f32.mrf.mxu1 }
  0x89   :  { %v183_v11 = vadd.f32 %v3680_v8, %v182_v7 }
  0x8e   :  { %v155_v9 = vpop.f32.mrf.mxu3 }
  0x8f   :  { %v156_v16 = vadd.f32 %v3681_v12, %v155_v9 }
  0x90   :  { %v184_v10 = vpop.f32.mrf.mxu1 }
  0x91   :  { %v185_v13 = vadd.f32 %v3680_v8, %v184_v10  ;;  %v215_v21 = vmul.f32 %v4172_v17, %v156_v16  ;;  %v218_v26 = vmul.f32 %v4178_v24, %v156_v16  ;;  %v221_v30 = vmul.f32 %v4183_v28, %v156_v16 }
  0x92   :  { %v224_v34 = vmul.f32 %v4188_v32, %v156_v16 }
  0x93   :  { %v230_v15 = vpack.c.bf16 %v185_v13, %v183_v11 }
  0x95   :  { %v244_v18 = vsel %vm142_vm0, %v230_v15, 0 }
  0x96   :  { %v157_v19 = vpop.f32.mrf.mxu3  ;;  %253 = vmatpush.bf16.xpose.msrb.mxu3 %v244_v18 }
  0x97   :  { %v158_v20 = vadd.f32 %v3681_v12, %v157_v19 }
  0x99   :  { %v216_v22 = vmul.f32 %v4172_v17, %v158_v20  ;;  %v219_v25 = vmul.f32 %v4178_v24, %v158_v20  ;;  %v222_v29 = vmul.f32 %v4183_v28, %v158_v20  ;;  %v225_v33 = vmul.f32 %v4188_v32, %v158_v20 }
  0x9b   :  { %v226_v23 = vpack.c.bf16 %v216_v22, %v215_v21  ;;  %v227_v27 = vpack.c.bf16 %v219_v25, %v218_v26  ;;  %v228_v31 = vpack.c.bf16 %v222_v29, %v221_v30  ;;  %v229_v35 = vpack.c.bf16 %v225_v33, %v224_v34 }
  0x9d   :  { %3382 = vmatmul.msk.bf16.vlgmr.msrb.gmra.mxu3 %vm142_vm0, %v226_v23 }
  0xad   :  { %3383 = vmatmul.msk.bf16.gmra.mxu3 %vm142_vm0, %v227_v27 }
  0xbd   :  { %3384 = vmatmul.msk.bf16.gmra.mxu3 %vm142_vm0, %v228_v31 }
  0xcd   :  { %3385 = vmatmul.msk.bf16.gmra.mxu3 %vm142_vm0, %v229_v35 }
 0x120   :  { %v255_v37 = vpop.f32.mrf.mxu3 }
 0x121   :  { %v256_v38 = vadd.f32 %v255_v37, %v61_v36 }
 0x123   :  { %v276_v39 = vsel %vm275_vm1, %v256_v38, -inf }
 0x124   :  { %277 = vmax.xlane.f32.xlu0 %v276_v39 }
 0x128   :  { %v257_v41 = vpop.f32.mrf.mxu3 }
 0x129   :  { %v258_v42 = vadd.f32 %v257_v41, %v62_v40 }
 0x12b   :  { %v279_v43 = vsel %vm275_vm1, %v258_v42, -inf }
 0x12c   :  { %280 = vmax.xlane.f32.xlu0 %v279_v43 }
 0x130   :  { %v260_v45 = vpop.f32.mrf.mxu3 }
 0x131   :  { %v261_v46 = vadd.f32 %v260_v45, %v63_v44 }
 0x133   :  { %v282_v47 = vsel %vm275_vm1, %v261_v46, -inf }
 0x134   :  { %283 = vmax.xlane.f32.xlu1 %v282_v47 }
 0x138   :  { %v262_v49 = vpop.f32.mrf.mxu3 }
 0x139   :  { %v263_v50 = vadd.f32 %v262_v49, %v64_v48 }
 0x13b   :  { %v285_v51 = vsel %vm275_vm1, %v263_v50, -inf }
 0x13c   :  { %286 = vmax.xlane.f32.xlu1 %v285_v51 }
 0x140   :  { %v265_v55 = vpop.f32.mrf.mxu3 }
 0x141   :  { %v266_v56 = vadd.f32 %v265_v55, %v65_v53  ;;  %v209_v53 = vpop.f32.mrf.mxu2 }
 0x143   :  { %v288_v57 = vsel %vm275_vm1, %v266_v56, -inf }
 0x144   :  { %289 = vmax.xlane.f32.xlu2 %v288_v57 }
 0x148   :  { %v267_v59 = vpop.f32.mrf.mxu3 }
 0x149   :  { %v268_v60 = vadd.f32 %v267_v59, %v66_v58  ;;  %v211_v55 = vpop.f32.mrf.mxu2 }
 0x14a   :  { %v212_v57 = vadd.f32 %v3682_v54, %v211_v55  ;;  %v3683_v55 = vld [vmem:[%s5464_s11 + $0x7] ss:$0 sm:$0xff] }
 0x14b   :  { %v291_v61 = vsel %vm275_vm1, %v268_v60, -inf }
 0x14c   :  { %292 = vmax.xlane.f32.xlu2 %v291_v61 }
 0x150   :  { %v270_v63 = vpop.f32.mrf.mxu3 }
 0x151   :  { %v271_v0 = vadd.f32 %v270_v63, %v67_v62 }
 0x153   :  { %v294_v1 = vsel %vm275_vm1, %v271_v0, -inf }
 0x154   :  { %295 = vmax.xlane.f32.xlu0 %v294_v1 }
 0x158   :  { %v272_v3 = vpop.f32.mrf.mxu3 }
 0x159   :  { %v273_v7 = vadd.f32 %v272_v3, %v68_v2 }
 0x15b   :  { %v297_v8 = vsel %vm275_vm1, %v273_v7, -inf }
 0x15c   :  { %298 = vmax.xlane.f32.xlu1 %v297_v8 }
 0x197   :  { %v278_v9 = vpop.xlane.xlu0 %277 }
 0x198   :  { %v300_v10 = vsub.f32 %v256_v38, %v278_v9 }
 0x19a   :  { %v308_v11 = vmul.f32 1.442695, %v300_v10 }
 0x19c   :  { %3714 = vpow2.f32 %v308_v11 }
 0x19f   :  { %v281_v12 = vpop.xlane.xlu0 %280 }
 0x1a0   :  { %v301_v13 = vsub.f32 %v258_v42, %v281_v12 }
 0x1a2   :  { %v4233_v14 = vpop.eup %3714  ;;  %v310_v15 = vmul.f32 1.442695, %v301_v13 }
 0x1a3   :  { %v324_v16 = vsel %vm275_vm1, %v4233_v14, 0.0 }
 0x1a4   :  { %3716 = vpow2.f32 %v310_v15  ;;  %325 = vadd.xlane.f32.xlu2 %v324_v16 }
 0x1a7   :  { %v284_v18 = vpop.xlane.xlu1 %283 }
 0x1a8   :  { %v302_v19 = vsub.f32 %v261_v46, %v284_v18 }
 0x1aa   :  { %v3717_v20 = vpop.eup %3716  ;;  %v312_v21 = vmul.f32 1.442695, %v302_v19 }
 0x1ab   :  { %v327_v22 = vsel %vm275_vm1, %v3717_v20, 0.0 }
 0x1ac   :  { %3718 = vpow2.f32 %v312_v21  ;;  %328 = vadd.xlane.f32.xlu0 %v327_v22 }
 0x1af   :  { %v287_v23 = vpop.xlane.xlu1 %286 }
 0x1b0   :  { %v303_v25 = vsub.f32 %v263_v50, %v287_v23 }
 0x1b2   :  { %v3719_v26 = vpop.eup %3718  ;;  %v314_v27 = vmul.f32 1.442695, %v303_v25 }
 0x1b3   :  { %v330_v29 = vsel %vm275_vm1, %v3719_v26, 0.0 }
 0x1b4   :  { %3720 = vpow2.f32 %v314_v27  ;;  %331 = vadd.xlane.f32.xlu1 %v330_v29 }
 0x1b7   :  { %v290_v30 = vpop.xlane.xlu2 %289 }
 0x1b8   :  { %v304_v31 = vsub.f32 %v266_v56, %v290_v30  ;;  %v210_v56 = vadd.f32 %v3682_v54, %v209_v53 }
 0x1ba   :  { %v3721_v33 = vpop.eup %3720  ;;  %v316_v34 = vmul.f32 1.442695, %v304_v31  ;;  %v368_v58 = vpack.c.bf16 %v212_v57, %v210_v56 }
 0x1bb   :  { %v333_v35 = vsel %vm275_vm1, %v3721_v33, 0.0 }
 0x1bc   :  { %3722 = vpow2.f32 %v316_v34  ;;  %334 = vadd.xlane.f32.xlu2 %v333_v35  ;;  %388 = vmatpush.bf16.msra.mxu0 %v368_v58  ;;  %v3629_v35 = vld [vmem:[%s5460_s7 + $0x30] sm:$0xff] }
 0x1bf   :  { %v293_v36 = vpop.xlane.xlu2 %292 }
 0x1c0   :  { %v305_v37 = vsub.f32 %v268_v60, %v293_v36 }
 0x1c2   :  { %v3723_v38 = vpop.eup %3722  ;;  %v318_v39 = vmul.f32 1.442695, %v305_v37 }
 0x1c3   :  { %v336_v40 = vsel %vm275_vm1, %v3723_v38, 0.0 }
 0x1c4   :  { %3724 = vpow2.f32 %v318_v39  ;;  %337 = vadd.xlane.f32.xlu0 %v336_v40 }
 0x1c7   :  { %v296_v41 = vpop.xlane.xlu0 %295 }
 0x1c8   :  { %v306_v42 = vsub.f32 %v271_v0, %v296_v41 }
 0x1ca   :  { %v3725_v43 = vpop.eup %3724  ;;  %v320_v44 = vmul.f32 1.442695, %v306_v42 }
 0x1cb   :  { %v339_v45 = vsel %vm275_vm1, %v3725_v43, 0.0 }
 0x1cc   :  { %3726 = vpow2.f32 %v320_v44  ;;  %340 = vadd.xlane.f32.xlu1 %v339_v45 }
 0x1cf   :  { %v299_v46 = vpop.xlane.xlu1 %298 }
 0x1d0   :  { %v307_v47 = vsub.f32 %v273_v7, %v299_v46 }
 0x1d2   :  { %v3727_v48 = vpop.eup %3726  ;;  %v322_v49 = vmul.f32 1.442695, %v307_v47 }
 0x1d3   :  { %v342_v50 = vsel %vm275_vm1, %v3727_v48, 0.0 }
 0x1d4   :  { %3728 = vpow2.f32 %v322_v49  ;;  %343 = vadd.xlane.f32.xlu2 %v342_v50 }
 0x1da   :  { %v3729_v51 = vpop.eup %3728 }
 0x1db   :  { %v345_v52 = vsel %vm275_vm1, %v3729_v51, 0.0 }
 0x1dc   :  { %346 = vadd.xlane.f32.xlu0 %v345_v52 }
 0x217   :  { %v326_v59 = vpop.xlane.xlu2 %325 }
 0x218   :  { %3730 = vrcp.f32 %v326_v59 }
 0x21e   :  { %v3731_v61 = vpop.eup %3730 }
 0x21f   :  { %v329_v60 = vpop.xlane.xlu0 %328  ;;  %v356_v63 = vmul.f32 %v3731_v61, %v4233_v14 }
 0x220   :  { %3732 = vrcp.f32 %v329_v60 }
 0x226   :  { %v3733_v62 = vpop.eup %3732 }
 0x227   :  { %v357_v0 = vmul.f32 %v3733_v62, %v3717_v20  ;;  %v332_v2 = vpop.xlane.xlu1 %331 }
 0x228   :  { %3734 = vrcp.f32 %v332_v2 }
 0x229   :  { %v364_v1 = vpack.c.bf16 %v357_v0, %v356_v63  ;;  %v4042_v0 = vmov 32.0  }
 0x22b   :  { %3386 = vmatmul.msk.bf16.vlgmr.msra.gmra.mxu0 %vm275_vm1, %v364_v1 }
 0x22e   :  { %v3735_v7 = vpop.eup %3734 }
 0x22f   :  { %v335_v3 = vpop.xlane.xlu2 %334  ;;  %v358_v9 = vmul.f32 %v3735_v7, %v3719_v26 }
 0x230   :  { %3736 = vrcp.f32 %v335_v3 }
 0x236   :  { %v3737_v8 = vpop.eup %3736 }
 0x237   :  { %v359_v10 = vmul.f32 %v3737_v8, %v3721_v33  ;;  %v338_v12 = vpop.xlane.xlu0 %337  ;;  %v3630_v33 = vld [vmem:[%s5460_s7 + $0x38] sm:$0xff] }
 0x238   :  { %3738 = vrcp.f32 %v338_v12  ;;  %447 = vmatpush.bf16.msrb.mxu1 %v3630_v33 }
 0x239   :  { %v365_v11 = vpack.c.bf16 %v359_v10, %v358_v9 }
 0x23b   :  { %3387 = vmatmul.msk.bf16.gmra.mxu0 %vm275_vm1, %v365_v11 }
 0x23c   :  { %448 = vmatpush.bf16.msrb.mxu1 %v3629_v35 }
 0x23e   :  { %v3739_v14 = vpop.eup %3738 }
 0x23f   :  { %v341_v13 = vpop.xlane.xlu1 %340  ;;  %v360_v16 = vmul.f32 %v3739_v14, %v3723_v38 }
 0x240   :  { %3740 = vrcp.f32 %v341_v13 }
 0x246   :  { %v3741_v15 = vpop.eup %3740 }
 0x247   :  { %v361_v18 = vmul.f32 %v3741_v15, %v3725_v43  ;;  %v344_v20 = vpop.xlane.xlu2 %343 }
 0x248   :  { %3742 = vrcp.f32 %v344_v20 }
 0x249   :  { %v366_v19 = vpack.c.bf16 %v361_v18, %v360_v16 }
 0x24b   :  { %3388 = vmatmul.msk.bf16.gmra.mxu0 %vm275_vm1, %v366_v19 }
 0x24e   :  { %v3743_v22 = vpop.eup %3742 }
 0x24f   :  { %v347_v21 = vpop.xlane.xlu0 %346  ;;  %v362_v25 = vmul.f32 %v3743_v22, %v3727_v48  ;;  %v3631_v22 = vld [vmem:[%s5461_s8] sm:$0xff] }
 0x250   :  { %3744 = vrcp.f32 %v347_v21  ;;  %v3632_v21 = vld [vmem:[%s5461_s8 + $0x8] sm:$0xff] }
 0x251   :  { %3746 = vrcp.f32 %v4042_v0  ;;  %585 = vmatpush.bf16.msrb.mxu2 %v3632_v21  ;;  %v3633_v21 = vld [vmem:[%s5460_s7 + $0xc0] sm:$0xff] }
 0x255   :  { %586 = vmatpush.bf16.msrb.mxu2 %v3631_v22  ;;  %v3640_v22 = vld [vmem:[%s5460_s7 + $0x58] sm:$0xff] }
 0x256   :  { %v3745_v23 = vpop.eup %3744 }
 0x257   :  { %v363_v26 = vmul.f32 %v3745_v23, %v3729_v51  ;;  %v3747_v1 = vpop.eup %3746 }
 0x258   :  { %v466_v2 = vmul.f32 32.0, %v3747_v1  ;;  %vm470_vm2 = vweird.f32 %v3747_v1 }
 0x259   :  { %v367_v27 = vpack.c.bf16 %v363_v26, %v362_v25 }
 0x25a   :  { %v467_v3 = vsub.f32 1.0, %v466_v2 }
 0x25b   :  { %3389 = vmatmul.msk.bf16.gmra.mxu0 %vm275_vm1, %v367_v27 }
 0x25c   :  { %v468_v7 = vmul.f32 %v3747_v1, %v467_v3 }
 0x25e   :  { %v469_v8 = vadd.f32 %v3747_v1, %v468_v7 }
 0x260   :  { %v4274_v9 = vsel %vm470_vm2, %v3747_v1, %v469_v8 }
 0x2a8   :  { %v390_v29 = vpop.f32.mrf.mxu0 }
 0x2a9   :  { %v410_v41 = vmul.f32 %v390_v29, %v4172_v17 }
 0x2b0   :  { %v392_v30 = vpop.f32.mrf.mxu0 }
 0x2b1   :  { %v411_v42 = vmul.f32 %v392_v30, %v4172_v17 }
 0x2b8   :  { %v395_v31 = vpop.f32.mrf.mxu0 }
 0x2b9   :  { %v412_v39 = vmul.f32 %v395_v31, %v4178_v24 }
 0x2bb   :  { %v414_v45 = vadd.f32 %v412_v39, %v410_v41 }
 0x2c0   :  { %v397_v34 = vpop.f32.mrf.mxu0 }
 0x2c1   :  { %v413_v40 = vmul.f32 %v397_v34, %v4178_v24 }
 0x2c3   :  { %v415_v46 = vadd.f32 %v413_v40, %v411_v42 }
 0x2c8   :  { %v400_v36 = vpop.f32.mrf.mxu0 }
 0x2c9   :  { %v416_v43 = vmul.f32 %v400_v36, %v4183_v28 }
 0x2cb   :  { %v418_v49 = vadd.f32 %v416_v43, %v414_v45 }
 0x2d0   :  { %v402_v37 = vpop.f32.mrf.mxu0 }
 0x2d1   :  { %v417_v44 = vmul.f32 %v402_v37, %v4183_v28 }
 0x2d3   :  { %v419_v50 = vadd.f32 %v417_v44, %v415_v46 }
 0x2d8   :  { %v405_v38 = vpop.f32.mrf.mxu0 }
 0x2d9   :  { %v420_v47 = vmul.f32 %v405_v38, %v4188_v32 }
 0x2db   :  { %v422_v52 = vadd.f32 %v420_v47, %v418_v49 }
 0x2e0   :  { %v407_v48 = vpop.f32.mrf.mxu0 }
 0x2e1   :  { %v421_v51 = vmul.f32 %v407_v48, %v4188_v32 }
 0x2e3   :  { %v423_v53 = vadd.f32 %v421_v51, %v419_v50 }
 0x2e5   :  { %v424_v54 = vpack.c.bf16 %v423_v53, %v422_v52 }
 0x2e7   :  { %3398 = vmatmul.msk.bf16.vlgmr.msrb.gmra.mxu1 %vm142_vm0, %v424_v54 }
 0x364   :  { %v450_v56 = vpop.f32.mrf.mxu1 }
 0x365   :  { %v451_v57 = vadd.f32 %v3683_v55, %v450_v56 }
 0x367   :  { %v457_v58 = vadd.f32 %v451_v57, %v4148_v4 }
 0x369   :  { %v459_v59 = vsel %vm142_vm0, %v457_v58, 0.0 }
 0x36a   :  { %460 = vadd.xlane.f32.xlu1 %v459_v59  ;;  %v3684_v59 = vld [vmem:[%s5464_s11 + $0x12] ss:$0 sm:$0xff] }
 0x36c   :  { %v452_v60 = vpop.f32.mrf.mxu1 }
 0x36d   :  { %v453_v61 = vadd.f32 %v3683_v55, %v452_v60 }
 0x36f   :  { %v458_v62 = vadd.f32 %v453_v61, %v4153_v5 }
 0x371   :  { %v462_v63 = vsel %vm142_vm0, %v458_v62, 0.0 }
 0x372   :  { %463 = vadd.xlane.f32.xlu2 %v462_v63 }
 0x3dd   :  { %v461_v4 = vpop.xlane.xlu1 %460 }
 0x3de   :  { %v472_v10 = vmul.f32 %v4274_v9, %v461_v4 }
 0x3e0   :  { %v4277_v11 = vsub.f32 %v457_v58, %v472_v10 }
 0x3e2   :  { %v476_v5 = vmul.f32 %v4277_v11, %v4277_v11  ;;  %v487_v3 = vmul.f32 %v3684_v59, %v4277_v11 }
 0x3e4   :  { %v478_v12 = vsel %vm142_vm0, %v476_v5, 0.0 }
 0x3e5   :  { %v464_v13 = vpop.xlane.xlu2 %463  ;;  %479 = vadd.xlane.f32.xlu0 %v478_v12  ;;  %v3685_v12 = vld [vmem:[%s5464_s11 + $0x13] ss:$0 sm:$0xff] }
 0x3e6   :  { %v473_v14 = vmul.f32 %v4274_v9, %v464_v13 }
 0x3e8   :  { %v4283_v15 = vsub.f32 %v458_v62, %v473_v14 }
 0x3ea   :  { %v477_v16 = vmul.f32 %v4283_v15, %v4283_v15  ;;  %v488_v4 = vmul.f32 %v3684_v59, %v4283_v15  ;;  %v3636_v15 = vld [vmem:[%s5460_s7 + $0xd8] sm:$0xff] }
 0x3eb   :  { %629 = vmatpush.bf16.msra.mxu1 %v3636_v15 }
 0x3ec   :  { %v481_v18 = vsel %vm142_vm0, %v477_v16, 0.0 }
 0x3ed   :  { %482 = vadd.xlane.f32.xlu1 %v481_v18 }
 0x458   :  { %v480_v19 = vpop.xlane.xlu0 %479 }
 0x459   :  { %v484_v20 = vmul.f32 0.032258064, %v480_v19  ;;  %v3635_v19 = vld [vmem:[%s5460_s7 + $0xd0] sm:$0xff] }
 0x45a   :  { %630 = vmatpush.bf16.msra.mxu1 %v3635_v19 }
 0x45b   :  { %3748 = vrsqrt.f32 %v484_v20  ;;  %vm496_vm3 = vcmp.eq.f32.partialorder %v484_v20, inf  ;;  %v499_v38 = vand.u32 2147483648, %v484_v20  ;;  %vm498_vm4 = vcmp.eq.f32.partialorder %v484_v20, 0.0 }
 0x460   :  { %v483_v23 = vpop.xlane.xlu1 %482 }
 0x461   :  { %v3749_v25 = vpop.eup %3748  ;;  %v485_v26 = vmul.f32 0.032258064, %v483_v23  ;;  %v3639_v23 = vld [vmem:[%s5460_s7 + $0x50] sm:$0xff] }
 0x462   :  { %v490_v27 = vmul.f32 %v3749_v25, %v484_v20 }
 0x463   :  { %3750 = vrsqrt.f32 %v485_v26  ;;  %vm508_vm5 = vcmp.eq.f32.partialorder %v485_v26, inf  ;;  %v511_v46 = vand.u32 2147483648, %v485_v26  ;;  %vm510_vm6 = vcmp.eq.f32.partialorder %v485_v26, 0.0 }
 0x464   :  { %v491_v29 = vmul.f32 %v3749_v25, %v490_v27 }
 0x466   :  { %v492_v30 = vmul.f32 0.5, %v491_v29  ;;  %v3638_v29 = vld [vmem:[%s5460_s7 + $0x48] sm:$0xff] }
 0x467   :  { %772 = vmatpush.bf16.msra.mxu2 %v3638_v29 }
 0x468   :  { %v493_v31 = vsub.f32 1.5, %v492_v30 }
 0x469   :  { %v3751_v33 = vpop.eup %3750 }
 0x46a   :  { %v494_v34 = vmul.f32 %v3749_v25, %v493_v31  ;;  %v502_v35 = vmul.f32 %v3751_v33, %v485_v26 }
 0x46c   :  { %v495_v36 = vmul.f32 %v494_v34, %v484_v20  ;;  %v503_v37 = vmul.f32 %v3751_v33, %v502_v35  ;;  %v4336_v35 = vld [vmem:[%s5454_s1] sm:$0xff] }
 0x46e   :  { %v497_v39 = vsel %vm496_vm3, %v484_v20, %v495_v36  ;;  %v504_v40 = vmul.f32 0.5, %v503_v37  ;;  %v3634_v20 = vld [vmem:[%s5460_s7 + $0xc8] sm:$0xff]  ;;  %v3637_v37 = vld [vmem:[%s5460_s7 + $0x40] sm:$0xff] }
 0x46f   :  { %v500_v41 = vsel %vm498_vm4, %v499_v38, %v497_v39  ;;  %631 = vmatpush.bf16.msra.mxu1 %v3634_v20  ;;  %v4341_v36 = vld [vmem:[%s5454_s1 + $0x8] sm:$0xff]  ;;  %773 = vmatpush.bf16.msra.mxu2 %v3637_v37  ;;  %v69_v37 = vld [vmem:[%s5456_s3] sm:$0xff] }
 0x470   :  { %v513_v42 = vadd.f32 1e-06, %v500_v41  ;;  %v505_v43 = vsub.f32 1.5, %v504_v40  ;;  %v4348_v39 = vpack.c.bf16 %v4341_v36, %v4336_v35  ;;  %v4356_v40 = vld [vmem:[%s5454_s1 + $0x10] sm:$0xff]  ;;  %v4361_v41 = vld [vmem:[%s5454_s1 + $0x18] sm:$0xff] }
 0x472   :  { %3752 = vrcp.f32 %v513_v42  ;;  %v506_v44 = vmul.f32 %v3751_v33, %v505_v43  ;;  %v526_v56 = vand.u32 2147483648, %v513_v42  ;;  %vm520_vm8 = vweird.f32 %v513_v42 }
 0x473   :  { %v524_v57 = vand.u32 2147483647, %v513_v42  ;;  %632 = vmatpush.bf16.msra.mxu1 %v3633_v21 }
 0x474   :  { %v507_v45 = vmul.f32 %v506_v44, %v485_v26  ;;  %v527_v62 = vor.u32 1.1754944e-38, %v526_v56 }
 0x475   :  { %vm525_vm10 = vcmp.eq.f32.partialorder %v524_v57, 8.507059e+37 }
 0x476   :  { %v509_v47 = vsel %vm508_vm5, %v485_v26, %v507_v45  ;;  %v3686_v26 = vld [vmem:[%s5465_s12] ss:$0 sm:$0xff] }
 0x477   :  { %v512_v48 = vsel %vm510_vm6, %v511_v46, %v509_v47  ;;  %804 = vmatpush.bf16.msrb.mxu1 %v3640_v22  ;;  %v3689_v46 = vld [vmem:[%s5464_s11 + $0x8] ss:$0 sm:$0xff] }
 0x478   :  { %v3753_v49 = vpop.eup %3752  ;;  %v514_v50 = vadd.f32 1e-06, %v512_v48 }
 0x479   :  { %v516_v51 = vmul.f32 %v3753_v49, %v513_v42  ;;  %vm521_vm7 = vweird.f32 %v3753_v49  ;;  %v4365_v42 = vpack.c.bf16 %v4361_v41, %v4356_v40 }
 0x47a   :  { %3754 = vrcp.f32 %v514_v50  ;;  %vm522_vm9 = vmor %vm520_vm8, %vm521_vm7  ;;  %v541_v63 = vand.u32 2147483648, %v514_v50  ;;  %v539_v1 = vand.u32 2147483647, %v514_v50  ;;  %vm535_vm12 = vweird.f32 %v514_v50 }
 0x47b   :  { %v517_v52 = vsub.f32 1.0, %v516_v51  ;;  %805 = vmatpush.bf16.msrb.mxu1 %v3639_v23 }
 0x47c   :  { %v542_v8 = vor.u32 1.1754944e-38, %v541_v63  ;;  %vm540_vm14 = vcmp.eq.f32.partialorder %v539_v1, 8.507059e+37 }
 0x47d   :  { %v518_v53 = vmul.f32 %v3753_v49, %v517_v52 }
 0x47f   :  { %v519_v54 = vadd.f32 %v3753_v49, %v518_v53 }
 0x480   :  { %v3755_v55 = vpop.eup %3754 }
 0x481   :  { %v531_v58 = vmul.f32 %v3755_v55, %v514_v50  ;;  %v523_v60 = vsel %vm522_vm9, %v3753_v49, %v519_v54  ;;  %vm536_vm11 = vweird.f32 %v3755_v55 }
 0x482   :  { %v528_v2 = vsel %vm525_vm10, %v527_v62, %v523_v60  ;;  %vm537_vm13 = vmor %vm535_vm12, %vm536_vm11 }
 0x483   :  { %v532_v61 = vsub.f32 1.0, %v531_v58  ;;  %v529_v10 = vmul.f32 %v528_v2, %v487_v3 }
 0x485   :  { %v533_v0 = vmul.f32 %v3755_v55, %v532_v61  ;;  %v4302_v16 = vadd.f32 %v3685_v12, %v529_v10 }
 0x487   :  { %v534_v7 = vadd.f32 %v3755_v55, %v533_v0 }
 0x489   :  { %v538_v5 = vsel %vm537_vm13, %v3755_v55, %v534_v7 }
 0x48a   :  { %v543_v13 = vsel %vm540_vm14, %v542_v8, %v538_v5  ;;  %v3688_v8 = vld [vmem:[%s5464_s11 + $0x9] ss:$0 sm:$0xff] }
 0x48b   :  { %v544_v14 = vmul.f32 %v543_v13, %v488_v4 }
 0x48d   :  { %v4304_v18 = vadd.f32 %v3685_v12, %v544_v14 }
 0x48f   :  { %v562_v11 = vpack.c.bf16 %v4304_v18, %v4302_v16 }
 0x491   :  { %3407 = vmatmul.msk.bf16.vlgmr.msrb.gmra.mxu2 %vm142_vm0, %v562_v11 }
 0x4a1   :  { %3433 = vmatmul.msk.bf16.vlgmr.msra.gmra.mxu2 %vm142_vm0, %v4348_v39 }
 0x4b1   :  { %3434 = vmatmul.msk.bf16.gmra.mxu2 %vm142_vm0, %v4365_v42 }
 0x514   :  { %v588_v25 = vpop.f32.mrf.mxu2 }
 0x515   :  { %v589_v27 = vadd.f32 %v3686_v26, %v588_v25 }
 0x517   :  { %v593_v33 = vmax.f32 %v589_v27, 0.0 }
 0x51c   :  { %v590_v30 = vpop.f32.mrf.mxu2 }
 0x51d   :  { %v591_v31 = vadd.f32 %v3686_v26, %v590_v30 }
 0x51f   :  { %v594_v34 = vmax.f32 %v591_v31, 0.0 }
 0x521   :  { %v595_v38 = vpack.c.bf16 %v594_v34, %v593_v33 }
 0x523   :  { %3424 = vmatmul.msk.bf16.vlgmr.msra.gmra.mxu1 %vm621_vm15, %v595_v38 }
 0x524   :  { %v775_v44 = vpop.f32.mrf.mxu2 }
 0x525   :  { %v776_v47 = vadd.f32 %v3689_v46, %v775_v44 }
 0x527   :  { %v857_v51 = vmul.f32 %v776_v47, %v4183_v28  ;;  %v861_v53 = vmul.f32 %v776_v47, %v4188_v32  ;;  %v849_v20 = vmul.f32 %v776_v47, %v4172_v17  ;;  %v853_v27 = vmul.f32 %v776_v47, %v4178_v24  ;;  %v70_v47 = vld [vmem:[%s5456_s3 + $0x8] sm:$0xff] }
 0x52c   :  { %v777_v48 = vpop.f32.mrf.mxu2 }
 0x52d   :  { %v778_v50 = vadd.f32 %v3689_v46, %v777_v48 }
 0x52f   :  { %v858_v52 = vmul.f32 %v778_v50, %v4183_v28  ;;  %v862_v54 = vmul.f32 %v778_v50, %v4188_v32  ;;  %v850_v21 = vmul.f32 %v778_v50, %v4172_v17  ;;  %v854_v29 = vmul.f32 %v778_v50, %v4178_v24 }
 0x531   :  { %v869_v55 = vpack.c.bf16 %v858_v52, %v857_v51  ;;  %v871_v56 = vpack.c.bf16 %v862_v54, %v861_v53  ;;  %v865_v22 = vpack.c.bf16 %v850_v21, %v849_v20  ;;  %v867_v30 = vpack.c.bf16 %v854_v29, %v853_v27  ;;  %v71_v51 = vld [vmem:[%s5456_s3 + $0x10] sm:$0xff] }
 0x533   :  { %3443 = vmatmul.msk.bf16.vlgmr.msrb.gmra.mxu1 %vm142_vm0, %v4348_v39 }
 0x534   :  { %v780_v57 = vpop.f32.mrf.mxu2 }
 0x535   :  { %v781_v59 = vadd.f32 %v3689_v46, %v780_v57 }
 0x537   :  { %v863_v63 = vmul.f32 %v781_v59, %v4188_v32  ;;  %v859_v0 = vmul.f32 %v781_v59, %v4183_v28  ;;  %v851_v23 = vmul.f32 %v781_v59, %v4172_v17  ;;  %v855_v31 = vmul.f32 %v781_v59, %v4178_v24  ;;  %v73_v59 = vld [vmem:[%s5456_s3 + $0x20] sm:$0xff] }
 0x53c   :  { %v782_v60 = vpop.f32.mrf.mxu2 }
 0x53d   :  { %v783_v62 = vadd.f32 %v3689_v46, %v782_v60 }
 0x53f   :  { %v860_v1 = vmul.f32 %v783_v62, %v4183_v28  ;;  %v864_v2 = vmul.f32 %v783_v62, %v4188_v32  ;;  %v852_v25 = vmul.f32 %v783_v62, %v4172_v17  ;;  %v856_v33 = vmul.f32 %v783_v62, %v4178_v24 }
 0x541   :  { %v870_v3 = vpack.c.bf16 %v860_v1, %v859_v0  ;;  %v872_v7 = vpack.c.bf16 %v864_v2, %v863_v63  ;;  %v866_v26 = vpack.c.bf16 %v852_v25, %v851_v23  ;;  %v868_v34 = vpack.c.bf16 %v856_v33, %v855_v31  ;;  %v74_v63 = vld [vmem:[%s5456_s3 + $0x28] sm:$0xff] }
 0x543   :  { %3444 = vmatmul.msk.bf16.gmra.mxu1 %vm142_vm0, %v4365_v42 }
 0x5a0   :  { %v4373_v43 = vpop.f32.mrf.mxu1 }
 0x5a8   :  { %v4375_v45 = vpop.f32.mrf.mxu1 }
 0x5b0   :  { %v807_v49 = vpop.f32.mrf.mxu1 }
 0x5b1   :  { %v808_v11 = vadd.f32 %v3688_v8, %v807_v49 }
 0x5b8   :  { %v809_v58 = vpop.f32.mrf.mxu1 }
 0x5b9   :  { %v810_v13 = vadd.f32 %v3688_v8, %v809_v58 }
 0x5bb   :  { %v873_v15 = vpack.c.bf16 %v810_v13, %v808_v11  ;;  %v3642_v13 = vld [vmem:[%s5460_s7 + $0x68] sm:$0xff]  ;;  %v77_v11 = vld [vmem:[%s5456_s3 + $0x40] sm:$0xff] }
 0x5bc   :  { %836 = vmatpush.bf16.msrb.mxu2 %v3642_v13 }
 0x5bd   :  { %v900_v19 = vsel %vm142_vm0, %v873_v15, 0 }
 0x5c0   :  { %v812_v61 = vpop.f32.mrf.mxu1 }
 0x5c1   :  { %v813_v10 = vadd.f32 %v3688_v8, %v812_v61 }
 0x5c8   :  { %v814_v4 = vpop.f32.mrf.mxu1 }
 0x5c9   :  { %v815_v5 = vadd.f32 %v3688_v8, %v814_v4 }
 0x5cb   :  { %v874_v12 = vpack.c.bf16 %v815_v5, %v813_v10  ;;  %v76_v10 = vld [vmem:[%s5456_s3 + $0x38] sm:$0xff] }
 0x5cd   :  { %v903_v14 = vsel %vm142_vm0, %v874_v12, 0 }
 0x5ce   :  { %911 = vmatpush.bf16.xpose.msra.mxu3 %v903_v14 }
 0x5d6   :  { %912 = vmatpush.bf16.xpose.msra.mxu3 %v900_v19  ;;  %v3641_v19 = vld [vmem:[%s5460_s7 + $0x60] sm:$0xff] }
 0x5d7   :  { %837 = vmatpush.bf16.msrb.mxu2 %v3641_v19 }
 0x5da   :  { %3453 = vmatmul.msk.bf16.vlgmr.msrb.gmra.mxu2 %vm142_vm0, %v4348_v39  ;;  %v78_v39 = vld [vmem:[%s5456_s3 + $0x48] sm:$0xff] }
 0x5dd   :  { %3455 = vmatmul.msk.bf16.vlgmr.msra.gmra.mxu3 %vm142_vm0, %v865_v22 }
 0x5ea   :  { %3454 = vmatmul.msk.bf16.gmra.mxu2 %vm142_vm0, %v4365_v42 }
 0x5ed   :  { %3456 = vmatmul.msk.bf16.gmra.mxu3 %vm142_vm0, %v866_v26 }
 0x5fd   :  { %3457 = vmatmul.msk.bf16.gmra.mxu3 %vm142_vm0, %v867_v30 }
 0x60d   :  { %3458 = vmatmul.msk.bf16.gmra.mxu3 %vm142_vm0, %v868_v34 }
 0x61d   :  { %3459 = vmatmul.msk.bf16.gmra.mxu3 %vm142_vm0, %v869_v55  ;;  %v72_v55 = vld [vmem:[%s5456_s3 + $0x18] sm:$0xff] }
 0x62d   :  { %3460 = vmatmul.msk.bf16.gmra.mxu3 %vm142_vm0, %v870_v3  ;;  %v75_v3 = vld [vmem:[%s5456_s3 + $0x30] sm:$0xff] }
 0x63d   :  { %3461 = vmatmul.msk.bf16.gmra.mxu3 %vm142_vm0, %v871_v56 }
 0x64d   :  { %3462 = vmatmul.msk.bf16.gmra.mxu3 %vm142_vm0, %v872_v7 }
 0x660   :  { %v914_v38 = vpop.f32.mrf.mxu3 }
 0x661   :  { %v915_v44 = vadd.f32 %v914_v38, %v69_v37 }
 0x663   :  { %v954_v46 = vsel %vm142_vm0, %v915_v44, -inf }
 0x664   :  { %955 = vmax.xlane.f32.xlu2 %v954_v46 }
 0x668   :  { %v916_v48 = vpop.f32.mrf.mxu3 }
 0x669   :  { %v917_v49 = vadd.f32 %v916_v48, %v70_v47 }
 0x66b   :  { %v957_v50 = vsel %vm142_vm0, %v917_v49, -inf }
 0x66c   :  { %958 = vmax.xlane.f32.xlu0 %v957_v50 }
 0x670   :  { %v919_v52 = vpop.f32.mrf.mxu3 }
 0x671   :  { %v920_v53 = vadd.f32 %v919_v52, %v71_v51 }
 0x673   :  { %v960_v54 = vsel %vm142_vm0, %v920_v53, -inf }
 0x674   :  { %961 = vmax.xlane.f32.xlu1 %v960_v54 }
 0x678   :  { %v921_v56 = vpop.f32.mrf.mxu3 }
 0x679   :  { %v4424_v57 = vadd.f32 %v921_v56, %v72_v55 }
 0x67b   :  { %v963_v58 = vsel %vm142_vm0, %v4424_v57, -inf }
 0x67c   :  { %964 = vmax.xlane.f32.xlu2 %v963_v58 }
 0x680   :  { %v924_v60 = vpop.f32.mrf.mxu3 }
 0x681   :  { %v4431_v61 = vadd.f32 %v924_v60, %v73_v59  ;;  %v80_v59 = vld [vmem:[%s5456_s3 + $0x58] sm:$0xff] }
 0x683   :  { %v966_v62 = vsel %vm142_vm0, %v4431_v61, -inf }
 0x684   :  { %967 = vmax.xlane.f32.xlu0 %v966_v62 }
 0x688   :  { %v926_v0 = vpop.f32.mrf.mxu3 }
 0x689   :  { %v4438_v1 = vadd.f32 %v926_v0, %v74_v63 }
 0x68b   :  { %v969_v2 = vsel %vm142_vm0, %v4438_v1, -inf }
 0x68c   :  { %970 = vmax.xlane.f32.xlu1 %v969_v2 }
 0x690   :  { %v929_v7 = vpop.f32.mrf.mxu3 }
 0x691   :  { %v4445_v8 = vadd.f32 %v929_v7, %v75_v3 }
 0x693   :  { %v972_v4 = vsel %vm142_vm0, %v4445_v8, -inf }
 0x694   :  { %973 = vmax.xlane.f32.xlu2 %v972_v4  ;;  %v81_v4 = vld [vmem:[%s5456_s3 + $0x60] sm:$0xff] }
 0x698   :  { %v931_v5 = vpop.f32.mrf.mxu3 }
 0x699   :  { %v4452_v12 = vadd.f32 %v931_v5, %v76_v10 }
 0x69b   :  { %v975_v14 = vsel %vm142_vm0, %v4452_v12, -inf }
 0x69c   :  { %976 = vmax.xlane.f32.xlu0 %v975_v14 }
 0x6a0   :  { %v934_v15 = vpop.f32.mrf.mxu3 }
 0x6a1   :  { %v4465_v20 = vadd.f32 %v934_v15, %v77_v11 }
 0x6a3   :  { %v978_v21 = vsel %vm142_vm0, %v4465_v20, -inf }
 0x6a4   :  { %979 = vmax.xlane.f32.xlu0 %v978_v21  ;;  %v82_v21 = vld [vmem:[%s5456_s3 + $0x68] sm:$0xff] }
 0x6a8   :  { %v936_v23 = vpop.f32.mrf.mxu3 }
 0x6a9   :  { %v4480_v42 = vadd.f32 %v936_v23, %v78_v39 }
 0x6ab   :  { %v981_v48 = vsel %vm142_vm0, %v4480_v42, -inf }
 0x6b0   :  { %v939_v31 = vpop.f32.mrf.mxu3 }
 0x6b8   :  { %v941_v50 = vpop.f32.mrf.mxu3 }
 0x6b9   :  { %v4503_v62 = vadd.f32 %v941_v50, %v80_v59 }
 0x6bb   :  { %v987_v3 = vsel %vm142_vm0, %v4503_v62, -inf }
 0x6c0   :  { %v944_v60 = vpop.f32.mrf.mxu3 }
 0x6c1   :  { %v4515_v10 = vadd.f32 %v944_v60, %v81_v4 }
 0x6c3   :  { %v990_v15 = vsel %vm142_vm0, %v4515_v10, -inf }
 0x6d7   :  { %v956_v22 = vpop.xlane.xlu2 %955 }
 0x6d8   :  { %v1002_v25 = vsub.f32 %v915_v44, %v956_v22 }
 0x6da   :  { %v1018_v26 = vmul.f32 1.442695, %v1002_v25 }
 0x6dc   :  { %3756 = vpow2.f32 %v1018_v26 }
 0x6df   :  { %v959_v27 = vpop.xlane.xlu0 %958 }
 0x6e0   :  { %v1003_v29 = vsub.f32 %v917_v49, %v959_v27  ;;  %v79_v49 = vld [vmem:[%s5456_s3 + $0x50] sm:$0xff] }
 0x6e1   :  { %v4491_v51 = vadd.f32 %v939_v31, %v79_v49 }
 0x6e2   :  { %v4473_v30 = vpop.eup %3756  ;;  %v1020_v33 = vmul.f32 1.442695, %v1003_v29 }
 0x6e3   :  { %v1050_v34 = vsel %vm142_vm0, %v4473_v30, 0.0  ;;  %v984_v58 = vsel %vm142_vm0, %v4491_v51, -inf }
 0x6e4   :  { %3758 = vpow2.f32 %v1020_v33  ;;  %1051 = vadd.xlane.f32.xlu1 %v1050_v34  ;;  %v83_v33 = vld [vmem:[%s5456_s3 + $0x70] sm:$0xff] }
 0x6e7   :  { %v962_v37 = vpop.xlane.xlu1 %961 }
 0x6e8   :  { %v1004_v38 = vsub.f32 %v920_v53, %v962_v37 }
 0x6ea   :  { %v4482_v44 = vpop.eup %3758  ;;  %v1022_v46 = vmul.f32 1.442695, %v1004_v38 }
 0x6eb   :  { %v1053_v47 = vsel %vm142_vm0, %v4482_v44, 0.0 }
 0x6ec   :  { %3760 = vpow2.f32 %v1022_v46  ;;  %1054 = vadd.xlane.f32.xlu2 %v1053_v47  ;;  %982 = vmax.xlane.f32.xlu1 %v981_v48  ;;  %v84_v48 = vld [vmem:[%s5456_s3 + $0x78] sm:$0xff] }
 0x6ef   :  { %v965_v52 = vpop.xlane.xlu2 %964 }
 0x6f0   :  { %v1005_v53 = vsub.f32 %v4424_v57, %v965_v52 }
 0x6f2   :  { %v4494_v54 = vpop.eup %3760  ;;  %v1024_v55 = vmul.f32 1.442695, %v1005_v53 }
 0x6f3   :  { %v1056_v56 = vsel %vm142_vm0, %v4494_v54, 0.0 }
 0x6f4   :  { %3762 = vpow2.f32 %v1024_v55  ;;  %1057 = vadd.xlane.f32.xlu2 %v1056_v56  ;;  %985 = vmax.xlane.f32.xlu1 %v984_v58 }
 0x6f7   :  { %v968_v57 = vpop.xlane.xlu0 %967 }
 0x6f8   :  { %v1006_v63 = vsub.f32 %v4431_v61, %v968_v57  ;;  %v946_v61 = vpop.f32.mrf.mxu3  ;;  %v839_v57 = vpop.f32.mrf.mxu2 }
 0x6f9   :  { %v4527_v22 = vadd.f32 %v946_v61, %v82_v21 }
 0x6fa   :  { %v4506_v0 = vpop.eup %3762  ;;  %v1026_v2 = vmul.f32 1.442695, %v1006_v63 }
 0x6fb   :  { %v1059_v7 = vsel %vm142_vm0, %v4506_v0, 0.0  ;;  %v993_v31 = vsel %vm142_vm0, %v4527_v22, -inf }
 0x6fc   :  { %3764 = vpow2.f32 %v1026_v2  ;;  %988 = vmax.xlane.f32.xlu2 %v987_v3  ;;  %1060 = vadd.xlane.f32.xlu0 %v1059_v7  ;;  %v3690_v2 = vld [vmem:[%s5464_s11 + $0xa] ss:$0 sm:$0xff] }
 0x6ff   :  { %v971_v5 = vpop.xlane.xlu1 %970 }
 0x700   :  { %v1007_v13 = vsub.f32 %v4438_v1, %v971_v5  ;;  %v949_v26 = vpop.f32.mrf.mxu3  ;;  %v840_v5 = vadd.f32 %v3690_v2, %v839_v57 }
 0x701   :  { %v4539_v34 = vadd.f32 %v949_v26, %v83_v33 }
 0x702   :  { %v4518_v14 = vpop.eup %3764  ;;  %v1028_v11 = vmul.f32 1.442695, %v1007_v13 }
 0x703   :  { %v1062_v19 = vsel %vm142_vm0, %v4518_v14, 0.0  ;;  %v996_v46 = vsel %vm142_vm0, %v4539_v34, -inf }
 0x704   :  { %3766 = vpow2.f32 %v1028_v11  ;;  %991 = vmax.xlane.f32.xlu2 %v990_v15  ;;  %1063 = vadd.xlane.f32.xlu0 %v1062_v19 }
 0x707   :  { %v974_v23 = vpop.xlane.xlu2 %973 }
 0x708   :  { %v1008_v1 = vsub.f32 %v4445_v8, %v974_v23  ;;  %v951_v49 = vpop.f32.mrf.mxu3 }
 0x709   :  { %v4551_v50 = vadd.f32 %v951_v49, %v84_v48 }
 0x70a   :  { %v4530_v25 = vpop.eup %3766  ;;  %v1030_v27 = vmul.f32 1.442695, %v1008_v1 }
 0x70b   :  { %v1065_v29 = vsel %vm142_vm0, %v4530_v25, 0.0  ;;  %v999_v58 = vsel %vm142_vm0, %v4551_v50, -inf }
 0x70c   :  { %3768 = vpow2.f32 %v1030_v27  ;;  %1066 = vadd.xlane.f32.xlu1 %v1065_v29  ;;  %994 = vmax.xlane.f32.xlu0 %v993_v31 }
 0x70f   :  { %v977_v8 = vpop.xlane.xlu0 %976 }
 0x710   :  { %v1009_v39 = vsub.f32 %v4452_v12, %v977_v8 }
 0x712   :  { %v4542_v37 = vpop.eup %3768  ;;  %v1032_v38 = vmul.f32 1.442695, %v1009_v39 }
 0x713   :  { %v1068_v47 = vsel %vm142_vm0, %v4542_v37, 0.0 }
 0x714   :  { %3770 = vpow2.f32 %v1032_v38  ;;  %997 = vmax.xlane.f32.xlu0 %v996_v46  ;;  %1069 = vadd.xlane.f32.xlu1 %v1068_v47 }
 0x717   :  { %v980_v12 = vpop.xlane.xlu0 %979 }
 0x718   :  { %v1010_v52 = vsub.f32 %v4465_v20, %v980_v12  ;;  %v841_v20 = vpop.f32.mrf.mxu2 }
 0x719   :  { %v842_v61 = vadd.f32 %v3690_v2, %v841_v20 }
 0x71a   :  { %v4554_v53 = vpop.eup %3770  ;;  %v1034_v55 = vmul.f32 1.442695, %v1010_v52 }
 0x71b   :  { %v1071_v56 = vsel %vm142_vm0, %v4554_v53, 0.0  ;;  %v1138_v11 = vpack.c.bf16 %v842_v61, %v840_v5 }
 0x71c   :  { %3772 = vpow2.f32 %v1034_v55  ;;  %1072 = vadd.xlane.f32.xlu2 %v1071_v56  ;;  %1000 = vmax.xlane.f32.xlu1 %v999_v58 }
 0x720   :  { %v844_v63 = vpop.f32.mrf.mxu2 }
 0x721   :  { %v845_v3 = vadd.f32 %v3690_v2, %v844_v63 }
 0x722   :  { %v4560_v59 = vpop.eup %3772 }
 0x723   :  { %v1074_v60 = vsel %vm142_vm0, %v4560_v59, 0.0 }
 0x724   :  { %1075 = vadd.xlane.f32.xlu2 %v1074_v60 }
 0x728   :  { %v846_v7 = vpop.f32.mrf.mxu2 }
 0x729   :  { %v847_v4 = vadd.f32 %v3690_v2, %v846_v7 }
 0x72b   :  { %v1139_v13 = vpack.c.bf16 %v847_v4, %v845_v3 }
 0x72d   :  { %1170 = vmatpush.bf16.msrb.mxu0 %v1139_v13 }
 0x731   :  { %1171 = vmatpush.bf16.msrb.mxu0 %v1138_v11 }
 0x757   :  { %v1052_v15 = vpop.xlane.xlu1 %1051 }
 0x758   :  { %3774 = vrcp.f32 %v1052_v15 }
 0x75e   :  { %v3775_v26 = vpop.eup %3774 }
 0x75f   :  { %v983_v19 = vpop.xlane.xlu1 %982  ;;  %v1055_v21 = vpop.xlane.xlu2 %1054  ;;  %v1114_v29 = vmul.f32 %v3775_v26, %v4473_v30 }
 0x760   :  { %v1011_v23 = vsub.f32 %v4480_v42, %v983_v19  ;;  %3776 = vrcp.f32 %v1055_v21 }
 0x762   :  { %v1036_v1 = vmul.f32 1.442695, %v1011_v23 }
 0x764   :  { %3778 = vpow2.f32 %v1036_v1 }
 0x766   :  { %v3777_v27 = vpop.eup %3776 }
 0x767   :  { %v1115_v31 = vmul.f32 %v3777_v27, %v4482_v44  ;;  %v986_v33 = vpop.xlane.xlu1 %985  ;;  %v1058_v8 = vpop.xlane.xlu2 %1057 }
 0x768   :  { %v1012_v39 = vsub.f32 %v4491_v51, %v986_v33 }
 0x769   :  { %v1130_v38 = vpack.c.bf16 %v1115_v31, %v1114_v29 }
 0x76a   :  { %v4571_v46 = vpop.eup %3778  ;;  %v1038_v47 = vmul.f32 1.442695, %v1012_v39 }
 0x76b   :  { %3463 = vmatmul.msk.bf16.vlgmr.msrb.gmra.mxu0 %vm142_vm0, %v1130_v38  ;;  %v1077_v42 = vsel %vm142_vm0, %v4571_v46, 0.0 }
 0x76c   :  { %3780 = vpow2.f32 %v1038_v47  ;;  %1078 = vadd.xlane.f32.xlu0 %v1077_v42 }
 0x76d   :  { %3782 = vrcp.f32 %v1058_v8 }
 0x76f   :  { %v1061_v48 = vpop.xlane.xlu0 %1060  ;;  %v989_v30 = vpop.xlane.xlu2 %988 }
 0x770   :  { %3784 = vrcp.f32 %v1061_v48  ;;  %v1013_v44 = vsub.f32 %v4503_v62, %v989_v30 }
 0x772   :  { %v4577_v49 = vpop.eup %3780  ;;  %v1040_v51 = vmul.f32 1.442695, %v1013_v44 }
 0x773   :  { %v1080_v12 = vsel %vm142_vm0, %v4577_v49, 0.0  ;;  %v3783_v52 = vpop.eup %3782 }
 0x774   :  { %3786 = vpow2.f32 %v1040_v51  ;;  %1081 = vadd.xlane.f32.xlu1 %v1080_v12  ;;  %v1116_v60 = vmul.f32 %v3783_v52, %v4494_v54 }
 0x776   :  { %v3785_v55 = vpop.eup %3784 }
 0x777   :  { %v1064_v56 = vpop.xlane.xlu0 %1063  ;;  %v992_v58 = vpop.xlane.xlu2 %991  ;;  %v1117_v57 = vmul.f32 %v3785_v55, %v4506_v0 }
 0x778   :  { %v1014_v20 = vsub.f32 %v4515_v10, %v992_v58 }
 0x779   :  { %v1131_v63 = vpack.c.bf16 %v1117_v57, %v1116_v60 }
 0x77a   :  { %v4584_v62 = vpop.eup %3786  ;;  %v1042_v2 = vmul.f32 1.442695, %v1014_v20 }
 0x77b   :  { %3464 = vmatmul.msk.bf16.gmra.mxu0 %vm142_vm0, %v1131_v63  ;;  %v1083_v3 = vsel %vm142_vm0, %v4584_v62, 0.0 }
 0x77c   :  { %3788 = vpow2.f32 %v1042_v2  ;;  %1084 = vadd.xlane.f32.xlu2 %v1083_v3 }
 0x77d   :  { %3790 = vrcp.f32 %v1064_v56 }
 0x77f   :  { %v1067_v7 = vpop.xlane.xlu1 %1066  ;;  %v995_v4 = vpop.xlane.xlu0 %994 }
 0x780   :  { %3792 = vrcp.f32 %v1067_v7  ;;  %v1015_v54 = vsub.f32 %v4527_v22, %v995_v4 }
 0x782   :  { %v4590_v0 = vpop.eup %3788  ;;  %v1044_v10 = vmul.f32 1.442695, %v1015_v54 }
 0x783   :  { %v1086_v5 = vsel %vm142_vm0, %v4590_v0, 0.0  ;;  %v3791_v61 = vpop.eup %3790 }
 0x784   :  { %3794 = vpow2.f32 %v1044_v10  ;;  %1087 = vadd.xlane.f32.xlu0 %v1086_v5  ;;  %v1118_v19 = vmul.f32 %v3791_v61, %v4518_v14 }
 0x786   :  { %v3793_v13 = vpop.eup %3792 }
 0x787   :  { %v998_v11 = vpop.xlane.xlu0 %997  ;;  %v1070_v15 = vpop.xlane.xlu1 %1069  ;;  %v1119_v21 = vmul.f32 %v3793_v13, %v4530_v25 }
 0x788   :  { %v1016_v23 = vsub.f32 %v4539_v34, %v998_v11 }
 0x789   :  { %v1132_v1 = vpack.c.bf16 %v1119_v21, %v1118_v19 }
 0x78a   :  { %v3795_v22 = vpop.eup %3794  ;;  %v1046_v26 = vmul.f32 1.442695, %v1016_v23 }
 0x78b   :  { %3465 = vmatmul.msk.bf16.gmra.mxu0 %vm142_vm0, %v1132_v1  ;;  %v1089_v27 = vsel %vm142_vm0, %v3795_v22, 0.0 }
 0x78c   :  { %3796 = vpow2.f32 %v1046_v26  ;;  %1090 = vadd.xlane.f32.xlu1 %v1089_v27 }
 0x78d   :  { %3798 = vrcp.f32 %v1070_v15 }
 0x78f   :  { %v1001_v29 = vpop.xlane.xlu1 %1000  ;;  %v1073_v31 = vpop.xlane.xlu2 %1072 }
 0x790   :  { %v1017_v33 = vsub.f32 %v4551_v50, %v1001_v29  ;;  %3800 = vrcp.f32 %v1073_v31 }
 0x792   :  { %v3797_v14 = vpop.eup %3796  ;;  %v1048_v8 = vmul.f32 1.442695, %v1017_v33 }
 0x793   :  { %v1092_v25 = vsel %vm142_vm0, %v3797_v14, 0.0  ;;  %v3799_v34 = vpop.eup %3798 }
 0x794   :  { %3802 = vpow2.f32 %v1048_v8  ;;  %1093 = vadd.xlane.f32.xlu2 %v1092_v25  ;;  %v1120_v38 = vmul.f32 %v3799_v34, %v4542_v37 }
 0x796   :  { %v3801_v39 = vpop.eup %3800 }
 0x797   :  { %v1121_v47 = vmul.f32 %v3801_v39, %v4554_v53  ;;  %v1076_v50 = vpop.xlane.xlu2 %1075  ;;  %v3644_v39 = vld [vmem:[%s5460_s7 + $0x78] sm:$0xff] }
 0x798   :  { %3804 = vrcp.f32 %v1076_v50  ;;  %1268 = vmatpush.bf16.msra.mxu1 %v3644_v39 }
 0x799   :  { %v1133_v42 = vpack.c.bf16 %v1121_v47, %v1120_v38 }
 0x79a   :  { %v3803_v48 = vpop.eup %3802 }
 0x79b   :  { %3466 = vmatmul.msk.bf16.gmra.mxu0 %vm142_vm0, %v1133_v42  ;;  %v1095_v30 = vsel %vm142_vm0, %v3803_v48, 0.0 }
 0x79c   :  { %1096 = vadd.xlane.f32.xlu0 %v1095_v30 }
 0x79e   :  { %v3805_v51 = vpop.eup %3804 }
 0x79f   :  { %v1122_v52 = vmul.f32 %v3805_v51, %v4560_v59 }
 0x7df   :  { %v1079_v44 = vpop.xlane.xlu0 %1078 }
 0x7e0   :  { %3806 = vrcp.f32 %v1079_v44 }
 0x7e6   :  { %v3807_v12 = vpop.eup %3806 }
 0x7e7   :  { %v1123_v55 = vmul.f32 %v3807_v12, %v4571_v46  ;;  %v1082_v53 = vpop.xlane.xlu1 %1081 }
 0x7e8   :  { %v1173_v37 = vpop.f32.mrf.mxu0  ;;  %3808 = vrcp.f32 %v1082_v53 }
 0x7e9   :  { %v1134_v56 = vpack.c.bf16 %v1123_v55, %v1122_v52  ;;  %v1213_v11 = vmul.f32 %v1173_v37, %v4172_v17 }
 0x7eb   :  { %3467 = vmatmul.msk.bf16.gmra.mxu0 %vm142_vm0, %v1134_v56 }
 0x7ee   :  { %v3809_v57 = vpop.eup %3808 }
 0x7ef   :  { %v1085_v58 = vpop.xlane.xlu2 %1084  ;;  %v1124_v63 = vmul.f32 %v3809_v57, %v4577_v49 }
 0x7f0   :  { %3810 = vrcp.f32 %v1085_v58  ;;  %v1175_v60 = vpop.f32.mrf.mxu0 }
 0x7f1   :  { %v1214_v50 = vmul.f32 %v1175_v60, %v4172_v17 }
 0x7f6   :  { %v3811_v20 = vpop.eup %3810 }
 0x7f7   :  { %v1125_v2 = vmul.f32 %v3811_v20, %v4584_v62  ;;  %v1088_v59 = vpop.xlane.xlu0 %1087 }
 0x7f8   :  { %v1178_v3 = vpop.f32.mrf.mxu0  ;;  %3812 = vrcp.f32 %v1088_v59 }
 0x7f9   :  { %v1135_v7 = vpack.c.bf16 %v1125_v2, %v1124_v63 }
 0x7fb   :  { %3468 = vmatmul.msk.bf16.gmra.mxu0 %vm142_vm0, %v1135_v7 }
 0x7fe   :  { %v3813_v54 = vpop.eup %3812 }
 0x7ff   :  { %v1091_v46 = vpop.xlane.xlu1 %1090  ;;  %v1126_v5 = vmul.f32 %v3813_v54, %v4590_v0 }
 0x800   :  { %3814 = vrcp.f32 %v1091_v46  ;;  %v1180_v4 = vpop.f32.mrf.mxu0 }
 0x801   :  { %v1216_v2 = vmul.f32 %v1180_v4, %v4172_v17  ;;  %v3691_v4 = vld [vmem:[%s5464_s11 + $0xb] ss:$0 sm:$0xff] }
 0x806   :  { %v3815_v10 = vpop.eup %3814 }
 0x807   :  { %v1127_v61 = vmul.f32 %v3815_v10, %v3795_v22  ;;  %v1094_v15 = vpop.xlane.xlu2 %1093  ;;  %v1215_v22 = vmul.f32 %v1178_v3, %v4172_v17 }
 0x808   :  { %v1183_v13 = vpop.f32.mrf.mxu0  ;;  %3816 = vrcp.f32 %v1094_v15 }
 0x809   :  { %v1217_v49 = vmul.f32 %v1183_v13, %v4178_v24  ;;  %v1136_v62 = vpack.c.bf16 %v1127_v61, %v1126_v5 }
 0x80b   :  { %v1221_v19 = vadd.f32 %v1217_v49, %v1213_v11  ;;  %3469 = vmatmul.msk.bf16.gmra.mxu0 %vm142_vm0, %v1136_v62 }
 0x80e   :  { %v3817_v1 = vpop.eup %3816 }
 0x80f   :  { %v1097_v21 = vpop.xlane.xlu0 %1096  ;;  %v1128_v27 = vmul.f32 %v3817_v1, %v3797_v14  ;;  %v3643_v14 = vld [vmem:[%s5460_s7 + $0x70] sm:$0xff] }
 0x810   :  { %3818 = vrcp.f32 %v1097_v21  ;;  %v1185_v23 = vpop.f32.mrf.mxu0  ;;  %1269 = vmatpush.bf16.msra.mxu1 %v3643_v14 }
 0x811   :  { %v1218_v30 = vmul.f32 %v1185_v23, %v4178_v24 }
 0x813   :  { %v1222_v12 = vadd.f32 %v1218_v30, %v1214_v50 }
 0x816   :  { %v3819_v26 = vpop.eup %3818 }
 0x817   :  { %v1129_v29 = vmul.f32 %v3819_v26, %v3803_v48 }
 0x818   :  { %v1188_v0 = vpop.f32.mrf.mxu0 }
 0x819   :  { %v1219_v31 = vmul.f32 %v1188_v0, %v4178_v24  ;;  %v1137_v33 = vpack.c.bf16 %v1129_v29, %v1128_v27 }
 0x81b   :  { %v1223_v8 = vadd.f32 %v1219_v31, %v1215_v22  ;;  %3470 = vmatmul.msk.bf16.gmra.mxu0 %vm142_vm0, %v1137_v33 }
 0x820   :  { %v1190_v25 = vpop.f32.mrf.mxu0 }
 0x821   :  { %v1220_v60 = vmul.f32 %v1190_v25, %v4178_v24 }
 0x823   :  { %v1224_v59 = vadd.f32 %v1220_v60, %v1216_v2  ;;  %v3648_v2 = vld [vmem:[%s5460_s7 + $0x98] sm:$0xff] }
 0x824   :  { %1528 = vmatpush.bf16.msrb.mxu1 %v3648_v2 }
 0x868   :  { %v1193_v34 = vpop.f32.mrf.mxu0 }
 0x869   :  { %v1225_v44 = vmul.f32 %v1193_v34, %v4183_v28 }
 0x86b   :  { %v1229_v37 = vadd.f32 %v1225_v44, %v1221_v19 }
 0x870   :  { %v1195_v38 = vpop.f32.mrf.mxu0 }
 0x871   :  { %v1226_v51 = vmul.f32 %v1195_v38, %v4183_v28 }
 0x873   :  { %v1230_v56 = vadd.f32 %v1226_v51, %v1222_v12 }
 0x878   :  { %v1198_v47 = vpop.f32.mrf.mxu0 }
 0x879   :  { %v1227_v3 = vmul.f32 %v1198_v47, %v4183_v28 }
 0x87b   :  { %v1231_v10 = vadd.f32 %v1227_v3, %v1223_v8 }
 0x880   :  { %v1200_v42 = vpop.f32.mrf.mxu0 }
 0x881   :  { %v1228_v7 = vmul.f32 %v1200_v42, %v4183_v28 }
 0x883   :  { %v1232_v5 = vadd.f32 %v1228_v7, %v1224_v59  ;;  %v3647_v59 = vld [vmem:[%s5460_s7 + $0x90] sm:$0xff] }
 0x884   :  { %1529 = vmatpush.bf16.msrb.mxu1 %v3647_v59 }
 0x888   :  { %v1203_v48 = vpop.f32.mrf.mxu0 }
 0x889   :  { %v1233_v52 = vmul.f32 %v1203_v48, %v4188_v32 }
 0x88b   :  { %v1237_v58 = vadd.f32 %v1233_v52, %v1229_v37 }
 0x890   :  { %v1205_v55 = vpop.f32.mrf.mxu0 }
 0x891   :  { %v1234_v53 = vmul.f32 %v1205_v55, %v4188_v32 }
 0x893   :  { %v1238_v57 = vadd.f32 %v1234_v53, %v1230_v56 }
 0x895   :  { %v1241_v20 = vpack.c.bf16 %v1238_v57, %v1237_v58 }
 0x897   :  { %3479 = vmatmul.msk.bf16.vlgmr.msra.gmra.mxu1 %vm142_vm0, %v1241_v20 }
 0x898   :  { %v1208_v63 = vpop.f32.mrf.mxu0 }
 0x899   :  { %v1235_v46 = vmul.f32 %v1208_v63, %v4188_v32 }
 0x89b   :  { %v1239_v13 = vadd.f32 %v1235_v46, %v1231_v10 }
 0x8a0   :  { %v1210_v54 = vpop.f32.mrf.mxu0 }
 0x8a1   :  { %v1236_v61 = vmul.f32 %v1210_v54, %v4188_v32  ;;  %v3646_v54 = vld [vmem:[%s5460_s7 + $0x88] sm:$0xff] }
 0x8a2   :  { %1496 = vmatpush.bf16.msra.mxu2 %v3646_v54 }
 0x8a3   :  { %v1240_v11 = vadd.f32 %v1236_v61, %v1232_v5  ;;  %v3645_v61 = vld [vmem:[%s5460_s7 + $0x80] sm:$0xff] }
 0x8a5   :  { %v1242_v49 = vpack.c.bf16 %v1240_v11, %v1239_v13 }
 0x8a6   :  { %1497 = vmatpush.bf16.msra.mxu2 %v3645_v61 }
 0x8a7   :  { %3480 = vmatmul.msk.bf16.gmra.mxu1 %vm142_vm0, %v1242_v49 }
 0x8b7   :  { %3499 = vmatmul.msk.bf16.vlgmr.msrb.gmra.mxu1 %vm142_vm0, %v4157_v6 }
 0x914   :  { %v1271_v62 = vpop.f32.mrf.mxu1 }
 0x915   :  { %v1272_v15 = vadd.f32 %v3691_v4, %v1271_v62 }
 0x917   :  { %v1283_v19 = vadd.f32 %v1272_v15, %v4336_v35 }
 0x919   :  { %v1287_v21 = vsel %vm142_vm0, %v1283_v19, 0.0 }
 0x91a   :  { %1288 = vadd.xlane.f32.xlu1 %v1287_v21 }
 0x91c   :  { %v1273_v23 = vpop.f32.mrf.mxu1 }
 0x91d   :  { %v1274_v1 = vadd.f32 %v3691_v4, %v1273_v23 }
 0x91f   :  { %v1284_v26 = vadd.f32 %v1274_v1, %v4341_v36 }
 0x921   :  { %v1290_v27 = vsel %vm142_vm0, %v1284_v26, 0.0 }
 0x922   :  { %1291 = vadd.xlane.f32.xlu2 %v1290_v27 }
 0x924   :  { %v1276_v29 = vpop.f32.mrf.mxu1 }
 0x925   :  { %v1277_v0 = vadd.f32 %v3691_v4, %v1276_v29 }
 0x927   :  { %v1285_v22 = vadd.f32 %v1277_v0, %v4356_v40 }
 0x929   :  { %v1293_v31 = vsel %vm142_vm0, %v1285_v22, 0.0 }
 0x92a   :  { %1294 = vadd.xlane.f32.xlu0 %v1293_v31 }
 0x92c   :  { %v1278_v33 = vpop.f32.mrf.mxu1 }
 0x92d   :  { %v1279_v8 = vadd.f32 %v3691_v4, %v1278_v33 }
 0x92f   :  { %v1286_v35 = vadd.f32 %v1279_v8, %v4361_v41 }
 0x931   :  { %v1296_v25 = vsel %vm142_vm0, %v1286_v35, 0.0 }
 0x932   :  { %1297 = vadd.xlane.f32.xlu1 %v1296_v25 }
 0x98d   :  { %v1289_v34 = vpop.xlane.xlu1 %1288 }
 0x98e   :  { %v1299_v36 = vmul.f32 %v1289_v34, %v4274_v9 }
 0x990   :  { %v4650_v39 = vsub.f32 %v1283_v19, %v1299_v36 }
 0x992   :  { %v1307_v38 = vmul.f32 %v4650_v39, %v4650_v39 }
 0x994   :  { %v1311_v40 = vsel %vm142_vm0, %v1307_v38, 0.0 }
 0x995   :  { %1312 = vadd.xlane.f32.xlu2 %v1311_v40  ;;  %v1292_v14 = vpop.xlane.xlu2 %1291 }
 0x996   :  { %v1300_v47 = vmul.f32 %v1292_v14, %v4274_v9 }
 0x998   :  { %v4656_v42 = vsub.f32 %v1284_v26, %v1300_v47 }
 0x99a   :  { %v1308_v41 = vmul.f32 %v4656_v42, %v4656_v42 }
 0x99c   :  { %v1314_v48 = vsel %vm142_vm0, %v1308_v41, 0.0 }
 0x99d   :  { %v1295_v30 = vpop.xlane.xlu0 %1294  ;;  %1315 = vadd.xlane.f32.xlu0 %v1314_v48 }
 0x99e   :  { %v1301_v50 = vmul.f32 %v1295_v30, %v4274_v9 }
 0x9a0   :  { %v4662_v44 = vsub.f32 %v1285_v22, %v1301_v50 }
 0x9a2   :  { %v1309_v51 = vmul.f32 %v4662_v44, %v4662_v44 }
 0x9a4   :  { %v1317_v12 = vsel %vm142_vm0, %v1309_v51, 0.0 }
 0x9a5   :  { %v1298_v52 = vpop.xlane.xlu1 %1297  ;;  %1318 = vadd.xlane.f32.xlu1 %v1317_v12 }
 0x9a6   :  { %v1302_v55 = vmul.f32 %v1298_v52, %v4274_v9 }
 0x9a8   :  { %v4668_v37 = vsub.f32 %v1286_v35, %v1302_v55 }
 0x9aa   :  { %v1310_v56 = vmul.f32 %v4668_v37, %v4668_v37 }
 0x9ac   :  { %v1320_v53 = vsel %vm142_vm0, %v1310_v56, 0.0 }
 0x9ad   :  { %1321 = vadd.xlane.f32.xlu2 %v1320_v53 }
 0xa08   :  { %v1313_v58 = vpop.xlane.xlu2 %1312 }
 0xa09   :  { %v1323_v57 = vmul.f32 0.032258064, %v1313_v58 }
 0xa0b   :  { %3820 = vrsqrt.f32 %v1323_v57  ;;  %vm1339_vm2 = vcmp.eq.f32.partialorder %v1323_v57, inf  ;;  %v1342_v19 = vand.u32 2147483648, %v1323_v57  ;;  %vm1341_vm3 = vcmp.eq.f32.partialorder %v1323_v57, 0.0 }
 0xa10   :  { %v1316_v20 = vpop.xlane.xlu0 %1315 }
 0xa11   :  { %v3821_v63 = vpop.eup %3820  ;;  %v1324_v60 = vmul.f32 0.032258064, %v1316_v20 }
 0xa12   :  { %v1333_v3 = vmul.f32 %v3821_v63, %v1323_v57 }
 0xa13   :  { %3822 = vrsqrt.f32 %v1324_v60  ;;  %vm1351_vm4 = vcmp.eq.f32.partialorder %v1324_v60, inf  ;;  %v1354_v25 = vand.u32 2147483648, %v1324_v60  ;;  %vm1353_vm5 = vcmp.eq.f32.partialorder %v1324_v60, 0.0 }
 0xa14   :  { %v1334_v7 = vmul.f32 %v3821_v63, %v1333_v3 }
 0xa16   :  { %v1335_v46 = vmul.f32 0.5, %v1334_v7 }
 0xa18   :  { %v1336_v10 = vsub.f32 1.5, %v1335_v46  ;;  %v1319_v5 = vpop.xlane.xlu1 %1318 }
 0xa19   :  { %v3823_v13 = vpop.eup %3822  ;;  %v1325_v11 = vmul.f32 0.032258064, %v1319_v5 }
 0xa1a   :  { %v1337_v49 = vmul.f32 %v3821_v63, %v1336_v10  ;;  %v1345_v4 = vmul.f32 %v3823_v13, %v1324_v60  ;;  %v3692_v10 = vld [vmem:[%s5464_s11 + $0x16] ss:$0 sm:$0xff] }
 0xa1b   :  { %3824 = vrsqrt.f32 %v1325_v11  ;;  %vm1363_vm6 = vcmp.eq.f32.partialorder %v1325_v11, inf  ;;  %v1366_v55 = vand.u32 2147483648, %v1325_v11  ;;  %vm1365_vm7 = vcmp.eq.f32.partialorder %v1325_v11, 0.0 }
 0xa1c   :  { %v1338_v62 = vmul.f32 %v1337_v49, %v1323_v57  ;;  %v1346_v15 = vmul.f32 %v3823_v13, %v1345_v4 }
 0xa1e   :  { %v1340_v21 = vsel %vm1339_vm2, %v1323_v57, %v1338_v62  ;;  %v1347_v23 = vmul.f32 0.5, %v1346_v15 }
 0xa1f   :  { %v1343_v1 = vsel %vm1341_vm3, %v1342_v19, %v1340_v21 }
 0xa20   :  { %v1380_v26 = vadd.f32 1e-06, %v1343_v1  ;;  %v1348_v27 = vsub.f32 1.5, %v1347_v23  ;;  %v1322_v29 = vpop.xlane.xlu2 %1321  ;;  %v1328_v23 = vmul.f32 %v3692_v10, %v4650_v39 }
 0xa21   :  { %v3825_v0 = vpop.eup %3824  ;;  %v4687_v22 = vmul.f32 0.032258064, %v1322_v29  ;;  %v1329_v29 = vmul.f32 %v3692_v10, %v4656_v42 }
 0xa22   :  { %3826 = vrcp.f32 %v1380_v26  ;;  %v1349_v31 = vmul.f32 %v3823_v13, %v1348_v27  ;;  %v1357_v33 = vmul.f32 %v3825_v0, %v1325_v11  ;;  %v1395_v2 = vand.u32 2147483648, %v1380_v26 }
 0xa23   :  { %3828 = vrsqrt.f32 %v4687_v22  ;;  %vm1389_vm9 = vweird.f32 %v1380_v26  ;;  %v1393_v7 = vand.u32 2147483647, %v1380_v26  ;;  %vm1375_vm11 = vcmp.eq.f32.partialorder %v4687_v22, inf }
 0xa24   :  { %v1350_v8 = vmul.f32 %v1349_v31, %v1324_v60  ;;  %v1358_v35 = vmul.f32 %v3825_v0, %v1357_v33  ;;  %v1396_v49 = vor.u32 1.1754944e-38, %v1395_v2  ;;  %vm1377_vm14 = vcmp.eq.f32.partialorder %v4687_v22, 0.0 }
 0xa25   :  { %vm1394_vm12 = vcmp.eq.f32.partialorder %v1393_v7, 8.507059e+37 }
 0xa26   :  { %v1352_v34 = vsel %vm1351_vm4, %v1324_v60, %v1350_v8  ;;  %v1359_v36 = vmul.f32 0.5, %v1358_v35  ;;  %v3693_v35 = vld [vmem:[%s5464_s11 + $0x17] ss:$0 sm:$0xff] }
 0xa27   :  { %v1355_v38 = vsel %vm1353_vm5, %v1354_v25, %v1352_v34 }
 0xa28   :  { %v3827_v40 = vpop.eup %3826  ;;  %v1381_v14 = vadd.f32 1e-06, %v1355_v38  ;;  %v1360_v47 = vsub.f32 1.5, %v1359_v36 }
 0xa29   :  { %v3829_v41 = vpop.eup %3828  ;;  %v1385_v48 = vmul.f32 %v3827_v40, %v1380_v26  ;;  %vm1390_vm8 = vweird.f32 %v3827_v40 }
 0xa2a   :  { %3830 = vrcp.f32 %v1381_v14  ;;  %v1361_v30 = vmul.f32 %v3825_v0, %v1360_v47  ;;  %v1369_v50 = vmul.f32 %v3829_v41, %v4687_v22  ;;  %vm4691_vm10 = vmor %vm1389_vm9, %vm1390_vm8  ;;  %v1410_v4 = vand.u32 2147483648, %v1381_v14 }
 0xa2b   :  { %v1386_v51 = vsub.f32 1.0, %v1385_v48  ;;  %v1408_v15 = vand.u32 2147483647, %v1381_v14  ;;  %vm1404_vm2 = vweird.f32 %v1381_v14 }
 0xa2c   :  { %v1362_v12 = vmul.f32 %v1361_v30, %v1325_v11  ;;  %v1370_v52 = vmul.f32 %v3829_v41, %v1369_v50  ;;  %v1411_v0 = vor.u32 1.1754944e-38, %v1410_v4  ;;  %v3695_v4 = vld [vmem:[%s5464_s11 + $0xc] ss:$0 sm:$0xff] }
 0xa2d   :  { %v1387_v56 = vmul.f32 %v3827_v40, %v1386_v51  ;;  %vm1409_vm4 = vcmp.eq.f32.partialorder %v1408_v15, 8.507059e+37 }
 0xa2e   :  { %v1364_v53 = vsel %vm1363_vm6, %v1325_v11, %v1362_v12  ;;  %v1371_v58 = vmul.f32 0.5, %v1370_v52  ;;  %v1378_v11 = vand.u32 2147483648, %v4687_v22 }
 0xa2f   :  { %v1388_v57 = vadd.f32 %v3827_v40, %v1387_v56  ;;  %v1367_v20 = vsel %vm1365_vm7, %v1366_v55, %v1364_v53 }
 0xa30   :  { %v3831_v63 = vpop.eup %3830  ;;  %v1372_v60 = vsub.f32 1.5, %v1371_v58  ;;  %v1382_v3 = vadd.f32 1e-06, %v1367_v20  ;;  %v1330_v58 = vmul.f32 %v3692_v10, %v4662_v44  ;;  %v1531_v44 = vpop.f32.mrf.mxu1 }
 0xa31   :  { %v1400_v59 = vmul.f32 %v3831_v63, %v1381_v14  ;;  %v1392_v5 = vsel %vm4691_vm10, %v3827_v40, %v1388_v57  ;;  %vm1405_vm13 = vweird.f32 %v3831_v63 }
 0xa32   :  { %v1373_v46 = vmul.f32 %v3829_v41, %v1372_v60  ;;  %3832 = vrcp.f32 %v1382_v3  ;;  %v1397_v21 = vsel %vm1394_vm12, %v1396_v49, %v1392_v5  ;;  %vm1406_vm3 = vmor %vm1404_vm2, %vm1405_vm13  ;;  %v1425_v41 = vand.u32 2147483648, %v1382_v3  ;;  %v3694_v5 = vld [vmem:[%s5464_s11 + $0xd] ss:$0 sm:$0xff] }
 0xa33   :  { %v1401_v61 = vsub.f32 1.0, %v1400_v59  ;;  %v1398_v33 = vmul.f32 %v1397_v21, %v1328_v23  ;;  %vm1419_vm6 = vweird.f32 %v1382_v3  ;;  %v1423_v48 = vand.u32 2147483647, %v1382_v3 }
 0xa34   :  { %v1374_v13 = vmul.f32 %v1373_v46, %v4687_v22  ;;  %v1426_v12 = vor.u32 1.1754944e-38, %v1425_v41 }
 0xa35   :  { %v1402_v62 = vmul.f32 %v3831_v63, %v1401_v61  ;;  %v4710_v36 = vadd.f32 %v3693_v35, %v1398_v33  ;;  %vm1424_vm8 = vcmp.eq.f32.partialorder %v1423_v48, 8.507059e+37 }
 0xa36   :  { %v1376_v19 = vsel %vm1375_vm11, %v4687_v22, %v1374_v13 }
 0xa37   :  { %v1403_v1 = vadd.f32 %v3831_v63, %v1402_v62  ;;  %v1379_v26 = vsel %vm1377_vm14, %v1378_v11, %v1376_v19 }
 0xa38   :  { %v3833_v27 = vpop.eup %3832  ;;  %v1383_v31 = vadd.f32 1e-06, %v1379_v26 }
 0xa39   :  { %v1407_v8 = vsel %vm1406_vm3, %v3831_v63, %v1403_v1  ;;  %v1415_v22 = vmul.f32 %v3833_v27, %v1382_v3  ;;  %vm1420_vm5 = vweird.f32 %v3833_v27  ;;  %v1331_v63 = vmul.f32 %v3692_v10, %v4668_v37  ;;  %v1533_v10 = vpop.f32.mrf.mxu1 }
 0xa3a   :  { %v1412_v25 = vsel %vm1409_vm4, %v1411_v0, %v1407_v8  ;;  %3834 = vrcp.f32 %v1383_v31  ;;  %vm1421_vm7 = vmor %vm1419_vm6, %vm1420_vm5  ;;  %v1440_v52 = vand.u32 2147483648, %v1383_v31  ;;  %v1438_v56 = vand.u32 2147483647, %v1383_v31 }
 0xa3b   :  { %v1413_v39 = vmul.f32 %v1412_v25, %v1329_v29  ;;  %v1416_v34 = vsub.f32 1.0, %v1415_v22  ;;  %vm1434_vm10 = vweird.f32 %v1383_v31  ;;  %v1532_v37 = vadd.f32 %v3694_v5, %v1531_v44 }
 0xa3c   :  { %v1441_v20 = vor.u32 1.1754944e-38, %v1440_v52  ;;  %vm1439_vm12 = vcmp.eq.f32.partialorder %v1438_v56, 8.507059e+37  ;;  %v1534_v61 = vadd.f32 %v3694_v5, %v1533_v10 }
 0xa3d   :  { %v4712_v38 = vadd.f32 %v3693_v35, %v1413_v39  ;;  %v1417_v42 = vmul.f32 %v3833_v27, %v1416_v34 }
 0xa3e   :  { %v1587_v13 = vpack.c.bf16 %v1534_v61, %v1532_v37  ;;  %v88_v37 = vld [vmem:[%s5457_s4 + $0x18] sm:$0xff] }
 0xa3f   :  { %v1469_v40 = vpack.c.bf16 %v4712_v38, %v4710_v36  ;;  %v1418_v14 = vadd.f32 %v3833_v27, %v1417_v42 }
 0xa40   :  { %v3835_v47 = vpop.eup %3834  ;;  %v1613_v11 = vsel %vm142_vm0, %v1587_v13, 0 }
 0xa41   :  { %3489 = vmatmul.msk.bf16.vlgmr.msra.gmra.mxu2 %vm142_vm0, %v1469_v40  ;;  %v1430_v30 = vmul.f32 %v3835_v47, %v1383_v31  ;;  %v1422_v50 = vsel %vm1421_vm7, %v3833_v27, %v1418_v14  ;;  %vm1435_vm9 = vweird.f32 %v3835_v47 }
 0xa42   :  { %v1427_v53 = vsel %vm1424_vm8, %v1426_v12, %v1422_v50  ;;  %vm1436_vm11 = vmor %vm1434_vm10, %vm1435_vm9  ;;  %1622 = vmatpush.bf16.xpose.msrb.mxu2 %v1613_v11  ;;  %v89_v11 = vld [vmem:[%s5457_s4 + $0x20] sm:$0xff] }
 0xa43   :  { %v1431_v51 = vsub.f32 1.0, %v1430_v30  ;;  %v1428_v60 = vmul.f32 %v1427_v53, %v1330_v58  ;;  %v85_v53 = vld [vmem:[%s5457_s4] sm:$0xff] }
 0xa45   :  { %v1432_v55 = vmul.f32 %v3835_v47, %v1431_v51  ;;  %v4719_v59 = vadd.f32 %v3693_v35, %v1428_v60 }
 0xa47   :  { %v1433_v57 = vadd.f32 %v3835_v47, %v1432_v55 }
 0xa49   :  { %v1437_v2 = vsel %vm1436_vm11, %v3835_v47, %v1433_v57 }
 0xa4a   :  { %v1442_v3 = vsel %vm1439_vm12, %v1441_v20, %v1437_v2 }
 0xa4b   :  { %v1443_v7 = vmul.f32 %v1442_v3, %v1331_v63  ;;  %v86_v63 = vld [vmem:[%s5457_s4 + $0x8] sm:$0xff] }
 0xa4d   :  { %v4721_v46 = vadd.f32 %v3693_v35, %v1443_v7  ;;  %v87_v7 = vld [vmem:[%s5457_s4 + $0x10] sm:$0xff] }
 0xa4f   :  { %v1470_v54 = vpack.c.bf16 %v4721_v46, %v4719_v59 }
 0xa51   :  { %3490 = vmatmul.msk.bf16.gmra.mxu2 %vm142_vm0, %v1470_v54 }
 0xac4   :  { %v1499_v49 = vpop.f32.mrf.mxu2 }
 0xac5   :  { %v1500_v62 = vadd.f32 %v3695_v4, %v1499_v49 }
 0xac7   :  { %v1563_v21 = vmul.f32 %v1500_v62, %v4172_v17  ;;  %v1571_v23 = vmul.f32 %v1500_v62, %v4183_v28  ;;  %v1575_v29 = vmul.f32 %v1500_v62, %v4188_v32  ;;  %v1567_v51 = vmul.f32 %v1500_v62, %v4178_v24 }
 0xacc   :  { %v1501_v15 = vpop.f32.mrf.mxu2 }
 0xacd   :  { %v1502_v19 = vadd.f32 %v3695_v4, %v1501_v15  ;;  %v90_v15 = vld [vmem:[%s5457_s4 + $0x28] sm:$0xff] }
 0xacf   :  { %v1564_v1 = vmul.f32 %v1502_v19, %v4172_v17  ;;  %v1572_v26 = vmul.f32 %v1502_v19, %v4183_v28  ;;  %v1576_v27 = vmul.f32 %v1502_v19, %v4188_v32  ;;  %v1568_v50 = vmul.f32 %v1502_v19, %v4178_v24 }
 0xad1   :  { %v1579_v0 = vpack.c.bf16 %v1564_v1, %v1563_v21  ;;  %v1583_v31 = vpack.c.bf16 %v1572_v26, %v1571_v23  ;;  %v1585_v33 = vpack.c.bf16 %v1576_v27, %v1575_v29  ;;  %v1581_v12 = vpack.c.bf16 %v1568_v50, %v1567_v51  ;;  %v91_v1 = vld [vmem:[%s5457_s4 + $0x30] sm:$0xff] }
 0xad3   :  { %3509 = vmatmul.msk.bf16.vlgmr.msrb.gmra.mxu2 %vm142_vm0, %v1579_v0  ;;  %v92_v0 = vld [vmem:[%s5457_s4 + $0x38] sm:$0xff] }
 0xad4   :  { %v1504_v8 = vpop.f32.mrf.mxu2 }
 0xad5   :  { %v1505_v35 = vadd.f32 %v3695_v4, %v1504_v8 }
 0xad7   :  { %v1573_v39 = vmul.f32 %v1505_v35, %v4183_v28  ;;  %v1577_v34 = vmul.f32 %v1505_v35, %v4188_v32  ;;  %v1565_v14 = vmul.f32 %v1505_v35, %v4172_v17  ;;  %v1569_v55 = vmul.f32 %v1505_v35, %v4178_v24  ;;  %v93_v35 = vld [vmem:[%s5457_s4 + $0x40] sm:$0xff] }
 0xadc   :  { %v1506_v22 = vpop.f32.mrf.mxu2 }
 0xadd   :  { %v1507_v25 = vadd.f32 %v3695_v4, %v1506_v22 }
 0xadf   :  { %v1574_v42 = vmul.f32 %v1507_v25, %v4183_v28  ;;  %v1578_v40 = vmul.f32 %v1507_v25, %v4188_v32  ;;  %v1566_v47 = vmul.f32 %v1507_v25, %v4172_v17  ;;  %v1570_v52 = vmul.f32 %v1507_v25, %v4178_v24 }
 0xae1   :  { %v1580_v41 = vpack.c.bf16 %v1566_v47, %v1565_v14  ;;  %v1584_v48 = vpack.c.bf16 %v1574_v42, %v1573_v39  ;;  %v1586_v30 = vpack.c.bf16 %v1578_v40, %v1577_v34  ;;  %v1582_v56 = vpack.c.bf16 %v1570_v52, %v1569_v55  ;;  %v3650_v34 = vld [vmem:[%s5460_s7 + $0xa8] sm:$0xff]  ;;  %v3649_v42 = vld [vmem:[%s5460_s7 + $0xa0] sm:$0xff] }
 0xae2   :  { %1555 = vmatpush.bf16.msra.mxu1 %v3650_v34  ;;  %v94_v55 = vld [vmem:[%s5457_s4 + $0x48] sm:$0xff] }
 0xae3   :  { %3510 = vmatmul.msk.bf16.gmra.mxu2 %vm142_vm0, %v1580_v41  ;;  %v98_v34 = vld [vmem:[%s5457_s4 + $0x68] sm:$0xff] }
 0xae6   :  { %1556 = vmatpush.bf16.msra.mxu1 %v3649_v42 }
 0xae9   :  { %3508 = vmatmul.msk.bf16.vlgmr.msra.gmra.mxu1 %vm142_vm0, %v4157_v6 }
 0xaf3   :  { %3511 = vmatmul.msk.bf16.gmra.mxu2 %vm142_vm0, %v1581_v12 }
 0xb03   :  { %3512 = vmatmul.msk.bf16.gmra.mxu2 %vm142_vm0, %v1582_v56 }
 0xb13   :  { %3513 = vmatmul.msk.bf16.gmra.mxu2 %vm142_vm0, %v1583_v31 }
 0xb23   :  { %3514 = vmatmul.msk.bf16.gmra.mxu2 %vm142_vm0, %v1584_v48 }
 0xb33   :  { %3515 = vmatmul.msk.bf16.gmra.mxu2 %vm142_vm0, %v1585_v33 }
 0xb43   :  { %3516 = vmatmul.msk.bf16.gmra.mxu2 %vm142_vm0, %v1586_v30 }
 0xb56   :  { %v1624_v58 = vpop.f32.mrf.mxu2 }
 0xb57   :  { %v1625_v57 = vadd.f32 %v1624_v58, %v85_v53 }
 0xb59   :  { %v1664_v20 = vsel %vm275_vm1, %v1625_v57, -inf }
 0xb5a   :  { %1665 = vmax.xlane.f32.xlu0 %v1664_v20 }
 0xb5e   :  { %v1626_v60 = vpop.f32.mrf.mxu2 }
 0xb5f   :  { %v1627_v2 = vadd.f32 %v1626_v60, %v86_v63  ;;  %v95_v60 = vld [vmem:[%s5457_s4 + $0x50] sm:$0xff] }
 0xb61   :  { %v1667_v3 = vsel %vm275_vm1, %v1627_v2, -inf }
 0xb62   :  { %1668 = vmax.xlane.f32.xlu1 %v1667_v3 }
 0xb66   :  { %v1629_v54 = vpop.f32.mrf.mxu2 }
 0xb67   :  { %v1630_v44 = vadd.f32 %v1629_v54, %v87_v7 }
 0xb69   :  { %v1670_v5 = vsel %vm275_vm1, %v1630_v44, -inf }
 0xb6a   :  { %1671 = vmax.xlane.f32.xlu2 %v1670_v5 }
 0xb6e   :  { %v1631_v10 = vpop.f32.mrf.mxu2 }
 0xb6f   :  { %v4772_v61 = vadd.f32 %v1631_v10, %v88_v37 }
 0xb71   :  { %v1673_v13 = vsel %vm275_vm1, %v4772_v61, -inf }
 0xb72   :  { %1674 = vmax.xlane.f32.xlu0 %v1673_v13  ;;  %v96_v13 = vld [vmem:[%s5457_s4 + $0x58] sm:$0xff] }
 0xb76   :  { %v1634_v49 = vpop.f32.mrf.mxu2 }
 0xb77   :  { %v4779_v4 = vadd.f32 %v1634_v49, %v89_v11 }
 0xb79   :  { %v1676_v62 = vsel %vm275_vm1, %v4779_v4, -inf }
 0xb7a   :  { %1677 = vmax.xlane.f32.xlu1 %v1676_v62 }
 0xb7e   :  { %v1636_v19 = vpop.f32.mrf.mxu2 }
 0xb7f   :  { %v4786_v21 = vadd.f32 %v1636_v19, %v90_v15 }
 0xb81   :  { %v1679_v23 = vsel %vm275_vm1, %v4786_v21, -inf }
 0xb82   :  { %1680 = vmax.xlane.f32.xlu2 %v1679_v23 }
 0xb86   :  { %v1639_v26 = vpop.f32.mrf.mxu2 }
 0xb87   :  { %v4793_v27 = vadd.f32 %v1639_v26, %v91_v1  ;;  %v97_v26 = vld [vmem:[%s5457_s4 + $0x60] sm:$0xff] }
 0xb89   :  { %v1682_v29 = vsel %vm275_vm1, %v4793_v27, -inf }
 0xb8a   :  { %1683 = vmax.xlane.f32.xlu0 %v1682_v29 }
 0xb8e   :  { %v1641_v31 = vpop.f32.mrf.mxu2 }
 0xb8f   :  { %v4800_v33 = vadd.f32 %v1641_v31, %v92_v0 }
 0xb91   :  { %v1685_v8 = vsel %vm275_vm1, %v4800_v33, -inf }
 0xb92   :  { %1686 = vmax.xlane.f32.xlu1 %v1685_v8 }
 0xb96   :  { %v1644_v22 = vpop.f32.mrf.mxu2 }
 0xb97   :  { %v4807_v25 = vadd.f32 %v1644_v22, %v93_v35 }
 0xb99   :  { %v1688_v39 = vsel %vm275_vm1, %v4807_v25, -inf }
 0xb9a   :  { %1689 = vmax.xlane.f32.xlu1 %v1688_v39 }
 0xb9e   :  { %v1646_v14 = vpop.f32.mrf.mxu2 }
 0xb9f   :  { %v4826_v6 = vadd.f32 %v1646_v14, %v94_v55 }
 0xba1   :  { %v1691_v63 = vsel %vm275_vm1, %v4826_v6, -inf }
 0xba6   :  { %v1649_v51 = vpop.f32.mrf.mxu2 }
 0xba7   :  { %v4837_v3 = vadd.f32 %v1649_v51, %v95_v60  ;;  %v99_v51 = vld [vmem:[%s5457_s4 + $0x70] sm:$0xff] }
 0xba9   :  { %v1694_v37 = vsel %vm275_vm1, %v4837_v3, -inf }
 0xbcd   :  { %v1666_v40 = vpop.xlane.xlu0 %1665 }
 0xbce   :  { %v1712_v47 = vsub.f32 %v1625_v57, %v1666_v40 }
 0xbd0   :  { %v1728_v41 = vmul.f32 1.442695, %v1712_v47 }
 0xbd2   :  { %3836 = vpow2.f32 %v1728_v41 }
 0xbd5   :  { %v1669_v48 = vpop.xlane.xlu1 %1668 }
 0xbd6   :  { %v1713_v30 = vsub.f32 %v1627_v2, %v1669_v48  ;;  %v1651_v2 = vpop.f32.mrf.mxu2 }
 0xbd7   :  { %v4849_v49 = vadd.f32 %v1651_v2, %v96_v13 }
 0xbd8   :  { %v4819_v50 = vpop.eup %3836  ;;  %v1730_v12 = vmul.f32 1.442695, %v1713_v30 }
 0xbd9   :  { %v1760_v52 = vsel %vm275_vm1, %v4819_v50, 0.0  ;;  %v1697_v1 = vsel %vm275_vm1, %v4849_v49, -inf }
 0xbda   :  { %3838 = vpow2.f32 %v1730_v12  ;;  %1761 = vadd.xlane.f32.xlu2 %v1760_v52 }
 0xbdd   :  { %v1672_v56 = vpop.xlane.xlu2 %1671 }
 0xbde   :  { %v1714_v53 = vsub.f32 %v1630_v44, %v1672_v56  ;;  %v1654_v11 = vpop.f32.mrf.mxu2 }
 0xbdf   :  { %v4861_v29 = vadd.f32 %v1654_v11, %v97_v26  ;;  %v1558_v11 = vpop.f32.mrf.mxu1 }
 0xbe0   :  { %v4828_v58 = vpop.eup %3838  ;;  %v1732_v57 = vmul.f32 1.442695, %v1714_v53 }
 0xbe1   :  { %v1763_v20 = vsel %vm275_vm1, %v4828_v58, 0.0  ;;  %v1700_v39 = vsel %vm275_vm1, %v4861_v29, -inf }
 0xbe2   :  { %3840 = vpow2.f32 %v1732_v57  ;;  %1764 = vadd.xlane.f32.xlu0 %v1763_v20  ;;  %1692 = vmax.xlane.f32.xlu2 %v1691_v63  ;;  %v100_v20 = vld [vmem:[%s5457_s4 + $0x78] sm:$0xff] }
 0xbe5   :  { %v1675_v7 = vpop.xlane.xlu0 %1674 }
 0xbe6   :  { %v1715_v54 = vsub.f32 %v4772_v61, %v1675_v7 }
 0xbe8   :  { %v4840_v44 = vpop.eup %3840  ;;  %v1734_v5 = vmul.f32 1.442695, %v1715_v54 }
 0xbe9   :  { %v1766_v10 = vsel %vm275_vm1, %v4840_v44, 0.0 }
 0xbea   :  { %3842 = vpow2.f32 %v1734_v5  ;;  %1695 = vmax.xlane.f32.xlu2 %v1694_v37  ;;  %1767 = vadd.xlane.f32.xlu0 %v1766_v10 }
 0xbed   :  { %v1678_v61 = vpop.xlane.xlu1 %1677 }
 0xbee   :  { %v1716_v62 = vsub.f32 %v4779_v4, %v1678_v61  ;;  %v1656_v4 = vpop.f32.mrf.mxu2 }
 0xbef   :  { %v4873_v42 = vadd.f32 %v1656_v4, %v98_v34 }
 0xbf0   :  { %v4852_v15 = vpop.eup %3842  ;;  %v1736_v19 = vmul.f32 1.442695, %v1716_v62  ;;  %v1560_v62 = vpop.f32.mrf.mxu1 }
 0xbf1   :  { %v1769_v23 = vsel %vm275_vm1, %v4852_v15, 0.0  ;;  %v1703_v48 = vsel %vm275_vm1, %v4873_v42, -inf }
 0xbf2   :  { %3844 = vpow2.f32 %v1736_v19  ;;  %1770 = vadd.xlane.f32.xlu1 %v1769_v23  ;;  %1698 = vmax.xlane.f32.xlu0 %v1697_v1 }
 0xbf5   :  { %v1681_v0 = vpop.xlane.xlu2 %1680 }
 0xbf6   :  { %v1717_v31 = vsub.f32 %v4786_v21, %v1681_v0  ;;  %v1659_v47 = vpop.f32.mrf.mxu2 }
 0xbf7   :  { %v4885_v12 = vadd.f32 %v1659_v47, %v99_v51 }
 0xbf8   :  { %v4864_v8 = vpop.eup %3844  ;;  %v1738_v35 = vmul.f32 1.442695, %v1717_v31 }
 0xbf9   :  { %v1772_v22 = vsel %vm275_vm1, %v4864_v8, 0.0  ;;  %v1706_v53 = vsel %vm275_vm1, %v4885_v12, -inf }
 0xbfa   :  { %3846 = vpow2.f32 %v1738_v35  ;;  %1773 = vadd.xlane.f32.xlu1 %v1772_v22  ;;  %1701 = vmax.xlane.f32.xlu0 %v1700_v39 }
 0xbfd   :  { %v1684_v40 = vpop.xlane.xlu0 %1683 }
 0xbfe   :  { %v1718_v21 = vsub.f32 %v4793_v27, %v1684_v40  ;;  %v1661_v63 = vpop.f32.mrf.mxu2 }
 0xbff   :  { %v4897_v60 = vadd.f32 %v1661_v63, %v100_v20 }
 0xc00   :  { %v4876_v14 = vpop.eup %3846  ;;  %v1740_v41 = vmul.f32 1.442695, %v1718_v21 }
 0xc01   :  { %v1775_v30 = vsel %vm275_vm1, %v4876_v14, 0.0  ;;  %v1709_v37 = vsel %vm275_vm1, %v4897_v60, -inf }
 0xc02   :  { %3848 = vpow2.f32 %v1740_v41  ;;  %1704 = vmax.xlane.f32.xlu1 %v1703_v48  ;;  %1776 = vadd.xlane.f32.xlu2 %v1775_v30 }
 0xc05   :  { %v1687_v27 = vpop.xlane.xlu1 %1686 }
 0xc06   :  { %v1719_v52 = vsub.f32 %v4800_v33, %v1687_v27 }
 0xc08   :  { %v4888_v55 = vpop.eup %3848  ;;  %v1742_v56 = vmul.f32 1.442695, %v1719_v52 }
 0xc09   :  { %v1778_v57 = vsel %vm275_vm1, %v4888_v55, 0.0 }
 0xc0a   :  { %3850 = vpow2.f32 %v1742_v56  ;;  %1707 = vmax.xlane.f32.xlu1 %v1706_v53  ;;  %1779 = vadd.xlane.f32.xlu2 %v1778_v57 }
 0xc0d   :  { %v1690_v33 = vpop.xlane.xlu1 %1689 }
 0xc0e   :  { %v1720_v2 = vsub.f32 %v4807_v25, %v1690_v33  ;;  %v3696_v25 = vld [vmem:[%s5464_s11 + $0xe] ss:$0 sm:$0xff] }
 0xc0f   :  { %v1559_v61 = vadd.f32 %v3696_v25, %v1558_v11  ;;  %v1561_v19 = vadd.f32 %v3696_v25, %v1560_v62 }
 0xc10   :  { %v4900_v7 = vpop.eup %3850  ;;  %v1744_v54 = vmul.f32 1.442695, %v1720_v2 }
 0xc11   :  { %v1781_v5 = vsel %vm275_vm1, %v4900_v7, 0.0  ;;  %v1848_v23 = vpack.c.bf16 %v1561_v19, %v1559_v61 }
 0xc12   :  { %3852 = vpow2.f32 %v1744_v54  ;;  %1782 = vadd.xlane.f32.xlu0 %v1781_v5  ;;  %1710 = vmax.xlane.f32.xlu2 %v1709_v37 }
 0xc13   :  { %1880 = vmatpush.bf16.msrb.mxu1 %v1848_v23 }
 0xc18   :  { %v4906_v10 = vpop.eup %3852 }
 0xc19   :  { %v1784_v13 = vsel %vm275_vm1, %v4906_v10, 0.0 }
 0xc1a   :  { %1785 = vadd.xlane.f32.xlu0 %v1784_v13 }
 0xc4d   :  { %v1762_v1 = vpop.xlane.xlu2 %1761 }
 0xc4e   :  { %3854 = vrcp.f32 %v1762_v1 }
 0xc54   :  { %v3855_v35 = vpop.eup %3854 }
 0xc55   :  { %v1765_v26 = vpop.xlane.xlu0 %1764  ;;  %v1693_v0 = vpop.xlane.xlu2 %1692  ;;  %v1824_v39 = vmul.f32 %v3855_v35, %v4819_v50 }
 0xc56   :  { %3856 = vrcp.f32 %v1765_v26  ;;  %v1721_v4 = vsub.f32 %v4826_v6, %v1693_v0 }
 0xc58   :  { %v1746_v31 = vmul.f32 1.442695, %v1721_v4 }
 0xc5a   :  { %3858 = vpow2.f32 %v1746_v31 }
 0xc5c   :  { %v3857_v22 = vpop.eup %3856 }
 0xc5d   :  { %v1825_v34 = vmul.f32 %v3857_v22, %v4828_v58  ;;  %v1768_v40 = vpop.xlane.xlu0 %1767  ;;  %v1696_v21 = vpop.xlane.xlu2 %1695 }
 0xc5e   :  { %v1722_v47 = vsub.f32 %v4837_v3, %v1696_v21 }
 0xc5f   :  { %v1840_v41 = vpack.c.bf16 %v1825_v34, %v1824_v39 }
 0xc60   :  { %v4917_v48 = vpop.eup %3858  ;;  %v1748_v30 = vmul.f32 1.442695, %v1722_v47 }
 0xc61   :  { %3517 = vmatmul.msk.bf16.vlgmr.msrb.gmra.mxu1 %vm275_vm1, %v1840_v41  ;;  %v1787_v6 = vsel %vm275_vm1, %v4917_v48, 0.0 }
 0xc62   :  { %3860 = vpow2.f32 %v1748_v30  ;;  %1788 = vadd.xlane.f32.xlu1 %v1787_v6 }
 0xc63   :  { %3862 = vrcp.f32 %v1768_v40 }
 0xc65   :  { %v1771_v51 = vpop.xlane.xlu1 %1770  ;;  %v1699_v50 = vpop.xlane.xlu0 %1698 }
 0xc66   :  { %3864 = vrcp.f32 %v1771_v51  ;;  %v1723_v58 = vsub.f32 %v4849_v49, %v1699_v50 }
 0xc68   :  { %v4923_v27 = vpop.eup %3860  ;;  %v1750_v3 = vmul.f32 1.442695, %v1723_v58 }
 0xc69   :  { %v1790_v52 = vsel %vm275_vm1, %v4923_v27, 0.0  ;;  %v3863_v56 = vpop.eup %3862 }
 0xc6a   :  { %3866 = vpow2.f32 %v1750_v3  ;;  %1791 = vadd.xlane.f32.xlu2 %v1790_v52  ;;  %v1826_v63 = vmul.f32 %v3863_v56, %v4840_v44 }
 0xc6c   :  { %v3865_v53 = vpop.eup %3864 }
 0xc6d   :  { %v1774_v57 = vpop.xlane.xlu1 %1773  ;;  %v1702_v20 = vpop.xlane.xlu0 %1701  ;;  %v1827_v33 = vmul.f32 %v3865_v53, %v4852_v15 }
 0xc6e   :  { %v1724_v2 = vsub.f32 %v4861_v29, %v1702_v20 }
 0xc6f   :  { %v1841_v54 = vpack.c.bf16 %v1827_v33, %v1826_v63 }
 0xc70   :  { %v4930_v49 = vpop.eup %3866  ;;  %v1752_v5 = vmul.f32 1.442695, %v1724_v2 }
 0xc71   :  { %3518 = vmatmul.msk.bf16.gmra.mxu1 %vm275_vm1, %v1841_v54  ;;  %v1793_v37 = vsel %vm275_vm1, %v4930_v49, 0.0 }
 0xc72   :  { %3868 = vpow2.f32 %v1752_v5  ;;  %1794 = vadd.xlane.f32.xlu0 %v1793_v37 }
 0xc73   :  { %3870 = vrcp.f32 %v1774_v57 }
 0xc75   :  { %v1705_v13 = vpop.xlane.xlu1 %1704  ;;  %v1777_v11 = vpop.xlane.xlu2 %1776 }
 0xc76   :  { %v1725_v44 = vsub.f32 %v4873_v42, %v1705_v13  ;;  %3872 = vrcp.f32 %v1777_v11  ;;  %v3652_v11 = vld [vmem:[%s5460_s7 + $0xb8] sm:$0xff] }
 0xc77   :  { %1977 = vmatpush.bf16.msrb.mxu3 %v3652_v11 }
 0xc78   :  { %v4936_v15 = vpop.eup %3868  ;;  %v1754_v29 = vmul.f32 1.442695, %v1725_v44 }
 0xc79   :  { %v1796_v25 = vsel %vm275_vm1, %v4936_v15, 0.0  ;;  %v3871_v61 = vpop.eup %3870 }
 0xc7a   :  { %3874 = vpow2.f32 %v1754_v29  ;;  %1797 = vadd.xlane.f32.xlu1 %v1796_v25  ;;  %v1828_v1 = vmul.f32 %v3871_v61, %v4864_v8 }
 0xc7c   :  { %v3873_v62 = vpop.eup %3872 }
 0xc7d   :  { %v1708_v19 = vpop.xlane.xlu1 %1707  ;;  %v1780_v23 = vpop.xlane.xlu2 %1779  ;;  %v1829_v26 = vmul.f32 %v3873_v62, %v4876_v14 }
 0xc7e   :  { %v1726_v0 = vsub.f32 %v4885_v12, %v1708_v19 }
 0xc7f   :  { %v1842_v42 = vpack.c.bf16 %v1829_v26, %v1828_v1 }
 0xc80   :  { %v3875_v4 = vpop.eup %3874  ;;  %v1756_v31 = vmul.f32 1.442695, %v1726_v0 }
 0xc81   :  { %3519 = vmatmul.msk.bf16.gmra.mxu1 %vm275_vm1, %v1842_v42  ;;  %v1799_v35 = vsel %vm275_vm1, %v3875_v4, 0.0 }
 0xc82   :  { %3876 = vpow2.f32 %v1756_v31  ;;  %1800 = vadd.xlane.f32.xlu2 %v1799_v35 }
 0xc83   :  { %3878 = vrcp.f32 %v1780_v23 }
 0xc85   :  { %v1783_v22 = vpop.xlane.xlu0 %1782  ;;  %v1711_v39 = vpop.xlane.xlu2 %1710 }
 0xc86   :  { %3880 = vrcp.f32 %v1783_v22  ;;  %v1727_v34 = vsub.f32 %v4897_v60, %v1711_v39 }
 0xc88   :  { %v3877_v8 = vpop.eup %3876  ;;  %v1758_v40 = vmul.f32 1.442695, %v1727_v34 }
 0xc89   :  { %v1802_v14 = vsel %vm275_vm1, %v3877_v8, 0.0  ;;  %v3879_v12 = vpop.eup %3878 }
 0xc8a   :  { %3882 = vpow2.f32 %v1758_v40  ;;  %1803 = vadd.xlane.f32.xlu0 %v1802_v14  ;;  %v1830_v47 = vmul.f32 %v3879_v12, %v4888_v55 }
 0xc8c   :  { %v3881_v21 = vpop.eup %3880 }
 0xc8d   :  { %v1831_v41 = vmul.f32 %v3881_v21, %v4900_v7  ;;  %v1786_v60 = vpop.xlane.xlu0 %1785  ;;  %v3651_v21 = vld [vmem:[%s5460_s7 + $0xb0] sm:$0xff] }
 0xc8e   :  { %3884 = vrcp.f32 %v1786_v60  ;;  %1978 = vmatpush.bf16.msrb.mxu3 %v3651_v21 }
 0xc8f   :  { %v1843_v30 = vpack.c.bf16 %v1831_v41, %v1830_v47 }
 0xc90   :  { %v3883_v6 = vpop.eup %3882 }
 0xc91   :  { %3520 = vmatmul.msk.bf16.gmra.mxu1 %vm275_vm1, %v1843_v30  ;;  %v1805_v51 = vsel %vm275_vm1, %v3883_v6, 0.0 }
 0xc92   :  { %1806 = vadd.xlane.f32.xlu1 %v1805_v51 }
 0xc94   :  { %v3885_v58 = vpop.eup %3884 }
 0xc95   :  { %v1832_v52 = vmul.f32 %v3885_v58, %v4906_v10 }
 0xcd5   :  { %v1789_v50 = vpop.xlane.xlu1 %1788 }
 0xcd6   :  { %3886 = vrcp.f32 %v1789_v50 }
 0xcdc   :  { %v3887_v3 = vpop.eup %3886 }
 0xcdd   :  { %v1833_v56 = vmul.f32 %v3887_v3, %v4917_v48  ;;  %v1792_v7 = vpop.xlane.xlu2 %1791 }
 0xcde   :  { %v1882_v55 = vpop.f32.mrf.mxu1  ;;  %3888 = vrcp.f32 %v1792_v7 }
 0xcdf   :  { %v1844_v53 = vpack.c.bf16 %v1833_v56, %v1832_v52  ;;  %v1922_v61 = vmul.f32 %v1882_v55, %v4172_v17 }
 0xce1   :  { %3521 = vmatmul.msk.bf16.gmra.mxu1 %vm275_vm1, %v1844_v53 }
 0xce4   :  { %v3889_v63 = vpop.eup %3888 }
 0xce5   :  { %v1795_v57 = vpop.xlane.xlu0 %1794  ;;  %v1834_v2 = vmul.f32 %v3889_v63, %v4923_v27 }
 0xce6   :  { %3890 = vrcp.f32 %v1795_v57  ;;  %v1884_v20 = vpop.f32.mrf.mxu1 }
 0xce7   :  { %v1923_v51 = vmul.f32 %v1884_v20, %v4172_v17 }
 0xcec   :  { %v3891_v33 = vpop.eup %3890 }
 0xced   :  { %v1835_v54 = vmul.f32 %v3891_v33, %v4930_v49  ;;  %v1798_v10 = vpop.xlane.xlu1 %1797 }
 0xcee   :  { %v1887_v5 = vpop.f32.mrf.mxu1  ;;  %3892 = vrcp.f32 %v1798_v10 }
 0xcef   :  { %v1845_v37 = vpack.c.bf16 %v1835_v54, %v1834_v2 }
 0xcf1   :  { %3522 = vmatmul.msk.bf16.gmra.mxu1 %vm275_vm1, %v1845_v37 }
 0xcf4   :  { %v3893_v44 = vpop.eup %3892 }
 0xcf5   :  { %v1801_v48 = vpop.xlane.xlu2 %1800  ;;  %v1836_v27 = vmul.f32 %v3893_v44, %v4936_v15 }
 0xcf6   :  { %3894 = vrcp.f32 %v1801_v48  ;;  %v1889_v13 = vpop.f32.mrf.mxu1 }
 0xcf7   :  { %v1925_v2 = vmul.f32 %v1889_v13, %v4172_v17 }
 0xcfc   :  { %v3895_v29 = vpop.eup %3894 }
 0xcfd   :  { %v1837_v25 = vmul.f32 %v3895_v29, %v3875_v4  ;;  %v1804_v23 = vpop.xlane.xlu0 %1803  ;;  %v1924_v4 = vmul.f32 %v1887_v5, %v4172_v17  ;;  %v3697_v17 = vld [vmem:[%s5464_s11 + $0xf] ss:$0 sm:$0xff] }
 0xcfe   :  { %v1892_v49 = vpop.f32.mrf.mxu1  ;;  %3896 = vrcp.f32 %v1804_v23 }
 0xcff   :  { %v1926_v62 = vmul.f32 %v1892_v49, %v4178_v24  ;;  %v1846_v19 = vpack.c.bf16 %v1837_v25, %v1836_v27 }
 0xd01   :  { %v1930_v1 = vadd.f32 %v1926_v62, %v1922_v61  ;;  %3523 = vmatmul.msk.bf16.gmra.mxu1 %vm275_vm1, %v1846_v19 }
 0xd04   :  { %v3897_v42 = vpop.eup %3896 }
 0xd05   :  { %v1807_v26 = vpop.xlane.xlu1 %1806  ;;  %v1838_v35 = vmul.f32 %v3897_v42, %v3877_v8 }
 0xd06   :  { %3898 = vrcp.f32 %v1807_v26  ;;  %v1894_v0 = vpop.f32.mrf.mxu1 }
 0xd0c   :  { %v3899_v31 = vpop.eup %3898 }
 0xd0d   :  { %v1839_v22 = vmul.f32 %v3899_v31, %v3883_v6  ;;  %v1927_v6 = vmul.f32 %v1894_v0, %v4178_v24 }
 0xd0e   :  { %v1897_v15 = vpop.f32.mrf.mxu1 }
 0xd0f   :  { %v1928_v39 = vmul.f32 %v1897_v15, %v4178_v24  ;;  %v1847_v34 = vpack.c.bf16 %v1839_v22, %v1838_v35  ;;  %v1931_v58 = vadd.f32 %v1927_v6, %v1923_v51 }
 0xd11   :  { %v1932_v40 = vadd.f32 %v1928_v39, %v1924_v4  ;;  %3524 = vmatmul.msk.bf16.gmra.mxu1 %vm275_vm1, %v1847_v34 }
 0xd16   :  { %v1899_v14 = vpop.f32.mrf.mxu1 }
 0xd17   :  { %v1929_v20 = vmul.f32 %v1899_v14, %v4178_v24  ;;  %v3687_v14 = vld [vmem:[%s5464_s11 + $0x10] ss:$0 sm:$0xff] }
 0xd19   :  { %v1933_v37 = vadd.f32 %v1929_v20, %v1925_v2 }
 0xd5e   :  { %v1902_v12 = vpop.f32.mrf.mxu1 }
 0xd5f   :  { %v1934_v60 = vmul.f32 %v1902_v12, %v4183_v28 }
 0xd61   :  { %v1938_v56 = vadd.f32 %v1934_v60, %v1930_v1 }
 0xd66   :  { %v1904_v47 = vpop.f32.mrf.mxu1 }
 0xd67   :  { %v1935_v50 = vmul.f32 %v1904_v47, %v4183_v28  ;;  %v635_v47 = vadd.f32 %v3687_v14, %v4373_v43 }
 0xd69   :  { %v1939_v55 = vadd.f32 %v1935_v50, %v1931_v58  ;;  %v641_v51 = vadd.f32 %v635_v47, %v4302_v16  ;;  %v637_v50 = vadd.f32 %v3687_v14, %v4375_v45 }
 0xd6e   :  { %v1907_v41 = vpop.f32.mrf.mxu1 }
 0xd6f   :  { %v1936_v54 = vmul.f32 %v1907_v41, %v4183_v28 }
 0xd71   :  { %v1940_v11 = vadd.f32 %v1936_v54, %v1932_v40 }
 0xd76   :  { %v1909_v8 = vpop.f32.mrf.mxu1 }
 0xd77   :  { %v1937_v5 = vmul.f32 %v1909_v8, %v4183_v28 }
 0xd79   :  { %v1941_v44 = vadd.f32 %v1937_v5, %v1933_v37 }
 0xd7e   :  { %v1912_v30 = vpop.f32.mrf.mxu1 }
 0xd7f   :  { %v1942_v3 = vmul.f32 %v1912_v30, %v4188_v32 }
 0xd81   :  { %v1946_v7 = vadd.f32 %v1942_v3, %v1938_v56  ;;  %v643_v3 = vsel %vm142_vm0, %v641_v51, 0.0 }
 0xd86   :  { %v1914_v52 = vpop.f32.mrf.mxu1 }
 0xd87   :  { %v1943_v53 = vmul.f32 %v1914_v52, %v4188_v32 }
 0xd89   :  { %v1947_v57 = vadd.f32 %v1943_v53, %v1939_v55  ;;  %v642_v55 = vadd.f32 %v637_v50, %v4304_v18 }
 0xd8b   :  { %v1950_v63 = vpack.c.bf16 %v1947_v57, %v1946_v7  ;;  %v646_v45 = vsel %vm142_vm0, %v642_v55, 0.0 }
 0xd8d   :  { %3533 = vmatmul.msk.bf16.vlgmr.msrb.gmra.mxu3 %vm142_vm0, %v1950_v63 }
 0xd8e   :  { %v1917_v33 = vpop.f32.mrf.mxu1 }
 0xd8f   :  { %v1944_v10 = vmul.f32 %v1917_v33, %v4188_v32 }
 0xd91   :  { %v1948_v27 = vadd.f32 %v1944_v10, %v1940_v11 }
 0xd96   :  { %v1919_v48 = vpop.f32.mrf.mxu1 }
 0xd97   :  { %v1945_v29 = vmul.f32 %v1919_v48, %v4188_v32 }
 0xd99   :  { %v1949_v25 = vadd.f32 %v1945_v29, %v1941_v44 }
 0xd9b   :  { %v1951_v49 = vpack.c.bf16 %v1949_v25, %v1948_v27  ;;  %v3653_v25 = vld [vmem:[%s5461_s8 + $0x10] sm:$0xff] }
 0xd9d   :  { %3534 = vmatmul.msk.bf16.gmra.mxu3 %vm142_vm0, %v1951_v49 }
 0xe10   :  { %v1980_v24 = vpop.f32.mrf.mxu3 }
 0xe11   :  { %v1981_v13 = vadd.f32 %v3697_v17, %v1980_v24 }
 0xe13   :  { %v1992_v28 = vadd.f32 %v1981_v13, %v4710_v36 }
 0xe15   :  { %v1996_v61 = vsel %vm142_vm0, %v1992_v28, 0.0 }
 0xe16   :  { %1997 = vadd.xlane.f32.xlu2 %v1996_v61 }
 0xe18   :  { %v1982_v62 = vpop.f32.mrf.mxu3 }
 0xe19   :  { %v1983_v19 = vadd.f32 %v3697_v17, %v1982_v62 }
 0xe1b   :  { %v1993_v32 = vadd.f32 %v1983_v19, %v4712_v38  ;;  %v3654_v38 = vld [vmem:[%s5461_s8 + $0x18] sm:$0xff] }
 0xe1c   :  { %2199 = vmatpush.bf16.msra.mxu0 %v3654_v38 }
 0xe1d   :  { %v1999_v23 = vsel %vm142_vm0, %v1993_v32, 0.0 }
 0xe1e   :  { %2000 = vadd.xlane.f32.xlu0 %v1999_v23 }
 0xe20   :  { %v1985_v1 = vpop.f32.mrf.mxu3  ;;  %2200 = vmatpush.bf16.msra.mxu0 %v3653_v25 }
 0xe21   :  { %v1986_v26 = vadd.f32 %v3697_v17, %v1985_v1 }
 0xe23   :  { %v1994_v0 = vadd.f32 %v1986_v26, %v4719_v59 }
 0xe25   :  { %v2002_v42 = vsel %vm142_vm0, %v1994_v0, 0.0 }
 0xe26   :  { %2003 = vadd.xlane.f32.xlu1 %v2002_v42 }
 0xe28   :  { %v1987_v31 = vpop.f32.mrf.mxu3 }
 0xe29   :  { %v1988_v35 = vadd.f32 %v3697_v17, %v1987_v31 }
 0xe2b   :  { %v1995_v36 = vadd.f32 %v1988_v35, %v4721_v46 }
 0xe2d   :  { %v2005_v22 = vsel %vm142_vm0, %v1995_v36, 0.0 }
 0xe2e   :  { %2006 = vadd.xlane.f32.xlu2 %v2005_v22 }
 0xe89   :  { %v1998_v15 = vpop.xlane.xlu2 %1997 }
 0xe8a   :  { %v2008_v4 = vmul.f32 %v1998_v15, %v4274_v9 }
 0xe8c   :  { %v4999_v39 = vsub.f32 %v1992_v28, %v2008_v4 }
 0xe8e   :  { %v2016_v59 = vmul.f32 %v4999_v39, %v4999_v39 }
 0xe90   :  { %v2020_v34 = vsel %vm142_vm0, %v2016_v59, 0.0 }
 0xe91   :  { %v2001_v40 = vpop.xlane.xlu0 %2000  ;;  %2021 = vadd.xlane.f32.xlu0 %v2020_v34 }
 0xe92   :  { %v2009_v46 = vmul.f32 %v2001_v40, %v4274_v9 }
 0xe94   :  { %v5008_v12 = vsub.f32 %v1993_v32, %v2009_v46 }
 0xe96   :  { %v2017_v21 = vmul.f32 %v5008_v12, %v5008_v12 }
 0xe98   :  { %v2023_v41 = vsel %vm142_vm0, %v2017_v21, 0.0 }
 0xe99   :  { %2024 = vadd.xlane.f32.xlu1 %v2023_v41  ;;  %v2004_v8 = vpop.xlane.xlu1 %2003 }
 0xe9a   :  { %v2010_v30 = vmul.f32 %v2004_v8, %v4274_v9 }
 0xe9c   :  { %v5015_v6 = vsub.f32 %v1994_v0, %v2010_v30 }
 0xe9e   :  { %v2018_v60 = vmul.f32 %v5015_v6, %v5015_v6 }
 0xea0   :  { %v2026_v58 = vsel %vm142_vm0, %v2018_v60, 0.0 }
 0xea1   :  { %v2007_v43 = vpop.xlane.xlu2 %2006  ;;  %2027 = vadd.xlane.f32.xlu2 %v2026_v58  ;;  %644 = vadd.xlane.f32.xlu1 %v643_v3 }
 0xea2   :  { %v2011_v52 = vmul.f32 %v2007_v43, %v4274_v9 }
 0xea4   :  { %v5024_v56 = vsub.f32 %v1995_v36, %v2011_v52 }
 0xea6   :  { %v2019_v16 = vmul.f32 %v5024_v56, %v5024_v56 }
 0xea8   :  { %v2029_v53 = vsel %vm142_vm0, %v2019_v16, 0.0 }
 0xea9   :  { %2030 = vadd.xlane.f32.xlu0 %v2029_v53  ;;  %647 = vadd.xlane.f32.xlu2 %v646_v45 }
 0xf04   :  { %v2022_v7 = vpop.xlane.xlu0 %2021 }
 0xf05   :  { %v2032_v57 = vmul.f32 0.032258064, %v2022_v7 }
 0xf07   :  { %3900 = vrsqrt.f32 %v2032_v57  ;;  %vm2048_vm13 = vcmp.eq.f32.partialorder %v2032_v57, inf  ;;  %v2051_v13 = vand.u32 2147483648, %v2032_v57  ;;  %vm2050_vm14 = vcmp.eq.f32.partialorder %v2032_v57, 0.0 }
 0xf0c   :  { %v2025_v63 = vpop.xlane.xlu1 %2024 }
 0xf0d   :  { %v3901_v33 = vpop.eup %3900  ;;  %v2033_v20 = vmul.f32 0.032258064, %v2025_v63 }
 0xf0e   :  { %v2042_v2 = vmul.f32 %v3901_v33, %v2032_v57 }
 0xf0f   :  { %3902 = vrsqrt.f32 %v2033_v20  ;;  %vm2060_vm2 = vcmp.eq.f32.partialorder %v2033_v20, inf  ;;  %v2063_v59 = vand.u32 2147483648, %v2033_v20  ;;  %vm2062_vm3 = vcmp.eq.f32.partialorder %v2033_v20, 0.0 }
 0xf10   :  { %v2043_v54 = vmul.f32 %v3901_v33, %v2042_v2 }
 0xf12   :  { %v2044_v5 = vmul.f32 0.5, %v2043_v54 }
 0xf14   :  { %v2045_v18 = vsub.f32 1.5, %v2044_v5  ;;  %v2028_v37 = vpop.xlane.xlu2 %2027  ;;  %v645_v10 = vpop.xlane.xlu1 %644 }
 0xf15   :  { %v3903_v48 = vpop.eup %3902  ;;  %v2034_v11 = vmul.f32 0.032258064, %v2028_v37  ;;  %v649_v44 = vmul.f32 %v645_v10, %v4274_v9  ;;  %v3698_v37 = vld [vmem:[%s5464_s11 + $0x18] ss:$0 sm:$0xff] }
 0xf16   :  { %v2046_v29 = vmul.f32 %v3901_v33, %v2045_v18  ;;  %v2054_v27 = vmul.f32 %v3903_v48, %v2033_v20  ;;  %v3657_v18 = vld [vmem:[%s5460_s7 + $0xf0] sm:$0xff] }
 0xf17   :  { %3904 = vrsqrt.f32 %v2034_v11  ;;  %v5035_v24 = vsub.f32 %v641_v51, %v649_v44  ;;  %vm2072_vm4 = vcmp.eq.f32.partialorder %v2034_v11, inf  ;;  %v2075_v52 = vand.u32 2147483648, %v2034_v11 }
 0xf18   :  { %v2047_v49 = vmul.f32 %v2046_v29, %v2032_v57  ;;  %v2055_v17 = vmul.f32 %v3903_v48, %v2054_v27  ;;  %vm2074_vm5 = vcmp.eq.f32.partialorder %v2034_v11, 0.0 }
 0xf19   :  { %v653_v62 = vmul.f32 %v5035_v24, %v5035_v24 }
 0xf1a   :  { %v2049_v28 = vsel %vm2048_vm13, %v2032_v57, %v2047_v49  ;;  %v2056_v61 = vmul.f32 0.5, %v2055_v17 }
 0xf1b   :  { %v2052_v19 = vsel %vm2050_vm14, %v2051_v13, %v2049_v28  ;;  %v655_v0 = vsel %vm142_vm0, %v653_v62, 0.0  ;;  %v2037_v28 = vmul.f32 %v3698_v37, %v4999_v39 }
 0xf1c   :  { %v5039_v32 = vadd.f32 1e-06, %v2052_v19  ;;  %v2057_v23 = vsub.f32 1.5, %v2056_v61  ;;  %v2031_v1 = vpop.xlane.xlu0 %2030  ;;  %v648_v26 = vpop.xlane.xlu2 %647  ;;  %656 = vadd.xlane.f32.xlu0 %v655_v0 }
 0xf1d   :  { %v3905_v42 = vpop.eup %3904  ;;  %v5042_v31 = vmul.f32 0.032258064, %v2031_v1  ;;  %v650_v35 = vmul.f32 %v648_v26, %v4274_v9 }
 0xf1e   :  { %3906 = vrcp.f32 %v5039_v32  ;;  %v2058_v36 = vmul.f32 %v3903_v48, %v2057_v23  ;;  %v2066_v22 = vmul.f32 %v3905_v42, %v2034_v11  ;;  %vm2098_vm7 = vweird.f32 %v5039_v32 }
 0xf1f   :  { %3908 = vrsqrt.f32 %v5042_v31  ;;  %v5047_v4 = vsub.f32 %v642_v55, %v650_v35  ;;  %v2102_v2 = vand.u32 2147483647, %v5039_v32  ;;  %vm2084_vm9 = vcmp.eq.f32.partialorder %v5042_v31, inf }
 0xf20   :  { %v2059_v15 = vmul.f32 %v2058_v36, %v2033_v20  ;;  %v2067_v38 = vmul.f32 %v3905_v42, %v2066_v22  ;;  %v2087_v44 = vand.u32 2147483648, %v5042_v31  ;;  %vm2086_vm12 = vcmp.eq.f32.partialorder %v5042_v31, 0.0 }
 0xf21   :  { %v654_v46 = vmul.f32 %v5047_v4, %v5047_v4  ;;  %vm2103_vm10 = vcmp.eq.f32.partialorder %v2102_v2, 8.507059e+37 }
 0xf22   :  { %v2061_v34 = vsel %vm2060_vm2, %v2033_v20, %v2059_v15  ;;  %v2068_v40 = vmul.f32 0.5, %v2067_v38  ;;  %v2104_v20 = vand.u32 2147483648, %v5039_v32 }
 0xf23   :  { %v2064_v14 = vsel %vm2062_vm3, %v2063_v59, %v2061_v34  ;;  %v658_v8 = vsel %vm142_vm0, %v654_v46, 0.0 }
 0xf24   :  { %v3907_v21 = vpop.eup %3906  ;;  %v2090_v47 = vadd.f32 1e-06, %v2064_v14  ;;  %v2069_v41 = vsub.f32 1.5, %v2068_v40  ;;  %659 = vadd.xlane.f32.xlu1 %v658_v8  ;;  %v2105_v29 = vor.u32 1.1754944e-38, %v2104_v20 }
 0xf25   :  { %v3909_v30 = vpop.eup %3908  ;;  %v2094_v51 = vmul.f32 %v3907_v21, %v5039_v32  ;;  %vm2099_vm6 = vweird.f32 %v3907_v21  ;;  %v2038_v32 = vmul.f32 %v3698_v37, %v5008_v12 }
 0xf26   :  { %3910 = vrcp.f32 %v2090_v47  ;;  %v2070_v60 = vmul.f32 %v3905_v42, %v2069_v41  ;;  %v2078_v50 = vmul.f32 %v3909_v30, %v5042_v31  ;;  %vm5057_vm8 = vmor %vm2098_vm7, %vm2099_vm6  ;;  %v2119_v27 = vand.u32 2147483648, %v2090_v47  ;;  %v3700_v42 = vld [vmem:[%s5464_s11 + $0x19] ss:$0 sm:$0xff] }
 0xf27   :  { %v2095_v58 = vsub.f32 1.0, %v2094_v51  ;;  %v2117_v49 = vand.u32 2147483647, %v2090_v47  ;;  %vm2113_vm13 = vweird.f32 %v2090_v47 }
 0xf28   :  { %v2071_v3 = vmul.f32 %v2070_v60, %v2034_v11  ;;  %v2079_v43 = vmul.f32 %v3909_v30, %v2078_v50  ;;  %v2120_v1 = vor.u32 1.1754944e-38, %v2119_v27  ;;  %v2039_v50 = vmul.f32 %v3698_v37, %v5015_v6 }
 0xf29   :  { %v2096_v55 = vmul.f32 %v3907_v21, %v2095_v58  ;;  %vm2118_vm2 = vcmp.eq.f32.partialorder %v2117_v49, 8.507059e+37  ;;  %v3660_v49 = vld [vmem:[%s5461_s8 + $0x28] sm:$0xff] }
 0xf2a   :  { %v2073_v16 = vsel %vm2072_vm4, %v2034_v11, %v2071_v3  ;;  %v2080_v53 = vmul.f32 0.5, %v2079_v43  ;;  %v2040_v43 = vmul.f32 %v3698_v37, %v5024_v56  ;;  %2470 = vmatpush.bf16.msrb.mxu0 %v3660_v49 }
 0xf2b   :  { %v2076_v45 = vsel %vm2074_vm5, %v2075_v52, %v2073_v16  ;;  %v2097_v7 = vadd.f32 %v3907_v21, %v2096_v55 }
 0xf2c   :  { %v3911_v57 = vpop.eup %3910  ;;  %v2091_v63 = vadd.f32 1e-06, %v2076_v45  ;;  %v2081_v33 = vsub.f32 1.5, %v2080_v53 }
 0xf2d   :  { %v2109_v54 = vmul.f32 %v3911_v57, %v2090_v47  ;;  %v2101_v10 = vsel %vm5057_vm8, %v3907_v21, %v2097_v7  ;;  %vm2114_vm11 = vweird.f32 %v3911_v57 }
 0xf2e   :  { %3912 = vrcp.f32 %v2091_v63  ;;  %v2082_v5 = vmul.f32 %v3909_v30, %v2081_v33  ;;  %v2106_v13 = vsel %vm2103_vm10, %v2105_v29, %v2101_v10  ;;  %vm2115_vm14 = vmor %vm2113_vm13, %vm2114_vm11  ;;  %v2134_v40 = vand.u32 2147483648, %v2091_v63  ;;  %v3656_v29 = vld [vmem:[%s5460_s7 + $0xe8] sm:$0xff] }
 0xf2f   :  { %v2110_v48 = vsub.f32 1.0, %v2109_v54  ;;  %v2107_v26 = vmul.f32 %v2106_v13, %v2037_v28  ;;  %vm2128_vm4 = vweird.f32 %v2091_v63  ;;  %v2132_v46 = vand.u32 2147483647, %v2091_v63  ;;  %v3658_v54 = vld [vmem:[%s5460_s7 + $0xf8] sm:$0xff] }
 0xf30   :  { %v2083_v11 = vmul.f32 %v2082_v5, %v5042_v31  ;;  %v2135_v41 = vor.u32 1.1754944e-38, %v2134_v40  ;;  %2253 = vmatpush.bf16.msra.mxu3 %v3658_v54 }
 0xf31   :  { %v2111_v25 = vmul.f32 %v3911_v57, %v2110_v48  ;;  %v5076_v22 = vadd.f32 %v3700_v42, %v2107_v26  ;;  %vm2133_vm6 = vcmp.eq.f32.partialorder %v2132_v46, 8.507059e+37 }
 0xf32   :  { %v2085_v17 = vsel %vm2084_vm9, %v5042_v31, %v2083_v11 }
 0xf33   :  { %v2088_v61 = vsel %vm2086_vm12, %v2087_v44, %v2085_v17  ;;  %v2112_v62 = vadd.f32 %v3911_v57, %v2111_v25 }
 0xf34   :  { %v3913_v19 = vpop.eup %3912  ;;  %v2092_v23 = vadd.f32 1e-06, %v2088_v61  ;;  %2254 = vmatpush.bf16.msra.mxu3 %v3657_v18 }
 0xf35   :  { %v2116_v0 = vsel %vm2115_vm14, %v3911_v57, %v2112_v62  ;;  %v2124_v31 = vmul.f32 %v3913_v19, %v2091_v63  ;;  %vm2129_vm3 = vweird.f32 %v3913_v19  ;;  %v3655_v62 = vld [vmem:[%s5460_s7 + $0xe0] sm:$0xff]  ;;  %s3323_s7 = sshll.u32 %s4044_s29, 4  ;;  %s3324_s7 = int_to_ptr.vmem [resolvable:$true] %s3323_s7 }
 0xf36   :  { %3914 = vrcp.f32 %v2092_v23  ;;  %v2121_v35 = vsel %vm2118_vm2, %v2120_v1, %v2116_v0  ;;  %vm2130_vm5 = vmor %vm2128_vm4, %vm2129_vm3  ;;  %v2149_v8 = vand.u32 2147483648, %v2092_v23  ;;  %v2147_v51 = vand.u32 2147483647, %v2092_v23 }
 0xf37   :  { %v2122_v39 = vmul.f32 %v2121_v35, %v2038_v32  ;;  %v2125_v36 = vsub.f32 1.0, %v2124_v31  ;;  %vm2143_vm8 = vweird.f32 %v2092_v23 }
 0xf38   :  { %v2150_v3 = vor.u32 1.1754944e-38, %v2149_v8  ;;  %vm2148_vm10 = vcmp.eq.f32.partialorder %v2147_v51, 8.507059e+37  ;;  %2255 = vmatpush.bf16.msra.mxu3 %v3656_v29  ;;  %v3702_v8 = vld [vmem:[%s5464_s11 + $0x15] ss:$0 sm:$0xff] }
 0xf39   :  { %v5078_v15 = vadd.f32 %v3700_v42, %v2122_v39  ;;  %v2126_v12 = vmul.f32 %v3913_v19, %v2125_v36 }
 0xf3b   :  { %v2172_v38 = vpack.c.bf16 %v5078_v15, %v5076_v22  ;;  %v2127_v59 = vadd.f32 %v3913_v19, %v2126_v12 }
 0xf3c   :  { %v3915_v34 = vpop.eup %3914  ;;  %2256 = vmatpush.bf16.msra.mxu3 %v3655_v62  ;;  %v3663_v62 = vld [vmem:[%s5462_s9 + $0x10] sm:$0xff] }
 0xf3d   :  { %3543 = vmatmul.msk.bf16.vlgmr.msra.gmra.mxu0 %vm142_vm0, %v2172_v38  ;;  %v2139_v14 = vmul.f32 %v3915_v34, %v2092_v23  ;;  %v2131_v21 = vsel %vm2130_vm5, %v3913_v19, %v2127_v59  ;;  %vm2144_vm7 = vweird.f32 %v3915_v34  ;;  %v3659_v19 = vld [vmem:[%s5461_s8 + $0x20] sm:$0xff]  ;;  %v3699_v59 = vld [vmem:[%s5464_s11 + $0x14] ss:$0 sm:$0xff] }
 0xf3e   :  { %v2136_v60 = vsel %vm2133_vm6, %v2135_v41, %v2131_v21  ;;  %vm2145_vm9 = vmor %vm2143_vm8, %vm2144_vm7  ;;  %2471 = vmatpush.bf16.msrb.mxu0 %v3659_v19  ;;  %v3662_v19 = vld [vmem:[%s5462_s9 + $0x8] sm:$0xff] }
 0xf3f   :  { %v2140_v47 = vsub.f32 1.0, %v2139_v14  ;;  %v2137_v52 = vmul.f32 %v2136_v60, %v2039_v50 }
 0xf41   :  { %v2141_v30 = vmul.f32 %v3915_v34, %v2140_v47  ;;  %v5085_v45 = vadd.f32 %v3700_v42, %v2137_v52  ;;  %v664_v47 = vmul.f32 %v3699_v59, %v5035_v24 }
 0xf43   :  { %v2142_v58 = vadd.f32 %v3915_v34, %v2141_v30 }
 0xf45   :  { %v2146_v55 = vsel %vm2145_vm9, %v3915_v34, %v2142_v58 }
 0xf46   :  { %v2151_v16 = vsel %vm2148_vm10, %v2150_v3, %v2146_v55  ;;  %vm2546_vm10 = vcmask 64512  }
 0xf47   :  { %v2152_v53 = vmul.f32 %v2151_v16, %v2040_v43  ;;  %v3701_v43 = vld [vmem:[%s5465_s12 + $0x1] ss:$0 sm:$0xff] }
 0xf48   :  { %v3984_v16 = vld [vmem:[%s5472_s0] sm:$0xff] }
 0xf49   :  { %v5087_v7 = vadd.f32 %v3700_v42, %v2152_v53 }
 0xf4b   :  { %v2173_v57 = vpack.c.bf16 %v5087_v7, %v5085_v45 }
 0xf4d   :  { %3544 = vmatmul.msk.bf16.gmra.mxu0 %vm142_vm0, %v2173_v57 }
 0xf8f   :  { %v657_v6 = vpop.xlane.xlu0 %656 }
 0xf90   :  { %v661_v63 = vmul.f32 0.032258064, %v657_v6 }
 0xf92   :  { %3916 = vrsqrt.f32 %v661_v63  ;;  %vm673_vm11 = vcmp.eq.f32.partialorder %v661_v63, inf  ;;  %v676_v17 = vand.u32 2147483648, %v661_v63  ;;  %vm675_vm12 = vcmp.eq.f32.partialorder %v661_v63, 0.0 }
 0xf97   :  { %v660_v33 = vpop.xlane.xlu1 %659 }
 0xf98   :  { %v3917_v20 = vpop.eup %3916  ;;  %v662_v56 = vmul.f32 0.032258064, %v660_v33 }
 0xf99   :  { %v667_v2 = vmul.f32 %v3917_v20, %v661_v63 }
 0xf9a   :  { %3918 = vrsqrt.f32 %v662_v56  ;;  %vm685_vm13 = vcmp.eq.f32.partialorder %v662_v56, inf  ;;  %v688_v0 = vand.u32 2147483648, %v662_v56  ;;  %vm687_vm14 = vcmp.eq.f32.partialorder %v662_v56, 0.0 }
 0xf9b   :  { %v668_v5 = vmul.f32 %v3917_v20, %v667_v2 }
 0xf9d   :  { %v669_v37 = vmul.f32 0.5, %v668_v5 }
 0xf9f   :  { %v670_v10 = vsub.f32 1.5, %v669_v37 }
 0xfa0   :  { %v3919_v48 = vpop.eup %3918 }
 0xfa1   :  { %v671_v11 = vmul.f32 %v3917_v20, %v670_v10  ;;  %v679_v44 = vmul.f32 %v3919_v48, %v662_v56 }
 0xfa3   :  { %v672_v27 = vmul.f32 %v671_v11, %v661_v63  ;;  %v680_v25 = vmul.f32 %v3919_v48, %v679_v44  ;;  %v3985_v11 = vld [vmem:[%s5472_s0 + $0x8] sm:$0xff] }
 0xfa5   :  { %v674_v13 = vsel %vm673_vm11, %v661_v63, %v672_v27  ;;  %v681_v28 = vmul.f32 0.5, %v680_v25  ;;  %v665_v63 = vmul.f32 %v3699_v59, %v5047_v4 }
 0xfa6   :  { %v677_v61 = vsel %vm675_vm12, %v676_v17, %v674_v13 }
 0xfa7   :  { %v690_v32 = vadd.f32 1e-06, %v677_v61  ;;  %v682_v23 = vsub.f32 1.5, %v681_v28  ;;  %v3664_v61 = vld [vmem:[%s5462_s9 + $0x18] sm:$0xff] }
 0xfa8   :  { %2524 = vmatpush.bf16.msra.mxu0 %v3664_v61 }
 0xfa9   :  { %3920 = vrcp.f32 %v690_v32  ;;  %v683_v1 = vmul.f32 %v3919_v48, %v682_v23  ;;  %v703_v38 = vand.u32 2147483648, %v690_v32  ;;  %v701_v40 = vand.u32 2147483647, %v690_v32 }
 0xfaa   :  { %vm697_vm3 = vweird.f32 %v690_v32 }
 0xfab   :  { %v684_v26 = vmul.f32 %v683_v1, %v662_v56  ;;  %v704_v21 = vor.u32 1.1754944e-38, %v703_v38  ;;  %vm702_vm5 = vcmp.eq.f32.partialorder %v701_v40, 8.507059e+37  ;;  %v3704_v1 = vld [vmem:[%s5464_s11 + $0x11] ss:$0 sm:$0xff] }
 0xfac   :  { %2525 = vmatpush.bf16.msra.mxu0 %v3663_v62 }
 0xfad   :  { %v686_v42 = vsel %vm685_vm13, %v662_v56, %v684_v26  ;;  %v3703_v26 = vld [vmem:[%s5465_s12 + $0x2] ss:$0 sm:$0xff] }
 0xfae   :  { %v689_v31 = vsel %vm687_vm14, %v688_v0, %v686_v42  ;;  %v4043_v0 = vmov 0  }
 0xfaf   :  { %v3921_v35 = vpop.eup %3920  ;;  %v691_v39 = vadd.f32 1e-06, %v689_v31  ;;  %3678 = vset.pattern.permute.xlu0 %v4043_v0  ;;  %3679 = vset.pattern.permute.xlu2 %v4043_v0  ;;  %v102_v0 = vld [vmem:[%s5458_s5 + $0x8] sm:$0xff] }
 0xfb0   :  { %v693_v36 = vmul.f32 %v3921_v35, %v690_v32  ;;  %vm698_vm2 = vweird.f32 %v3921_v35  ;;  %2526 = vmatpush.bf16.msra.mxu0 %v3662_v19  ;;  %v3661_v32 = vld [vmem:[%s5462_s9] sm:$0xff]  ;;  %s4045_s9 = smov 128  }
 0xfb1   :  { %3922 = vrcp.f32 %v691_v39  ;;  %vm699_vm4 = vmor %vm697_vm3, %vm698_vm2  ;;  %v718_v3 = vand.u32 2147483648, %v691_v39  ;;  %v716_v24 = vand.u32 2147483647, %v691_v39  ;;  %vm712_vm7 = vweird.f32 %v691_v39 }
 0xfb2   :  { %v694_v12 = vsub.f32 1.0, %v693_v36 }
 0xfb3   :  { %v719_v6 = vor.u32 1.1754944e-38, %v718_v3  ;;  %vm717_vm9 = vcmp.eq.f32.partialorder %v716_v24, 8.507059e+37  ;;  %v103_v3 = vld [vmem:[%s5459_s6] sm:$0xff] }
 0xfb4   :  { %v695_v34 = vmul.f32 %v3921_v35, %v694_v12  ;;  %2527 = vmatpush.bf16.msra.mxu0 %v3661_v32 }
 0xfb6   :  { %v696_v46 = vadd.f32 %v3921_v35, %v695_v34 }
 0xfb7   :  { %v3923_v14 = vpop.eup %3922 }
 0xfb8   :  { %v700_v41 = vsel %vm699_vm4, %v3921_v35, %v696_v46  ;;  %v708_v30 = vmul.f32 %v3923_v14, %v691_v39  ;;  %vm713_vm6 = vweird.f32 %v3923_v14 }
 0xfb9   :  { %v705_v60 = vsel %vm702_vm5, %v704_v21, %v700_v41  ;;  %vm714_vm8 = vmor %vm712_vm7, %vm713_vm6 }
 0xfba   :  { %v2202_v51 = vpop.f32.mrf.mxu0  ;;  %v706_v50 = vmul.f32 %v705_v60, %v664_v47  ;;  %v709_v58 = vsub.f32 1.0, %v708_v30 }
 0xfbb   :  { %v2203_v33 = vadd.f32 %v3701_v43, %v2202_v51 }
 0xfbc   :  { %v723_v52 = vadd.f32 %v3702_v8, %v706_v50  ;;  %v710_v55 = vmul.f32 %v3923_v14, %v709_v58 }
 0xfbd   :  { %v2212_v18 = vmax.f32 %v2203_v33, 0.0 }
 0xfbe   :  { %v5123_v53 = vadd.f32 %v3984_v16, %v723_v52  ;;  %v711_v57 = vadd.f32 %v3923_v14, %v710_v55 }
 0xfc0   :  { %2629 = vmatpush.msra.mxu2 %v5123_v53  ;;  %v715_v20 = vsel %vm714_vm8, %v3923_v14, %v711_v57 }
 0xfc1   :  { %v720_v2 = vsel %vm717_vm9, %v719_v6, %v715_v20 }
 0xfc2   :  { %v2204_v56 = vpop.f32.mrf.mxu0  ;;  %v721_v5 = vmul.f32 %v720_v2, %v665_v63 }
 0xfc3   :  { %v2205_v54 = vadd.f32 %v3701_v43, %v2204_v56 }
 0xfc4   :  { %v724_v10 = vadd.f32 %v3702_v8, %v721_v5  ;;  %v5194_v5 = vld [vmem:[%s5466_s13] ss:$0 sm:$0xff] }
 0xfc5   :  { %v2213_v37 = vmax.f32 %v2205_v54, 0.0 }
 0xfc6   :  { %v5130_v44 = vadd.f32 %v3985_v11, %v724_v10 }
 0xfc7   :  { %v2216_v48 = vpack.c.bf16 %v2213_v37, %v2212_v18 }
 0xfc8   :  { %v2447_v4 = vpack.c.bf16 %v5130_v44, %v5123_v53  ;;  %2716 = vmatpush.msrb.mxu3 %v5130_v44 }
 0xfc9   :  { %3561 = vmatmul.msk.bf16.vlgmr.msra.gmra.mxu3 %vm621_vm15, %v2216_v48 }
 0xfca   :  { %v2207_v29 = vpop.f32.mrf.mxu0  ;;  %3571 = vmatmul.msk.bf16.vlgmr.msrb.gmra.mxu0 %vm142_vm0, %v2447_v4 }
 0xfcb   :  { %v2208_v27 = vadd.f32 %v3701_v43, %v2207_v29 }
 0xfcd   :  { %v2214_v17 = vmax.f32 %v2208_v27, 0.0 }
 0xfd2   :  { %v2209_v25 = vpop.f32.mrf.mxu0 }
 0xfd3   :  { %v2210_v49 = vadd.f32 %v3701_v43, %v2209_v25 }
 0xfd5   :  { %v2215_v13 = vmax.f32 %v2210_v49, 0.0 }
 0xfd7   :  { %v2217_v28 = vpack.c.bf16 %v2215_v13, %v2214_v17 }
 0xfd9   :  { %3562 = vmatmul.msk.bf16.gmra.mxu3 %vm621_vm15, %v2217_v28 }
0x1047   :  { %v2473_v23 = vpop.f32.mrf.mxu0 }
0x1048   :  { %v2474_v35 = vadd.f32 %v3703_v26, %v2473_v23 }
0x104a   :  { %v2478_v59 = vmax.f32 %v2474_v35, 0.0 }
0x104c   :  { %v2258_v42 = vpop.f32.mrf.mxu3 }
0x104d   :  { %v2259_v31 = vadd.f32 %v3704_v1, %v2258_v42 }
0x104f   :  { %v2475_v39 = vpop.f32.mrf.mxu0  ;;  %v2270_v36 = vadd.f32 %v2259_v31, %v5076_v22 }
0x1050   :  { %v2476_v12 = vadd.f32 %v3703_v26, %v2475_v39 }
0x1051   :  { %v2274_v38 = vsel %vm142_vm0, %v2270_v36, 0.0 }
0x1052   :  { %v2479_v34 = vmax.f32 %v2476_v12, 0.0  ;;  %2275 = vadd.xlane.f32.xlu2 %v2274_v38 }
0x1054   :  { %v2488_v40 = vpack.c.bf16 %v2479_v34, %v2478_v59  ;;  %v2260_v46 = vpop.f32.mrf.mxu3 }
0x1055   :  { %v2261_v14 = vadd.f32 %v3704_v1, %v2260_v46 }
0x1056   :  { %3588 = vmatmul.msk.bf16.vlgmr.msra.gmra.mxu0 %vm621_vm15, %v2488_v40 }
0x1057   :  { %v2271_v21 = vadd.f32 %v2261_v14, %v5078_v15  ;;  %v101_v15 = vld [vmem:[%s5458_s5] sm:$0xff] }
0x1059   :  { %v2277_v47 = vsel %vm142_vm0, %v2271_v21, 0.0 }
0x105a   :  { %2278 = vadd.xlane.f32.xlu0 %v2277_v47 }
0x105c   :  { %v2263_v41 = vpop.f32.mrf.mxu3 }
0x105d   :  { %v2264_v8 = vadd.f32 %v3704_v1, %v2263_v41 }
0x105f   :  { %v2272_v22 = vadd.f32 %v2264_v8, %v5085_v45  ;;  %v105_v45 = vld [vmem:[%s5459_s6 + $0x10] sm:$0xff] }
0x1061   :  { %v2280_v30 = vsel %vm142_vm0, %v2272_v22, 0.0 }
0x1062   :  { %2281 = vadd.xlane.f32.xlu1 %v2280_v30 }
0x1064   :  { %v2265_v51 = vpop.f32.mrf.mxu3 }
0x1065   :  { %v2266_v60 = vadd.f32 %v3704_v1, %v2265_v51 }
0x1067   :  { %v2273_v50 = vadd.f32 %v2266_v60, %v5087_v7 }
0x1069   :  { %v2283_v58 = vsel %vm142_vm0, %v2273_v50, 0.0 }
0x106a   :  { %2284 = vadd.xlane.f32.xlu2 %v2283_v58 }
0x106e   :  { %2536 = vperm.xlu0 %3678, %v101_v15  }
0x1076   :  { %2835 = vperm.xlu0 %3678, %v103_v3  }
0x107e   :  { %2845 = vperm.xlu0 %3678, %v105_v45  }
0x10c5   :  { %v2276_v43 = vpop.xlane.xlu2 %2275 }
0x10c6   :  { %v2286_v7 = vmul.f32 %v2276_v43, %v4274_v9 }
0x10c8   :  { %v5175_v52 = vsub.f32 %v2270_v36, %v2286_v7 }
0x10ca   :  { %v2294_v55 = vmul.f32 %v5175_v52, %v5175_v52 }
0x10cc   :  { %v2298_v24 = vsel %vm142_vm0, %v2294_v55, 0.0 }
0x10cd   :  { %2299 = vadd.xlane.f32.xlu1 %v2298_v24  ;;  %v2279_v16 = vpop.xlane.xlu0 %2278 }
0x10ce   :  { %v2287_v57 = vmul.f32 %v2279_v16, %v4274_v9 }
0x10d0   :  { %v5181_v6 = vsub.f32 %v2271_v21, %v2287_v57 }
0x10d2   :  { %v2295_v63 = vmul.f32 %v5181_v6, %v5181_v6 }
0x10d3   :  { %v2529_v18 = vpop.f32.mrf.mxu0 }
0x10d4   :  { %v2301_v33 = vsel %vm142_vm0, %v2295_v63, 0.0  ;;  %v2530_v11 = vadd.f32 %v5194_v5, %v2529_v18 }
0x10d5   :  { %2302 = vadd.xlane.f32.xlu2 %v2301_v33  ;;  %v2282_v20 = vpop.xlane.xlu1 %2281 }
0x10d6   :  { %v2288_v56 = vmul.f32 %v2282_v20, %v4274_v9 }
0x10d8   :  { %v5187_v2 = vsub.f32 %v2272_v22, %v2288_v56 }
0x10da   :  { %v2296_v54 = vmul.f32 %v5187_v2, %v5187_v2 }
0x10dc   :  { %v2304_v37 = vsel %vm142_vm0, %v2296_v54, 0.0 }
0x10dd   :  { %v2285_v10 = vpop.xlane.xlu2 %2284  ;;  %2305 = vadd.xlane.f32.xlu1 %v2304_v37 }
0x10de   :  { %v2289_v48 = vmul.f32 %v2285_v10, %v4274_v9 }
0x10e0   :  { %v5199_v4 = vsub.f32 %v2273_v50, %v2289_v48  ;;  %v2537_v29 = vpop.permute.xlu0 %2536 }
0x10e1   :  { %v2544_v27 = vadd.f32 %v2537_v29, %v2530_v11 }
0x10e2   :  { %v2297_v25 = vmul.f32 %v5199_v4, %v5199_v4 }
0x10e3   :  { %v2547_v49 = vsel %vm2546_vm10, %v2544_v27, -inf }
0x10e4   :  { %v2548_v17 = vrot.slane %v2547_v49, 4  ;;  %v2307_v13 = vsel %vm142_vm0, %v2297_v25, 0.0 }
0x10e5   :  { %2308 = vadd.xlane.f32.xlu2 %v2307_v13 }
0x10e6   :  { %v2549_v28 = vmax.f32 %v2547_v49, %v2548_v17  ;;  %v2531_v17 = vpop.f32.mrf.mxu0 }
0x10e8   :  { %v2550_v61 = vrot.slane %v2549_v28, 2 }
0x10ea   :  { %v2551_v62 = vmax.f32 %v2549_v28, %v2550_v61 }
0x10ec   :  { %v2552_v19 = vrot.slane %v2551_v62, 1 }
0x10ee   :  { %v2553_v32 = vmax.f32 %v2551_v62, %v2552_v19 }
0x10f0   :  { %v2554_v23 = vsub.f32 %v2544_v27, %v2553_v32  ;;  %v2532_v32 = vadd.f32 %v5194_v5, %v2531_v17 }
0x10f2   :  { %v2555_v1 = vmul.f32 1.442695, %v2554_v23 }
0x10f4   :  { %3924 = vpow2.f32 %v2555_v1 }
0x10fa   :  { %v3925_v26 = vpop.eup %3924 }
0x10fb   :  { %v2557_v42 = vsel %vm2546_vm10, %v3925_v26, 0.0 }
0x10fc   :  { %v2558_v31 = vrot.slane %v2557_v42, 4 }
0x10fd   :  { %2541 = vperm.xlu2 %3679, %v102_v0  }
0x10fe   :  { %v2559_v35 = vadd.f32 %v2558_v31, %v2557_v42 }
0x1100   :  { %v2560_v39 = vrot.slane %v2559_v35, 2 }
0x1102   :  { %v2561_v36 = vadd.f32 %v2560_v39, %v2559_v35 }
0x1104   :  { %v2562_v12 = vrot.slane %v2561_v36, 1 }
0x1106   :  { %v2563_v38 = vadd.f32 %v2562_v12, %v2561_v36 }
0x1108   :  { %3926 = vrcp.f32 %v2563_v38  ;;  %v2575_v46 = vand.u32 2147483648, %v2563_v38  ;;  %v2573_v21 = vand.u32 2147483647, %v2563_v38  ;;  %vm2569_vm12 = vweird.f32 %v2563_v38 }
0x110a   :  { %v2576_v41 = vor.u32 1.1754944e-38, %v2575_v46  ;;  %vm2574_vm14 = vcmp.eq.f32.partialorder %v2573_v21, 8.507059e+37 }
0x110e   :  { %v3927_v59 = vpop.eup %3926 }
0x110f   :  { %v2565_v34 = vmul.f32 %v3927_v59, %v2563_v38  ;;  %vm2570_vm11 = vweird.f32 %v3927_v59 }
0x1110   :  { %vm2571_vm13 = vmor %vm2569_vm12, %vm2570_vm11 }
0x1111   :  { %v2566_v40 = vsub.f32 1.0, %v2565_v34 }
0x1113   :  { %v2567_v14 = vmul.f32 %v3927_v59, %v2566_v40 }
0x1115   :  { %v2568_v47 = vadd.f32 %v3927_v59, %v2567_v14 }
0x1117   :  { %v2572_v8 = vsel %vm2571_vm13, %v3927_v59, %v2568_v47 }
0x1118   :  { %v2577_v22 = vsel %vm2574_vm14, %v2576_v41, %v2572_v8 }
0x1119   :  { %v2578_v30 = vmul.f32 %v3925_v26, %v2577_v22 }
0x111b   :  { %2579 = vxpose.xlu1.b32.start.end [1/1] (short) (narrow) %v2578_v30, 8 }
0x1140   :  { %v2300_v51 = vpop.xlane.xlu1 %2299 }
0x1141   :  { %v2310_v60 = vmul.f32 0.032258064, %v2300_v51 }
0x1143   :  { %3928 = vrsqrt.f32 %v2310_v60  ;;  %vm2326_vm2 = vcmp.eq.f32.partialorder %v2310_v60, inf  ;;  %v2329_v56 = vand.u32 2147483648, %v2310_v60  ;;  %vm2328_vm3 = vcmp.eq.f32.partialorder %v2310_v60, 0.0 }
0x1148   :  { %v2303_v50 = vpop.xlane.xlu2 %2302 }
0x1149   :  { %v3929_v58 = vpop.eup %3928  ;;  %v2311_v15 = vmul.f32 0.032258064, %v2303_v50 }
0x114a   :  { %v2320_v3 = vmul.f32 %v3929_v58, %v2310_v60 }
0x114b   :  { %3930 = vrsqrt.f32 %v2311_v15  ;;  %vm2338_vm4 = vcmp.eq.f32.partialorder %v2311_v15, inf  ;;  %v2341_v61 = vand.u32 2147483648, %v2311_v15  ;;  %vm2340_vm5 = vcmp.eq.f32.partialorder %v2311_v15, 0.0 }
0x114c   :  { %v2321_v45 = vmul.f32 %v3929_v58, %v2320_v3 }
0x114e   :  { %v2322_v43 = vmul.f32 0.5, %v2321_v45 }
0x1150   :  { %v2323_v7 = vsub.f32 1.5, %v2322_v43  ;;  %v2306_v55 = vpop.xlane.xlu1 %2305 }
0x1151   :  { %v3931_v24 = vpop.eup %3930  ;;  %v2312_v16 = vmul.f32 0.032258064, %v2306_v55  ;;  %v5239_v55 = vld [vmem:[%s5464_s11 + $0x1a] ss:$0 sm:$0xff] }
0x1152   :  { %v2324_v57 = vmul.f32 %v3929_v58, %v2323_v7  ;;  %v2332_v63 = vmul.f32 %v3931_v24, %v2311_v15  ;;  %v2316_v17 = vmul.f32 %v5239_v55, %v5181_v6 }
0x1153   :  { %3932 = vrsqrt.f32 %v2312_v16  ;;  %vm2350_vm6 = vcmp.eq.f32.partialorder %v2312_v16, inf  ;;  %v2353_v46 = vand.u32 2147483648, %v2312_v16  ;;  %vm2352_vm7 = vcmp.eq.f32.partialorder %v2312_v16, 0.0 }
0x1154   :  { %v2325_v33 = vmul.f32 %v2324_v57, %v2310_v60  ;;  %v2333_v20 = vmul.f32 %v3931_v24, %v2332_v63 }
0x1156   :  { %v2327_v54 = vsel %vm2326_vm2, %v2310_v60, %v2325_v33  ;;  %v2334_v18 = vmul.f32 0.5, %v2333_v20 }
0x1157   :  { %v2330_v37 = vsel %vm2328_vm3, %v2329_v56, %v2327_v54 }
0x1158   :  { %v2335_v10 = vsub.f32 1.5, %v2334_v18  ;;  %v2309_v48 = vpop.xlane.xlu2 %2308  ;;  %v5209_v11 = vadd.f32 1e-06, %v2330_v37 }
0x1159   :  { %v3933_v29 = vpop.eup %3932  ;;  %v5211_v27 = vmul.f32 0.032258064, %v2309_v48 }
0x115a   :  { %v2336_v25 = vmul.f32 %v3931_v24, %v2335_v10  ;;  %v2344_v49 = vmul.f32 %v3933_v29, %v2312_v16  ;;  %3934 = vrcp.f32 %v5209_v11  ;;  %v2382_v50 = vand.u32 2147483648, %v5209_v11 }
0x115b   :  { %3936 = vrsqrt.f32 %v5211_v27  ;;  %vm2376_vm9 = vweird.f32 %v5209_v11  ;;  %v2380_v3 = vand.u32 2147483647, %v5209_v11  ;;  %vm2362_vm12 = vcmp.eq.f32.partialorder %v5211_v27, inf }
0x115c   :  { %v2337_v13 = vmul.f32 %v2336_v25, %v2311_v15  ;;  %v2345_v28 = vmul.f32 %v3933_v29, %v2344_v49  ;;  %v2365_v24 = vand.u32 2147483648, %v5211_v27  ;;  %v2383_v56 = vor.u32 1.1754944e-38, %v2382_v50 }
0x115d   :  { %vm2381_vm14 = vcmp.eq.f32.partialorder %v2380_v3, 8.507059e+37  ;;  %vm2364_vm2 = vcmp.eq.f32.partialorder %v5211_v27, 0.0  ;;  %v2317_v50 = vmul.f32 %v5239_v55, %v5187_v2  ;;  %v3988_v2 = vld [vmem:[%s5454_s1 + $0x18] sm:$0xff] }
0x115e   :  { %v2339_v62 = vsel %vm2338_vm4, %v2311_v15, %v2337_v13  ;;  %v2346_v19 = vmul.f32 0.5, %v2345_v28 }
0x115f   :  { %v2342_v23 = vsel %vm2340_vm5, %v2341_v61, %v2339_v62 }
0x1160   :  { %v3935_v1 = vpop.eup %3934  ;;  %v5216_v26 = vadd.f32 1e-06, %v2342_v23  ;;  %v2347_v0 = vsub.f32 1.5, %v2346_v19  ;;  %v2542_v42 = vpop.permute.xlu2 %2541 }
0x1161   :  { %v3937_v31 = vpop.eup %3936  ;;  %v5218_v35 = vadd.f32 %v2542_v42, %v2532_v32  ;;  %v2372_v39 = vmul.f32 %v3935_v1, %v5209_v11  ;;  %vm2377_vm8 = vweird.f32 %v3935_v1  ;;  %v2315_v11 = vmul.f32 %v5239_v55, %v5175_v52  ;;  %v3707_v52 = vld [vmem:[%s5464_s11 + $0x1b] ss:$0 sm:$0xff] }
0x1162   :  { %3938 = vrcp.f32 %v5216_v26  ;;  %v2348_v36 = vmul.f32 %v3933_v29, %v2347_v0  ;;  %v2356_v12 = vmul.f32 %v3937_v31, %v5211_v27  ;;  %vm5231_vm11 = vmor %vm2376_vm9, %vm2377_vm8  ;;  %v2397_v20 = vand.u32 2147483648, %v5216_v26 }
0x1163   :  { %v2634_v38 = vsel %vm2546_vm10, %v5218_v35, -inf  ;;  %v2373_v5 = vsub.f32 1.0, %v2372_v39  ;;  %v2395_v18 = vand.u32 2147483647, %v5216_v26  ;;  %vm2391_vm3 = vweird.f32 %v5216_v26 }
0x1164   :  { %v2349_v59 = vmul.f32 %v2348_v36, %v2312_v16  ;;  %v2357_v34 = vmul.f32 %v3937_v31, %v2356_v12  ;;  %v2635_v40 = vrot.slane %v2634_v38, 4  ;;  %v2398_v61 = vor.u32 1.1754944e-38, %v2397_v20 }
0x1165   :  { %v2374_v14 = vmul.f32 %v3935_v1, %v2373_v5  ;;  %vm2396_vm5 = vcmp.eq.f32.partialorder %v2395_v18, 8.507059e+37 }
0x1166   :  { %v2351_v21 = vsel %vm2350_vm6, %v2312_v16, %v2349_v59  ;;  %v2358_v47 = vmul.f32 0.5, %v2357_v34  ;;  %v2636_v41 = vmax.f32 %v2634_v38, %v2635_v40  ;;  %v3987_v38 = vld [vmem:[%s5454_s1] sm:$0xff] }
0x1167   :  { %v2375_v8 = vadd.f32 %v3935_v1, %v2374_v14  ;;  %v2354_v22 = vsel %vm2352_vm7, %v2353_v46, %v2351_v21 }
0x1168   :  { %v3939_v30 = vpop.eup %3938  ;;  %v2359_v51 = vsub.f32 1.5, %v2358_v47  ;;  %v2637_v60 = vrot.slane %v2636_v41, 2  ;;  %v5226_v58 = vadd.f32 1e-06, %v2354_v22 }
0x1169   :  { %v2387_v15 = vmul.f32 %v3939_v30, %v5216_v26  ;;  %v2379_v57 = vsel %vm5231_vm11, %v3935_v1, %v2375_v8  ;;  %vm2392_vm13 = vweird.f32 %v3939_v30 }
0x116a   :  { %v2360_v45 = vmul.f32 %v3937_v31, %v2359_v51  ;;  %v2638_v43 = vmax.f32 %v2636_v41, %v2637_v60  ;;  %3940 = vrcp.f32 %v5226_v58  ;;  %v2384_v48 = vsel %vm2381_vm14, %v2383_v56, %v2379_v57  ;;  %vm2393_vm4 = vmor %vm2391_vm3, %vm2392_vm13  ;;  %v3986_v31 = vld [vmem:[%s5454_s1 + $0x8] sm:$0xff] }
0x116b   :  { %v2388_v16 = vsub.f32 1.0, %v2387_v15  ;;  %v2385_v62 = vmul.f32 %v2384_v48, %v2315_v11  ;;  %v2412_v12 = vand.u32 2147483648, %v5226_v58  ;;  %vm2406_vm7 = vweird.f32 %v5226_v58 }
0x116c   :  { %v2361_v63 = vmul.f32 %v2360_v45, %v5211_v27  ;;  %v2639_v33 = vrot.slane %v2638_v43, 1  ;;  %v2410_v34 = vand.u32 2147483647, %v5226_v58  ;;  %v2318_v45 = vmul.f32 %v5239_v55, %v5199_v4  ;;  %v3989_v4 = vld [vmem:[%s5454_s1 + $0x10] sm:$0xff]  ;;  %s3325_s1 = sshll.u32 %s5468_s15, 4  ;;  %s3326_s1 = int_to_ptr.hbm [resolvable:$true] %s3325_s1 }
0x116d   :  { %v2389_v54 = vmul.f32 %v3939_v30, %v2388_v16  ;;  %v2432_v0 = vadd.f32 %v3707_v52, %v2385_v62  ;;  %v2413_v8 = vor.u32 1.1754944e-38, %v2412_v12  ;;  %v104_v12 = vld [vmem:[%s5459_s6 + $0x8] sm:$0xff] }
0x116e   :  { %v2363_v37 = vsel %vm2362_vm12, %v5211_v27, %v2361_v63  ;;  %v2640_v10 = vmax.f32 %v2638_v43, %v2639_v33  ;;  %vm2411_vm11 = vcmp.eq.f32.partialorder %v2410_v34, 8.507059e+37  ;;  %2840 = vperm.xlu2 %3679, %v104_v12   ;;  %v106_v34 = vld [vmem:[%s5459_s6 + $0x18] sm:$0xff] }
0x116f   :  { %v2366_v29 = vsel %vm2364_vm2, %v2365_v24, %v2363_v37  ;;  %v2390_v25 = vadd.f32 %v3939_v30, %v2389_v54  ;;  %v5271_v5 = vadd.f32 %v3987_v38, %v2432_v0  ;;  %v3667_v0 = vld [vmem:[%s5463_s10] sm:$0xff] }
0x1170   :  { %v3941_v49 = vpop.eup %3940  ;;  %v2370_v13 = vadd.f32 1e-06, %v2366_v29  ;;  %v2641_v28 = vsub.f32 %v5218_v35, %v2640_v10 }
0x1171   :  { %v2394_v27 = vsel %vm2393_vm4, %v3939_v30, %v2390_v25  ;;  %v2402_v19 = vmul.f32 %v3941_v49, %v5226_v58  ;;  %vm2407_vm6 = vweird.f32 %v3941_v49 }
0x1172   :  { %3942 = vrcp.f32 %v2370_v13  ;;  %v2642_v32 = vmul.f32 1.442695, %v2641_v28  ;;  %v2399_v23 = vsel %vm2396_vm5, %v2398_v61, %v2394_v27  ;;  %vm2408_vm8 = vmor %vm2406_vm7, %vm2407_vm6  ;;  %v2427_v41 = vand.u32 2147483648, %v2370_v13  ;;  %v3666_v61 = vld [vmem:[%s5461_s8 + $0x38] sm:$0xff]  ;;  %v3665_v27 = vld [vmem:[%s5461_s8 + $0x30] sm:$0xff] }
0x1173   :  { %v2400_v1 = vmul.f32 %v2399_v23, %v2316_v17  ;;  %v2403_v6 = vsub.f32 1.0, %v2402_v19  ;;  %v2425_v30 = vand.u32 2147483647, %v2370_v13  ;;  %vm2421_vm12 = vweird.f32 %v2370_v13  ;;  %2753 = vmatpush.bf16.msrb.mxu2 %v3666_v61  ;;  %v2836_v23 = vpop.permute.xlu0 %2835 }
0x1174   :  { %3944 = vpow2.f32 %v2642_v32  ;;  %v2428_v3 = vor.u32 1.1754944e-38, %v2427_v41  ;;  %v3670_v32 = vld [vmem:[%s5463_s10 + $0x18] sm:$0xff] }
0x1175   :  { %v2433_v26 = vadd.f32 %v3707_v52, %v2400_v1  ;;  %v2404_v42 = vmul.f32 %v3941_v49, %v2403_v6  ;;  %vm2426_vm14 = vcmp.eq.f32.partialorder %v2425_v30, 8.507059e+37  ;;  %2818 = vmatpush.bf16.msrb.mxu0 %v3670_v32  ;;  %v3669_v1 = vld [vmem:[%s5463_s10 + $0x10] sm:$0xff]  ;;  %v3668_v6 = vld [vmem:[%s5463_s10 + $0x8] sm:$0xff] }
0x1176   :  { %2850 = vperm.xlu2 %3679, %v106_v34  }
0x1177   :  { %v5264_v35 = vadd.f32 %v3986_v31, %v2433_v26  ;;  %v2405_v39 = vadd.f32 %v3941_v49, %v2404_v42  ;;  %2754 = vmatpush.bf16.msrb.mxu2 %v3665_v27 }
0x1178   :  { %v3943_v36 = vpop.eup %3942 }
0x1179   :  { %2949 = vmatpush.msra.mxu3 %v5264_v35  ;;  %v2417_v59 = vmul.f32 %v3943_v36, %v2370_v13  ;;  %v2409_v21 = vsel %vm2408_vm8, %v3941_v49, %v2405_v39  ;;  %vm2422_vm9 = vweird.f32 %v3943_v36  ;;  %v2726_v62 = vpack.c.bf16 %v5264_v35, %v5271_v5  ;;  %2819 = vmatpush.bf16.msrb.mxu0 %v3669_v1 }
0x117a   :  { %v3945_v40 = vpop.eup %3944  ;;  %v2414_v60 = vsel %vm2411_vm11, %v2413_v8, %v2409_v21  ;;  %vm2423_vm13 = vmor %vm2421_vm12, %vm2422_vm9 }
0x117b   :  { %v2644_v46 = vsel %vm2546_vm10, %v3945_v40, 0.0  ;;  %2950 = vmatpush.msra.mxu3 %v5271_v5  ;;  %v2418_v14 = vsub.f32 1.0, %v2417_v59  ;;  %v2415_v7 = vmul.f32 %v2414_v60, %v2317_v50  ;;  %v2846_v26 = vpop.permute.xlu0 %2845  ;;  %v3708_v59 = vld [vmem:[%s5465_s12 + $0x3] ss:$0 sm:$0xff] }
0x117c   :  { %v2645_v47 = vrot.slane %v2644_v46, 4 }
0x117d   :  { %v2419_v22 = vmul.f32 %v3943_v36, %v2418_v14  ;;  %v2434_v20 = vadd.f32 %v3707_v52, %v2415_v7  ;;  %2820 = vmatpush.bf16.msrb.mxu0 %v3668_v6 }
0x117e   :  { %v2646_v51 = vadd.f32 %v2645_v47, %v2644_v46 }
0x117f   :  { %v2420_v58 = vadd.f32 %v3943_v36, %v2419_v22  ;;  %v5290_v55 = vadd.f32 %v3989_v4, %v2434_v20 }
0x1180   :  { %v2647_v15 = vrot.slane %v2646_v51, 2 }
0x1181   :  { %v2424_v43 = vsel %vm2423_vm13, %v3943_v36, %v2420_v58  ;;  %2821 = vmatpush.bf16.msrb.mxu0 %v3667_v0 }
0x1182   :  { %v2648_v24 = vadd.f32 %v2647_v15, %v2646_v51  ;;  %v2429_v16 = vsel %vm2426_vm14, %v2428_v3, %v2424_v43 }
0x1183   :  { %v2430_v57 = vmul.f32 %v2429_v16, %v2318_v45 }
0x1184   :  { %v2649_v63 = vrot.slane %v2648_v24, 1 }
0x1185   :  { %v2435_v33 = vadd.f32 %v3707_v52, %v2430_v57 }
0x1186   :  { %v2650_v56 = vadd.f32 %v2649_v63, %v2648_v24  ;;  %v3710_v24 = vld [vmem:[%s5467_s14] ss:$0 sm:$0xff] }
0x1187   :  { %v5284_v54 = vadd.f32 %v3988_v2, %v2435_v33 }
0x1188   :  { %3946 = vrcp.f32 %v2650_v56  ;;  %v2662_v48 = vand.u32 2147483648, %v2650_v56  ;;  %v2660_v29 = vand.u32 2147483647, %v2650_v56  ;;  %vm2656_vm3 = vweird.f32 %v2650_v56 }
0x1189   :  { %3050 = vmatpush.msra.mxu1 %v5284_v54  ;;  %v2727_v19 = vpack.c.bf16 %v5284_v54, %v5290_v55 }
0x118a   :  { %v2663_v49 = vor.u32 1.1754944e-38, %v2662_v48  ;;  %vm2661_vm5 = vcmp.eq.f32.partialorder %v2660_v29, 8.507059e+37 }
0x118b   :  { %3051 = vmatpush.msra.mxu1 %v5290_v55 }
0x118e   :  { %v3947_v18 = vpop.eup %3946 }
0x118f   :  { %v2652_v37 = vmul.f32 %v3947_v18, %v2650_v56  ;;  %vm2657_vm2 = vweird.f32 %v3947_v18 }
0x1190   :  { %vm2658_vm4 = vmor %vm2656_vm3, %vm2657_vm2 }
0x1191   :  { %v2653_v10 = vsub.f32 1.0, %v2652_v37 }
0x1193   :  { %v2654_v11 = vmul.f32 %v3947_v18, %v2653_v10 }
0x1195   :  { %v2655_v25 = vadd.f32 %v3947_v18, %v2654_v11 }
0x1197   :  { %v2659_v17 = vsel %vm2658_vm4, %v3947_v18, %v2655_v25 }
0x1198   :  { %v2664_v13 = vsel %vm2661_vm5, %v2663_v49, %v2659_v17 }
0x1199   :  { %v2665_v28 = vmul.f32 %v3945_v40, %v2664_v13 }
0x119b   :  { %2666 = vxpose.xlu0.b32.start.end [1/1] (short) (narrow) %v2665_v28, 8 }
0x11bf   :  { %v2595_v52 = vpop.trf.xlu1 }
0x11c0   :  { %3589 = vmatmul.msk.f32.vlgmr.msra.gmra.mxu2 %vm2546_vm10, %v2595_v52 }
0x11c8   :  { %3599 = vmatmul.msk.bf16.vlgmr.msrb.gmra.mxu2 %vm142_vm0, %v2726_v62  ;;  %v2841_v20 = vpop.permute.xlu2 %2840 }
0x11d0   :  { %v2851_v27 = vpop.permute.xlu2 %2850 }
0x11d8   :  { %3600 = vmatmul.msk.bf16.gmra.mxu2 %vm142_vm0, %v2727_v19 }
0x123f   :  { %v2682_v42 = vpop.trf.xlu0 }
0x1240   :  { %3590 = vmatmul.msk.f32.vlgmr.msrb.gmra.mxu3 %vm2546_vm10, %v2682_v42 }
0x1243   :  { %v2631_v31 = vpop.f32.mrf.mxu2 }
0x1244   :  { %v3061_v39 = vadd.f32 %v2631_v31, %v5123_v53 }
0x1246   :  { %v3063_v36 = vsel %vm142_vm0, %v3061_v39, 0.0 }
0x1247   :  { %3064 = vadd.xlane.f32.xlu0 %v3063_v36 }
0x124b   :  { %v2756_v38 = vpop.f32.mrf.mxu2 }
0x124c   :  { %v2757_v40 = vadd.f32 %v3708_v59, %v2756_v38 }
0x124e   :  { %v2766_v14 = vmax.f32 %v2757_v40, 0.0 }
0x1253   :  { %v2758_v46 = vpop.f32.mrf.mxu2 }
0x1254   :  { %v2759_v53 = vadd.f32 %v3708_v59, %v2758_v46 }
0x1256   :  { %v2767_v21 = vmax.f32 %v2759_v53, 0.0 }
0x1258   :  { %v2778_v47 = vpack.c.bf16 %v2767_v21, %v2766_v14 }
0x125a   :  { %3617 = vmatmul.msk.bf16.vlgmr.msrb.gmra.mxu0 %vm621_vm15, %v2778_v47 }
0x125b   :  { %v2761_v41 = vpop.f32.mrf.mxu2 }
0x125c   :  { %v2762_v8 = vadd.f32 %v3708_v59, %v2761_v41 }
0x125e   :  { %v2768_v51 = vmax.f32 %v2762_v8, 0.0 }
0x1263   :  { %v2763_v22 = vpop.f32.mrf.mxu2 }
0x1264   :  { %v2764_v30 = vadd.f32 %v3708_v59, %v2763_v22 }
0x1266   :  { %v2769_v60 = vmax.f32 %v2764_v30, 0.0 }
0x1268   :  { %v2779_v50 = vpack.c.bf16 %v2769_v60, %v2768_v51 }
0x126a   :  { %3618 = vmatmul.msk.bf16.gmra.mxu0 %vm621_vm15, %v2779_v50 }
0x12ba   :  { %v3065_v58 = vpop.xlane.xlu0 %3064 }
0x12bb   :  { %v3069_v15 = vmul.f32 %v3065_v58, %v4274_v9 }
0x12bd   :  { %v5333_v3 = vsub.f32 %v3061_v39, %v3069_v15 }
0x12bf   :  { %v3073_v45 = vmul.f32 %v5333_v3, %v5333_v3 }
0x12c1   :  { %v3075_v43 = vsel %vm142_vm0, %v3073_v45, 0.0 }
0x12c2   :  { %3076 = vadd.xlane.f32.xlu0 %v3075_v43 }
0x12d7   :  { %v2823_v7 = vpop.f32.mrf.mxu0 }
0x12d8   :  { %v2824_v16 = vadd.f32 %v3710_v24, %v2823_v7 }
0x12da   :  { %v2853_v63 = vadd.f32 %v2836_v23, %v2824_v16 }
0x12dc   :  { %v2857_v2 = vsel %vm275_vm1, %v2853_v63, -inf }
0x12df   :  { %v2825_v57 = vpop.f32.mrf.mxu0 }
0x12e0   :  { %v2826_v33 = vadd.f32 %v3710_v24, %v2825_v57 }
0x12e2   :  { %v2854_v56 = vadd.f32 %v2841_v20, %v2826_v33 }
0x12e4   :  { %v2858_v4 = vsel %vm275_vm1, %v2854_v56, -inf }
0x12e5   :  { %v2859_v18 = vmax.f32 %v2857_v2, %v2858_v4 }
0x12e7   :  { %v2860_v37 = vrot.slane %v2859_v18, 4  ;;  %v2828_v10 = vpop.f32.mrf.mxu0 }
0x12e8   :  { %v2829_v29 = vadd.f32 %v3710_v24, %v2828_v10 }
0x12e9   :  { %v2861_v48 = vmax.f32 %v2859_v18, %v2860_v37 }
0x12ea   :  { %v2855_v13 = vadd.f32 %v2846_v26, %v2829_v29 }
0x12eb   :  { %v2862_v11 = vrot.slane %v2861_v48, 2 }
0x12ec   :  { %v2958_v32 = vsel %vm275_vm1, %v2855_v13, -inf }
0x12ed   :  { %v2863_v25 = vmax.f32 %v2861_v48, %v2862_v11 }
0x12ef   :  { %v2864_v49 = vrot.slane %v2863_v25, 1  ;;  %v2830_v17 = vpop.f32.mrf.mxu0 }
0x12f0   :  { %v2831_v28 = vadd.f32 %v3710_v24, %v2830_v17 }
0x12f1   :  { %v2865_v61 = vmax.f32 %v2863_v25, %v2864_v49 }
0x12f2   :  { %v2856_v52 = vadd.f32 %v2851_v27, %v2831_v28 }
0x12f3   :  { %v2866_v62 = vsub.f32 %v2853_v63, %v2865_v61  ;;  %v2867_v19 = vsub.f32 %v2854_v56, %v2865_v61 }
0x12f4   :  { %v2959_v23 = vsel %vm275_vm1, %v2856_v52, -inf }
0x12f5   :  { %v2868_v1 = vmul.f32 1.442695, %v2866_v62  ;;  %v2870_v6 = vmul.f32 1.442695, %v2867_v19  ;;  %v2960_v0 = vmax.f32 %v2958_v32, %v2959_v23 }
0x12f7   :  { %3948 = vpow2.f32 %v2868_v1  ;;  %v2961_v42 = vrot.slane %v2960_v0, 4 }
0x12f8   :  { %3950 = vpow2.f32 %v2870_v6 }
0x12f9   :  { %v2962_v31 = vmax.f32 %v2960_v0, %v2961_v42 }
0x12fb   :  { %v2963_v39 = vrot.slane %v2962_v31, 2 }
0x12fd   :  { %v3949_v36 = vpop.eup %3948  ;;  %v2964_v26 = vmax.f32 %v2962_v31, %v2963_v39 }
0x12fe   :  { %v3951_v12 = vpop.eup %3950  ;;  %v2872_v38 = vsel %vm275_vm1, %v3949_v36, 0.0 }
0x12ff   :  { %v2873_v59 = vsel %vm275_vm1, %v3951_v12, 0.0  ;;  %v2965_v34 = vrot.slane %v2964_v26, 1 }
0x1300   :  { %v2874_v40 = vadd.f32 %v2873_v59, %v2872_v38 }
0x1301   :  { %v2966_v46 = vmax.f32 %v2964_v26, %v2965_v34 }
0x1302   :  { %v2875_v53 = vrot.slane %v2874_v40, 4 }
0x1303   :  { %v2967_v14 = vsub.f32 %v2855_v13, %v2966_v46  ;;  %v2968_v21 = vsub.f32 %v2856_v52, %v2966_v46 }
0x1304   :  { %v2876_v47 = vadd.f32 %v2875_v53, %v2874_v40 }
0x1305   :  { %v2969_v41 = vmul.f32 1.442695, %v2967_v14  ;;  %v2971_v8 = vmul.f32 1.442695, %v2968_v21 }
0x1306   :  { %v2877_v22 = vrot.slane %v2876_v47, 2 }
0x1307   :  { %3952 = vpow2.f32 %v2969_v41 }
0x1308   :  { %v2878_v30 = vadd.f32 %v2877_v22, %v2876_v47  ;;  %3954 = vpow2.f32 %v2971_v8  ;;  %v5352_v8 = vld [vmem:[%s5464_s11 + $0x1c] ss:$0 sm:$0xff] }
0x130a   :  { %v2879_v51 = vrot.slane %v2878_v30, 1 }
0x130c   :  { %v2880_v60 = vadd.f32 %v2879_v51, %v2878_v30 }
0x130d   :  { %v3953_v50 = vpop.eup %3952 }
0x130e   :  { %v3955_v58 = vpop.eup %3954  ;;  %3956 = vrcp.f32 %v2880_v60  ;;  %v2973_v15 = vsel %vm275_vm1, %v3953_v50, 0.0  ;;  %v2892_v56 = vand.u32 2147483648, %v2880_v60  ;;  %v2890_v4 = vand.u32 2147483647, %v2880_v60 }
0x130f   :  { %v2974_v45 = vsel %vm275_vm1, %v3955_v58, 0.0  ;;  %vm2886_vm10 = vweird.f32 %v2880_v60 }
0x1310   :  { %v2975_v43 = vadd.f32 %v2974_v45, %v2973_v15  ;;  %v2893_v48 = vor.u32 1.1754944e-38, %v2892_v56  ;;  %vm2891_vm7 = vcmp.eq.f32.partialorder %v2890_v4, 8.507059e+37  ;;  %v5359_v15 = vld [vmem:[%s5464_s11 + $0x1d] ss:$0 sm:$0xff] }
0x1312   :  { %v2976_v7 = vrot.slane %v2975_v43, 4 }
0x1314   :  { %v3957_v24 = vpop.eup %3956  ;;  %v2977_v16 = vadd.f32 %v2976_v7, %v2975_v43 }
0x1315   :  { %v2882_v57 = vmul.f32 %v3957_v24, %v2880_v60  ;;  %vm2887_vm15 = vweird.f32 %v3957_v24 }
0x1316   :  { %v2978_v63 = vrot.slane %v2977_v16, 2  ;;  %vm2888_vm6 = vmor %vm2886_vm10, %vm2887_vm15 }
0x1317   :  { %v2883_v33 = vsub.f32 1.0, %v2882_v57 }
0x1318   :  { %v2979_v20 = vadd.f32 %v2978_v63, %v2977_v16 }
0x1319   :  { %v2884_v2 = vmul.f32 %v3957_v24, %v2883_v33 }
0x131a   :  { %v2980_v18 = vrot.slane %v2979_v20, 1 }
0x131b   :  { %v2885_v37 = vadd.f32 %v3957_v24, %v2884_v2 }
0x131c   :  { %v2981_v10 = vadd.f32 %v2980_v18, %v2979_v20 }
0x131d   :  { %v2889_v11 = vsel %vm2888_vm6, %v3957_v24, %v2885_v37  ;;  %v2718_v24 = vpop.f32.mrf.mxu3 }
0x131e   :  { %3958 = vrcp.f32 %v2981_v10  ;;  %v2894_v29 = vsel %vm2891_vm7, %v2893_v48, %v2889_v11  ;;  %v2993_v61 = vand.u32 2147483648, %v2981_v10  ;;  %v2991_v52 = vand.u32 2147483647, %v2981_v10 }
0x131f   :  { %v2895_v25 = vmul.f32 %v3949_v36, %v2894_v29  ;;  %v2896_v13 = vmul.f32 %v3951_v12, %v2894_v29  ;;  %vm2987_vm9 = vweird.f32 %v2981_v10  ;;  %v3062_v16 = vadd.f32 %v2718_v24, %v5130_v44 }
0x1320   :  { %v2994_v19 = vor.u32 1.1754944e-38, %v2993_v61  ;;  %vm2992_vm12 = vcmp.eq.f32.partialorder %v2991_v52, 8.507059e+37 }
0x1321   :  { %2897 = vxpose.xlu2.b32.start [1/2] (short) (narrow) %v2895_v25, 16  ;;  %v3066_v57 = vsel %vm142_vm0, %v3062_v16, 0.0 }
0x1324   :  { %v3959_v49 = vpop.eup %3958 }
0x1325   :  { %v2983_v17 = vmul.f32 %v3959_v49, %v2981_v10  ;;  %vm2988_vm8 = vweird.f32 %v3959_v49 }
0x1326   :  { %vm2989_vm11 = vmor %vm2987_vm9, %vm2988_vm8 }
0x1327   :  { %v2984_v28 = vsub.f32 1.0, %v2983_v17 }
0x1329   :  { %2898 = vxpose.xlu2.b32.end [2/2] (short) (narrow) %v2896_v13, 16  ;;  %v2985_v27 = vmul.f32 %v3959_v49, %v2984_v28 }
0x132b   :  { %v2986_v62 = vadd.f32 %v3959_v49, %v2985_v27 }
0x132d   :  { %v2990_v32 = vsel %vm2989_vm11, %v3959_v49, %v2986_v62 }
0x132e   :  { %v2995_v23 = vsel %vm2992_vm12, %v2994_v19, %v2990_v32 }
0x132f   :  { %v2996_v1 = vmul.f32 %v3953_v50, %v2995_v23  ;;  %v2997_v42 = vmul.f32 %v3955_v58, %v2995_v23  ;;  %v3084_v50 = vmul.f32 %v5352_v8, %v5333_v3 }
0x1331   :  { %2998 = vxpose.xlu1.b32.start [1/2] (short) (narrow) %v2996_v1, 16 }
0x1335   :  { %v3077_v6 = vpop.xlane.xlu0 %3076 }
0x1336   :  { %v3081_v0 = vmul.f32 0.032258064, %v3077_v6 }
0x1338   :  { %3960 = vrsqrt.f32 %v3081_v0  ;;  %vm3093_vm13 = vcmp.eq.f32.partialorder %v3081_v0, inf  ;;  %v3096_v34 = vand.u32 2147483648, %v3081_v0  ;;  %vm3095_vm14 = vcmp.eq.f32.partialorder %v3081_v0, 0.0 }
0x1339   :  { %2999 = vxpose.xlu1.b32.end [2/2] (short) (narrow) %v2997_v42, 16 }
0x133e   :  { %v3961_v31 = vpop.eup %3960 }
0x133f   :  { %v3087_v39 = vmul.f32 %v3961_v31, %v3081_v0 }
0x1341   :  { %v3088_v36 = vmul.f32 %v3961_v31, %v3087_v39 }
0x1343   :  { %v3089_v26 = vmul.f32 0.5, %v3088_v36 }
0x1345   :  { %v3090_v12 = vsub.f32 1.5, %v3089_v26 }
0x1347   :  { %v3091_v38 = vmul.f32 %v3961_v31, %v3090_v12 }
0x1349   :  { %v3092_v59 = vmul.f32 %v3091_v38, %v3081_v0 }
0x134b   :  { %v3094_v40 = vsel %vm3093_vm13, %v3081_v0, %v3092_v59 }
0x134c   :  { %v3097_v46 = vsel %vm3095_vm14, %v3096_v34, %v3094_v40 }
0x134d   :  { %v3110_v53 = vadd.f32 1e-06, %v3097_v46 }
0x134f   :  { %3962 = vrcp.f32 %v3110_v53  ;;  %v3123_v41 = vand.u32 2147483648, %v3110_v53  ;;  %v3121_v30 = vand.u32 2147483647, %v3110_v53  ;;  %vm3117_vm3 = vweird.f32 %v3110_v53 }
0x1351   :  { %v3124_v60 = vor.u32 1.1754944e-38, %v3123_v41  ;;  %vm3122_vm5 = vcmp.eq.f32.partialorder %v3121_v30, 8.507059e+37 }
0x1355   :  { %v3963_v14 = vpop.eup %3962 }
0x1356   :  { %v3113_v21 = vmul.f32 %v3963_v14, %v3110_v53  ;;  %vm3118_vm2 = vweird.f32 %v3963_v14 }
0x1357   :  { %vm3119_vm4 = vmor %vm3117_vm3, %vm3118_vm2 }
0x1358   :  { %v3114_v47 = vsub.f32 1.0, %v3113_v21 }
0x135a   :  { %v3115_v22 = vmul.f32 %v3963_v14, %v3114_v47 }
0x135c   :  { %v3116_v51 = vadd.f32 %v3963_v14, %v3115_v22 }
0x135e   :  { %v3120_v58 = vsel %vm3119_vm4, %v3963_v14, %v3116_v51 }
0x135f   :  { %v3125_v45 = vsel %vm3122_vm5, %v3124_v60, %v3120_v58 }
0x1360   :  { %v3126_v43 = vmul.f32 %v3125_v45, %v3084_v50 }
0x1362   :  { %v3143_v7 = vadd.f32 %v5359_v15, %v3126_v43 }
0x1364   :  { %3145 = vst.msk [vmem:[#allocation2] sm:$0xff] %vm142_vm0, %v3143_v7 }
0x1399   :  { %3067 = vadd.xlane.f32.xlu1 %v3066_v57 }
0x13ba   :  { %v2913_v3 = vpop.trf.xlu2 }
0x13bb   :  { %3619 = vmatmul.msk.f32.vlgmr.msra.gmra.mxu3 %vm275_vm1, %v2913_v3 }
0x13c2   :  { %v2914_v63 = vpop.trf.xlu2 }
0x13c3   :  { %3620 = vmatmul.msk.f32.gmra.mxu3 %vm275_vm1, %v2914_v63 }
0x13d5   :  { %v3014_v33 = vpop.trf.xlu1 }
0x13d6   :  { %3621 = vmatmul.msk.f32.vlgmr.msra.gmra.mxu1 %vm275_vm1, %v3014_v33 }
0x13dd   :  { %v3015_v20 = vpop.trf.xlu1 }
0x13de   :  { %3622 = vmatmul.msk.f32.gmra.mxu1 %vm275_vm1, %v3015_v20 }
0x140c   :  { %v3068_v29 = vpop.xlane.xlu1 %3067 }
0x140d   :  { %v3070_v25 = vmul.f32 %v3068_v29, %v4274_v9 }
0x140f   :  { %v3072_v17 = vsub.f32 %v3062_v16, %v3070_v25 }
0x1411   :  { %v3085_v3 = vmul.f32 %v5352_v8, %v3072_v17 }
0x143e   :  { %v2952_v56 = vpop.f32.mrf.mxu3 }
0x143f   :  { %v3149_v2 = vadd.f32 %v2952_v56, %v5271_v5 }
0x1441   :  { %v3153_v44 = vsel %vm142_vm0, %v3149_v2, 0.0 }
0x1442   :  { %3154 = vadd.xlane.f32.xlu2 %v3153_v44 }
0x1446   :  { %v2955_v4 = vpop.f32.mrf.mxu3 }
0x1447   :  { %v3150_v18 = vadd.f32 %v2955_v4, %v5264_v35  ;;  %v3074_v35 = vmul.f32 %v3072_v17, %v3072_v17 }
0x1449   :  { %v3156_v37 = vsel %vm142_vm0, %v3150_v18, 0.0  ;;  %v3078_v28 = vsel %vm142_vm0, %v3074_v35, 0.0 }
0x144a   :  { %3157 = vadd.xlane.f32.xlu1 %v3156_v37 }
0x1453   :  { %v3053_v10 = vpop.f32.mrf.mxu1 }
0x1454   :  { %v3151_v48 = vadd.f32 %v3053_v10, %v5290_v55 }
0x1456   :  { %v3159_v11 = vsel %vm142_vm0, %v3151_v48, 0.0 }
0x1457   :  { %3160 = vadd.xlane.f32.xlu1 %v3159_v11 }
0x145b   :  { %v3056_v49 = vpop.f32.mrf.mxu1 }
0x145c   :  { %v3152_v5 = vadd.f32 %v3056_v49, %v5284_v54 }
0x145e   :  { %v3162_v13 = vsel %vm142_vm0, %v3152_v5, 0.0 }
0x145f   :  { %3163 = vadd.xlane.f32.xlu1 %v3162_v13 }
0x1467   :  { %3079 = vadd.xlane.f32.xlu1 %v3078_v28 }
0x14b5   :  { %v3155_v61 = vpop.xlane.xlu2 %3154 }
0x14b6   :  { %v3165_v55 = vmul.f32 %v3155_v61, %v4274_v9 }
0x14b8   :  { %v5380_v27 = vsub.f32 %v3149_v2, %v3165_v55 }
0x14ba   :  { %v3173_v52 = vmul.f32 %v5380_v27, %v5380_v27 }
0x14bc   :  { %v3177_v62 = vsel %vm142_vm0, %v3173_v52, 0.0 }
0x14bd   :  { %v3158_v19 = vpop.xlane.xlu1 %3157  ;;  %3178 = vadd.xlane.f32.xlu0 %v3177_v62 }
0x14be   :  { %v3166_v54 = vmul.f32 %v3158_v19, %v4274_v9 }
0x14c0   :  { %v5386_v32 = vsub.f32 %v3150_v18, %v3166_v54 }
0x14c2   :  { %v3174_v23 = vmul.f32 %v5386_v32, %v5386_v32 }
0x14c4   :  { %v3180_v1 = vsel %vm142_vm0, %v3174_v23, 0.0 }
0x14c5   :  { %3181 = vadd.xlane.f32.xlu2 %v3180_v1 }
0x14ca   :  { %v3161_v6 = vpop.xlane.xlu1 %3160 }
0x14cb   :  { %v3167_v0 = vmul.f32 %v3161_v6, %v4274_v9 }
0x14cd   :  { %v5392_v42 = vsub.f32 %v3151_v48, %v3167_v0 }
0x14cf   :  { %v3175_v31 = vmul.f32 %v5392_v42, %v5392_v42 }
0x14d1   :  { %v3183_v39 = vsel %vm142_vm0, %v3175_v31, 0.0 }
0x14d2   :  { %3184 = vadd.xlane.f32.xlu1 %v3183_v39  ;;  %v3164_v36 = vpop.xlane.xlu1 %3163 }
0x14d3   :  { %v3168_v26 = vmul.f32 %v3164_v36, %v4274_v9 }
0x14d5   :  { %v5398_v12 = vsub.f32 %v3152_v5, %v3168_v26 }
0x14d7   :  { %v3176_v38 = vmul.f32 %v5398_v12, %v5398_v12 }
0x14d9   :  { %v3186_v59 = vsel %vm142_vm0, %v3176_v38, 0.0 }
0x14da   :  { %v3080_v34 = vpop.xlane.xlu1 %3079  ;;  %3187 = vadd.xlane.f32.xlu0 %v3186_v59 }
0x14db   :  { %v3082_v40 = vmul.f32 0.032258064, %v3080_v34 }
0x14dd   :  { %3964 = vrsqrt.f32 %v3082_v40  ;;  %vm3105_vm1 = vcmp.eq.f32.partialorder %v3082_v40, inf  ;;  %v3108_v9 = vand.u32 2147483648, %v3082_v40  ;;  %vm3107_vm15 = vcmp.eq.f32.partialorder %v3082_v40, 0.0 }
0x14e3   :  { %v3965_v46 = vpop.eup %3964 }
0x14e4   :  { %v3099_v53 = vmul.f32 %v3965_v46, %v3082_v40 }
0x14e6   :  { %v3100_v14 = vmul.f32 %v3965_v46, %v3099_v53  ;;  %v5418_v53 = vld [vmem:[%s5464_s11 + $0x1e] ss:$0 sm:$0xff] }
0x14e8   :  { %v3101_v21 = vmul.f32 0.5, %v3100_v14 }
0x14ea   :  { %v3102_v47 = vsub.f32 1.5, %v3101_v21 }
0x14ec   :  { %v3103_v41 = vmul.f32 %v3965_v46, %v3102_v47 }
0x14ee   :  { %v3104_v22 = vmul.f32 %v3103_v41, %v3082_v40 }
0x14f0   :  { %v3106_v30 = vsel %vm3105_vm1, %v3082_v40, %v3104_v22 }
0x14f1   :  { %v3109_v51 = vsel %vm3107_vm15, %v3108_v9, %v3106_v30 }
0x14f2   :  { %v3111_v60 = vadd.f32 1e-06, %v3109_v51 }
0x14f4   :  { %3966 = vrcp.f32 %v3111_v60  ;;  %v3138_v43 = vand.u32 2147483648, %v3111_v60  ;;  %v3136_v24 = vand.u32 2147483647, %v3111_v60  ;;  %vm3132_vm6 = vweird.f32 %v3111_v60 }
0x14f6   :  { %v3139_v57 = vor.u32 1.1754944e-38, %v3138_v43  ;;  %vm3137_vm8 = vcmp.eq.f32.partialorder %v3136_v24, 8.507059e+37 }
0x14fa   :  { %v3967_v50 = vpop.eup %3966 }
0x14fb   :  { %v3128_v58 = vmul.f32 %v3967_v50, %v3111_v60  ;;  %vm3133_vm10 = vweird.f32 %v3967_v50 }
0x14fc   :  { %vm3134_vm7 = vmor %vm3132_vm6, %vm3133_vm10 }
0x14fd   :  { %v3129_v45 = vsub.f32 1.0, %v3128_v58 }
0x14ff   :  { %v3130_v7 = vmul.f32 %v3967_v50, %v3129_v45 }
0x1501   :  { %v3131_v16 = vadd.f32 %v3967_v50, %v3130_v7 }
0x1503   :  { %v3135_v63 = vsel %vm3134_vm7, %v3967_v50, %v3131_v16  ;;  %v3194_v50 = vmul.f32 %v5418_v53, %v5380_v27  ;;  %v5426_v16 = vld [vmem:[%s5464_s11 + $0x1f] ss:$0 sm:$0xff]  ;;  %s4047_s11 = smov [#allocation4]  }
0x1504   :  { %v3140_v33 = vsel %vm3137_vm8, %v3139_v57, %v3135_v63  ;;  %s3336_s8 = sshll.u32 %s4047_s11, 4  ;;  %s3337_s8 = int_to_ptr.vmem [resolvable:$true] %s3336_s8 }
0x1505   :  { %v3141_v20 = vmul.f32 %v3140_v33, %v3085_v3 }
0x1507   :  { %v3144_v56 = vadd.f32 %v5359_v15, %v3141_v20 }
0x1509   :  { %3146 = vst.msk [vmem:[#allocation2 + $0x8] sm:$0xff] %vm142_vm0, %v3144_v56 }
0x150a   :  { %3331 = dma.vmem_to_hbm [thread:$0]  %s3324_s7, 256, %s3326_s1, [#allocation3], %s4045_s9, %s4045_s9, %s4046_s17  }
0x1530   :  { %v3179_v8 = vpop.xlane.xlu0 %3178 }
0x1531   :  { %v3189_v2 = vmul.f32 0.032258064, %v3179_v8 }
0x1533   :  { %3968 = vrsqrt.f32 %v3189_v2  ;;  %vm3205_vm9 = vcmp.eq.f32.partialorder %v3189_v2, inf  ;;  %v3208_v17 = vand.u32 2147483648, %v3189_v2  ;;  %vm3207_vm11 = vcmp.eq.f32.partialorder %v3189_v2, 0.0 }
0x1538   :  { %v3182_v44 = vpop.xlane.xlu2 %3181 }
0x1539   :  { %v3969_v4 = vpop.eup %3968  ;;  %v3190_v18 = vmul.f32 0.032258064, %v3182_v44 }
0x153a   :  { %v3199_v37 = vmul.f32 %v3969_v4, %v3189_v2 }
0x153b   :  { %3970 = vrsqrt.f32 %v3190_v18  ;;  %vm3217_vm12 = vcmp.eq.f32.partialorder %v3190_v18, inf  ;;  %v3220_v23 = vand.u32 2147483648, %v3190_v18  ;;  %vm3219_vm13 = vcmp.eq.f32.partialorder %v3190_v18, 0.0 }
0x153c   :  { %v3200_v10 = vmul.f32 %v3969_v4, %v3199_v37 }
0x153e   :  { %v3201_v48 = vmul.f32 0.5, %v3200_v10 }
0x1540   :  { %v3202_v11 = vsub.f32 1.5, %v3201_v48 }
0x1541   :  { %v3971_v15 = vpop.eup %3970 }
0x1542   :  { %v3203_v29 = vmul.f32 %v3969_v4, %v3202_v11  ;;  %v3211_v25 = vmul.f32 %v3971_v15, %v3190_v18 }
0x1544   :  { %v3204_v49 = vmul.f32 %v3203_v29, %v3189_v2  ;;  %v3212_v5 = vmul.f32 %v3971_v15, %v3211_v25 }
0x1545   :  { %v3185_v13 = vpop.xlane.xlu1 %3184 }
0x1546   :  { %v3206_v35 = vsel %vm3205_vm9, %v3189_v2, %v3204_v49  ;;  %v3213_v28 = vmul.f32 0.5, %v3212_v5  ;;  %v3191_v61 = vmul.f32 0.032258064, %v3185_v13 }
0x1547   :  { %v3209_v55 = vsel %vm3207_vm11, %v3208_v17, %v3206_v35 }
0x1548   :  { %v3246_v52 = vadd.f32 1e-06, %v3209_v55  ;;  %v3214_v62 = vsub.f32 1.5, %v3213_v28  ;;  %3972 = vrsqrt.f32 %v3191_v61  ;;  %vm3229_vm5 = vcmp.eq.f32.partialorder %v3191_v61, inf }
0x1549   :  { %vm3231_vm1 = vcmp.eq.f32.partialorder %v3191_v61, 0.0  ;;  %v3232_v57 = vand.u32 2147483648, %v3191_v61 }
0x154a   :  { %3974 = vrcp.f32 %v3246_v52  ;;  %v3215_v19 = vmul.f32 %v3971_v15, %v3214_v62  ;;  %v3259_v14 = vand.u32 2147483647, %v3246_v52  ;;  %v3261_v21 = vand.u32 2147483648, %v3246_v52 }
0x154b   :  { %vm3255_vm2 = vweird.f32 %v3246_v52  ;;  %v3195_v15 = vmul.f32 %v5418_v53, %v5386_v32 }
0x154c   :  { %v3216_v54 = vmul.f32 %v3215_v19, %v3190_v18  ;;  %vm3260_vm4 = vcmp.eq.f32.partialorder %v3259_v14, 8.507059e+37  ;;  %v3262_v58 = vor.u32 1.1754944e-38, %v3261_v21 }
0x154d   :  { %v3188_v1 = vpop.xlane.xlu0 %3187 }
0x154e   :  { %v3973_v6 = vpop.eup %3972  ;;  %v3218_v0 = vsel %vm3217_vm12, %v3190_v18, %v3216_v54  ;;  %v5412_v31 = vmul.f32 0.032258064, %v3188_v1 }
0x154f   :  { %v3221_v39 = vsel %vm3219_vm13, %v3220_v23, %v3218_v0  ;;  %v3223_v36 = vmul.f32 %v3973_v6, %v3191_v61  ;;  %v3196_v0 = vmul.f32 %v5418_v53, %v5392_v42  ;;  %v3197_v42 = vmul.f32 %v5418_v53, %v5398_v12 }
0x1550   :  { %v3975_v26 = vpop.eup %3974  ;;  %v3247_v38 = vadd.f32 1e-06, %v3221_v39  ;;  %3976 = vrsqrt.f32 %v5412_v31  ;;  %vm3241_vm8 = vcmp.eq.f32.partialorder %v5412_v31, inf  ;;  %v3244_v49 = vand.u32 2147483648, %v5412_v31 }
0x1551   :  { %v3224_v59 = vmul.f32 %v3973_v6, %v3223_v36  ;;  %v3251_v34 = vmul.f32 %v3975_v26, %v3246_v52  ;;  %vm3256_vm14 = vweird.f32 %v3975_v26  ;;  %vm3243_vm9 = vcmp.eq.f32.partialorder %v5412_v31, 0.0 }
0x1552   :  { %3978 = vrcp.f32 %v3247_v38  ;;  %vm3257_vm3 = vmor %vm3255_vm2, %vm3256_vm14  ;;  %v3274_v8 = vand.u32 2147483647, %v3247_v38  ;;  %v3276_v2 = vand.u32 2147483648, %v3247_v38  ;;  %vm3270_vm10 = vweird.f32 %v3247_v38 }
0x1553   :  { %v3225_v40 = vmul.f32 0.5, %v3224_v59  ;;  %v3252_v46 = vsub.f32 1.0, %v3251_v34 }
0x1554   :  { %v3277_v11 = vor.u32 1.1754944e-38, %v3276_v2  ;;  %vm3275_vm7 = vcmp.eq.f32.partialorder %v3274_v8, 8.507059e+37 }
0x1555   :  { %v3226_v47 = vsub.f32 1.5, %v3225_v40  ;;  %v3253_v41 = vmul.f32 %v3975_v26, %v3252_v46 }
0x1556   :  { %v3977_v22 = vpop.eup %3976 }
0x1557   :  { %v3227_v9 = vmul.f32 %v3973_v6, %v3226_v47  ;;  %v3235_v30 = vmul.f32 %v3977_v22, %v5412_v31  ;;  %v3254_v51 = vadd.f32 %v3975_v26, %v3253_v41 }
0x1558   :  { %v3979_v60 = vpop.eup %3978 }
0x1559   :  { %v3228_v45 = vmul.f32 %v3227_v9, %v3191_v61  ;;  %v3236_v43 = vmul.f32 %v3977_v22, %v3235_v30  ;;  %v3258_v7 = vsel %vm3257_vm3, %v3975_v26, %v3254_v51  ;;  %v3266_v24 = vmul.f32 %v3979_v60, %v3247_v38 }
0x155a   :  { %v3263_v3 = vsel %vm3260_vm4, %v3262_v58, %v3258_v7  ;;  %vm3271_vm15 = vweird.f32 %v3979_v60 }
0x155b   :  { %v3230_v63 = vsel %vm3229_vm5, %v3191_v61, %v3228_v45  ;;  %v3237_v33 = vmul.f32 0.5, %v3236_v43  ;;  %v3264_v20 = vmul.f32 %v3263_v3, %v3194_v50  ;;  %v3267_v27 = vsub.f32 1.0, %v3266_v24  ;;  %vm3272_vm6 = vmor %vm3270_vm10, %vm3271_vm15 }
0x155c   :  { %v3233_v56 = vsel %vm3231_vm1, %v3232_v57, %v3230_v63 }
0x155d   :  { %v3248_v44 = vadd.f32 1e-06, %v3233_v56  ;;  %v3238_v4 = vsub.f32 1.5, %v3237_v33  ;;  %v3268_v18 = vmul.f32 %v3979_v60, %v3267_v27  ;;  %v3311_v37 = vadd.f32 %v5426_v16, %v3264_v20 }
0x155f   :  { %3980 = vrcp.f32 %v3248_v44  ;;  %v3239_v10 = vmul.f32 %v3977_v22, %v3238_v4  ;;  %v3269_v48 = vadd.f32 %v3979_v60, %v3268_v18  ;;  %3315 = vst.msk [vmem:[#allocation4] sm:$0xff] %vm142_vm0, %v3311_v37  ;;  %v3291_v62 = vand.u32 2147483648, %v3248_v44 }
0x1560   :  { %v3289_v54 = vand.u32 2147483647, %v3248_v44  ;;  %vm3285_vm12 = vweird.f32 %v3248_v44 }
0x1561   :  { %v3240_v29 = vmul.f32 %v3239_v10, %v5412_v31  ;;  %v3273_v25 = vsel %vm3272_vm6, %v3979_v60, %v3269_v48  ;;  %v3292_v6 = vor.u32 1.1754944e-38, %v3291_v62 }
0x1562   :  { %v3278_v5 = vsel %vm3275_vm7, %v3277_v11, %v3273_v25  ;;  %vm3290_vm14 = vcmp.eq.f32.partialorder %v3289_v54, 8.507059e+37 }
0x1563   :  { %v3242_v17 = vsel %vm3241_vm8, %v5412_v31, %v3240_v29  ;;  %v3279_v13 = vmul.f32 %v3278_v5, %v3195_v15 }
0x1564   :  { %v3245_v35 = vsel %vm3243_vm9, %v3244_v49, %v3242_v17 }
0x1565   :  { %v3981_v28 = vpop.eup %3980  ;;  %v3249_v61 = vadd.f32 1e-06, %v3245_v35  ;;  %v3312_v55 = vadd.f32 %v5426_v16, %v3279_v13 }
0x1566   :  { %v3281_v32 = vmul.f32 %v3981_v28, %v3248_v44  ;;  %vm3286_vm11 = vweird.f32 %v3981_v28 }
0x1567   :  { %3982 = vrcp.f32 %v3249_v61  ;;  %3316 = vst.msk [vmem:[#allocation4 + $0x8] sm:$0xff] %vm142_vm0, %v3312_v55  ;;  %vm3287_vm13 = vmor %vm3285_vm12, %vm3286_vm11  ;;  %v3306_v59 = vand.u32 2147483648, %v3249_v61  ;;  %v3304_v40 = vand.u32 2147483647, %v3249_v61  ;;  %vm3300_vm3 = vweird.f32 %v3249_v61 }
0x1568   :  { %v3282_v52 = vsub.f32 1.0, %v3281_v32 }
0x1569   :  { %v3307_v21 = vor.u32 1.1754944e-38, %v3306_v59  ;;  %vm3305_vm5 = vcmp.eq.f32.partialorder %v3304_v40, 8.507059e+37 }
0x156a   :  { %v3283_v19 = vmul.f32 %v3981_v28, %v3282_v52 }
0x156c   :  { %v3284_v23 = vadd.f32 %v3981_v28, %v3283_v19 }
0x156d   :  { %v3983_v1 = vpop.eup %3982 }
0x156e   :  { %v3288_v31 = vsel %vm3287_vm13, %v3981_v28, %v3284_v23  ;;  %v3296_v39 = vmul.f32 %v3983_v1, %v3249_v61  ;;  %vm3301_vm2 = vweird.f32 %v3983_v1 }
0x156f   :  { %v3293_v36 = vsel %vm3290_vm14, %v3292_v6, %v3288_v31  ;;  %vm3302_vm4 = vmor %vm3300_vm3, %vm3301_vm2 }
0x1570   :  { %v3294_v26 = vmul.f32 %v3293_v36, %v3196_v0  ;;  %v3297_v38 = vsub.f32 1.0, %v3296_v39 }
0x1572   :  { %v3298_v34 = vmul.f32 %v3983_v1, %v3297_v38  ;;  %v3313_v46 = vadd.f32 %v5426_v16, %v3294_v26 }
0x1574   :  { %v3299_v14 = vadd.f32 %v3983_v1, %v3298_v34  ;;  %3317 = vst.msk [vmem:[#allocation4 + $0x10] sm:$0xff] %vm142_vm0, %v3313_v46 }
0x1576   :  { %v3303_v47 = vsel %vm3302_vm4, %v3983_v1, %v3299_v14 }
0x1577   :  { %v3308_v41 = vsel %vm3305_vm5, %v3307_v21, %v3303_v47 }
0x1578   :  { %v3309_v22 = vmul.f32 %v3308_v41, %v3197_v42 }
0x157a   :  { %v3314_v9 = vadd.f32 %v5426_v16, %v3309_v22 }
0x157c   :  { %3318 = vst.msk [vmem:[#allocation4 + $0x18] sm:$0xff] %vm142_vm0, %v3314_v9 }
0x157d   :  { %3344 = dma.vmem_to_hbm [thread:$0]  %s3337_s8, 512, %s3339_s22, [#allocation5], %s4045_s9, %s4045_s9, %s4046_s17  }
0x157e   :  { %4038 = dma.done.wait [#allocation3], 256  }
0x157f   :  { %4039 = vsyncadd [#allocation3], 4294967040 }
0x1580   :  { %4040 = dma.done.wait [#allocation5], 512  }
0x1581   :  { %4041 = vsyncadd [#allocation5], 4294966784 }
0x1582   :  { %3353 = vsyncpa [#allocation3], 1 }
0x1583   :  { %3354 = vsyncpa [#allocation5], 1 }

</bundles_post_ra>
